<compile_context>
chip_gen: v7x
topology: tpu7x:2x2x1
jax: 0.10.0
libtpu: 0.0.40
codegen_flags: <defaults>
</compile_context>

<pallas_src>
import numpy as np
import jax
import jax.numpy as jnp
from jax.experimental import pallas as pl
from jax.experimental.pallas import tpu as pltpu

# ----------------------------- small synthetic config -----------------------------
N_BATCH, C, H, W = 2, 4, 16, 16          # input image:  (2, 4, 16, 16)
HW = H * W                                # pixels per sample on the lane axis (256)
HID = 32                                  # surrogate UNet hidden width
T_DIFF = 20                               # num_diffusion_timesteps
T_SAMPLE = 4                              # num_sampling_timesteps  -> skip = 5
BETA_SCHEDULE = "linear"
BETA_START, BETA_END = 1e-4, 2e-2


# ----------------------------- beta schedule (verbatim) ---------------------------
def get_beta_schedule(beta_schedule, *, beta_start, beta_end, num_diffusion_timesteps):
    def sigmoid(x):
        return 1 / (np.exp(-x) + 1)

    if beta_schedule == "quad":
        betas = np.linspace(beta_start ** 0.5, beta_end ** 0.5,
                            num_diffusion_timesteps, dtype=np.float64) ** 2
    elif beta_schedule == "linear":
        betas = np.linspace(beta_start, beta_end, num_diffusion_timesteps, dtype=np.float64)
    elif beta_schedule == "const":
        betas = beta_end * np.ones(num_diffusion_timesteps, dtype=np.float64)
    elif beta_schedule == "jsd":
        betas = 1.0 / np.linspace(num_diffusion_timesteps, 1,
                                  num_diffusion_timesteps, dtype=np.float64)
    elif beta_schedule == "sigmoid":
        betas = np.linspace(-6, 6, num_diffusion_timesteps)
        betas = sigmoid(betas) * (beta_end - beta_start) + beta_start
    else:
        raise NotImplementedError(beta_schedule)
    assert betas.shape == (num_diffusion_timesteps,)
    return betas


# ----------------------------- BlockSpec helpers -----------------------------------
def _full_spec(shape):
    zeros = (0,) * len(shape)
    return pl.BlockSpec(shape, lambda i, _z=zeros: _z)


def _smem_spec(shape):
    zeros = (0,) * len(shape)
    return pl.BlockSpec(shape, lambda i, _z=zeros: _z,
                        memory_space=pltpu.MemorySpace.SMEM)


# ----------------------------- Pallas kernels --------------------------------------
def _ctdn_decom_kernel(x_ref, w_ref, b_ref, r_ref, l_ref, f_ref, hl_ref):
    # TODO(synk): the real CTDN stage-1 decomposition (loaded from a checkpoint in the
    # original code) is not provided; this sigmoid 1x1-conv surrogate keeps the same
    # output heads (low_R, low_L, low_fea, high_L), each (N, C, HW).
    w = w_ref[...]                                    # (4C, C)
    b = b_ref[...]                                    # (4C, 1)
    for n in range(x_ref.shape[0]):
        y = jax.nn.sigmoid(
            jnp.dot(w, x_ref[n], preferred_element_type=jnp.float32) + b)  # (4C, HW)
        r_ref[n] = y[0 * C:1 * C]
        l_ref[n] = y[1 * C:2 * C]
        f_ref[n] = y[2 * C:3 * C]
        hl_ref[n] = y[3 * C:4 * C]


def _ctdn_rec_kernel(x_ref, pf_ref, wa_ref, wb_ref, b_ref, o_ref):
    # Reconstruction head: sigmoid(W_rec @ cat([inputs, pred_fea])) with the concat
    # removed by splitting W_rec row-wise into wa (inputs) + wb (pred_fea).
    wa = wa_ref[...]; wb = wb_ref[...]; b = b_ref[...]
    for n in range(x_ref.shape[0]):
        y = (jnp.dot(wa, x_ref[n], preferred_element_type=jnp.float32)
             + jnp.dot(wb, pf_ref[n], preferred_element_type=jnp.float32) + b)
        o_ref[n] = jax.nn.sigmoid(y)


def _ddim_loop_kernel(coef_ref, low_ref, xt0_ref, z_ref, w1a_ref, w1b_ref,
                      bias_ref, w2_ref, b2_ref, out_ref):
    # Fused DDIM sampling loop (sample_training):
    #   xt_{s+1} = k_x * xt_s + k_e * UNet([x_cond, xt_s], t_s) + k_z * z_s
    # coef_ref (SMEM, (T,3)): per-step [k_x, k_e, k_z] (c2 clamped >= 0 outside).
    # bias_ref ((T, HID, 1)): per-step (b1 + temb(t_s)) column.
    # data_transform of x_cond and inverse_data_transform of the result are fused in.
    w1a = w1a_ref[...]                                # (HID, C)
    w1b = w1b_ref[...]                                # (HID, C)
    w2 = w2_ref[...]                                  # (C, HID)
    b2 = b2_ref[...]                                  # (C, 1)
    n_steps = z_ref.shape[0]
    for n in range(low_ref.shape[0]):
        xc = 2.0 * low_ref[n] - 1.0                   # data_transform(low_fea)
        # loop-invariant condition branch of the first layer, computed once:
        cond = jnp.dot(w1a, xc, preferred_element_type=jnp.float32)     # (HID, HW)
        xt = xt0_ref[n]                               # (C, HW), stays resident in VMEM/vregs
        for s in range(n_steps):                      # statically unrolled (T_SAMPLE = 4)
            h = cond + jnp.dot(w1b, xt, preferred_element_type=jnp.float32) + bias_ref[s]
            h = h * jax.nn.sigmoid(h)                 # SiLU
            et = jnp.dot(w2, h, preferred_element_type=jnp.float32) + b2
            xt = (coef_ref[s, 0] * xt + coef_ref[s, 1] * et
                  + coef_ref[s, 2] * z_ref[s, n])
        out_ref[n] = jnp.clip((xt + 1.0) * 0.5, 0.0, 1.0)   # inverse_data_transform


def _train_noise_kernel(lr_ref, ll_ref, lf_ref, hl_ref, e_ref, qc_ref, temb_ref,
                        w1a_ref, w1b_ref, w2_ref, b2_ref, noise_ref, refer_ref):
    # Fused training branch: data_transform + q_sample + UNet noise prediction
    # + reference_fea, one kernel.  qc_ref (SMEM, (N,2)) = [sqrt(a_n), sqrt(1-a_n)].
    w1a = w1a_ref[...]; w1b = w1b_ref[...]
    w2 = w2_ref[...]; b2 = b2_ref[...]
    for n in range(lr_ref.shape[0]):
        low_R = lr_ref[n]
        low_L = ll_ref[n]
        xc = 2.0 * lf_ref[n] - 1.0                    # data_transform(low_fea)
        x_hi = 2.0 * (low_R * hl_ref[n]) - 1.0        # data_transform(low_R * high_L)
        x = x_hi * qc_ref[n, 0] + e_ref[n] * qc_ref[n, 1]     # q_sample
        h = (jnp.dot(w1a, xc, preferred_element_type=jnp.float32)
             + jnp.dot(w1b, x, preferred_element_type=jnp.float32) + temb_ref[n])
        h = h * jax.nn.sigmoid(h)                     # SiLU
        noise_ref[n] = jnp.dot(w2, h, preferred_element_type=jnp.float32) + b2
        # low_L = sigmoid(.) in (0,1)  =>  pow(low_L, 0.2) == exp(0.2 * log(low_L))
        refer_ref[n] = low_R * jnp.exp(0.2 * jnp.log(low_L))


# ----------------------------- surrogate sub-networks -------------------------------
def timestep_embedding(t, dim):
    # TODO(synk): the real DiffusionUNet(config) is not provided; this sinusoidal
    # embedding + per-pixel two-layer MLP surrogate keeps the same I/O contract.
    half = dim // 2
    freqs = jnp.exp(-np.log(10000.0) * jnp.arange(half, dtype=jnp.float32) / half)
    args = t[:, None].astype(jnp.float32) * freqs[None, :]
    return jnp.concatenate([jnp.sin(args), jnp.cos(args)], axis=-1)   # (n, dim)


def ctdn_decom(p, x_flat):
    n = x_flat.shape[0]
    img = _full_spec((n, C, HW))
    return pl.pallas_call(
        _ctdn_decom_kernel,
        out_shape=tuple(jax.ShapeDtypeStruct((n, C, HW), jnp.float32) for _ in range(4)),
        grid=(1,),
        in_specs=[img, _full_spec((4 * C, C)), _full_spec((4 * C, 1))],
        out_specs=[img, img, img, img],
    )(x_flat, p["w_dec_t"], p["b_dec"])


def ctdn_reconstruct(p, x_flat, pred_fea_flat):
    n = x_flat.shape[0]
    img = _full_spec((n, C, HW))
    return pl.pallas_call(
        _ctdn_rec_kernel,
        out_shape=jax.ShapeDtypeStruct((n, C, HW), jnp.float32),
        grid=(1,),
        in_specs=[img, img, _full_spec((C, C)), _full_spec((C, C)), _full_spec((C, 1))],
        out_specs=img,
    )(x_flat, pred_fea_flat, p["w_rec_a_t"], p["w_rec_b_t"], p["b_rec"])


def ddim_sample(p_unet, low_fea_flat, betas, key, *, eta=0.0):
    """Fused DDIM sampling loop (the whole sample_training) in one pallas_call."""
    n = low_fea_flat.shape[0]
    skip = T_DIFF // T_SAMPLE
    seq = list(range(0, T_DIFF, skip))
    seq_next = [-1] + seq[:-1]
    seq_rev = np.array(list(reversed(seq)), dtype=np.int32)
    seq_next_rev = np.array(list(reversed(seq_next)), dtype=np.int32)
    n_steps = len(seq_rev)

    # compute_alpha hoisted out of the loop: alpha_bar with the leading 1.0, gathered
    # once for every step; DDIM update folded into 3 scalars per step.
    abar_ext = jnp.cumprod(jnp.concatenate([jnp.ones((1,), jnp.float32), 1.0 - betas]))
    at = abar_ext[seq_rev + 1]
    atn = abar_ext[seq_next_rev + 1]
    c1 = eta * jnp.sqrt((1.0 - at / atn) * (1.0 - atn) / (1.0 - at))
    c2 = jnp.sqrt(jnp.maximum(1.0 - atn - c1 * c1, 0.0))    # clamp: avoids NaN when eta>0
    k_x = jnp.sqrt(atn / at)
    k_e = c2 - jnp.sqrt(atn * (1.0 - at) / at)
    coefs = jnp.stack([k_x, k_e, c1], axis=1)                # (T, 3) -> SMEM

    # per-step (b1 + temb(t)) column; t is the same scalar for the whole batch per step.
    temb = timestep_embedding(jnp.asarray(seq_rev, jnp.float32), HID)   # (T, HID)
    bias_steps = (temb + p_unet["b1"][None, :])[:, :, None]             # (T, HID, 1)

    k0, k1 = jax.random.split(key)
    xt0 = jax.random.normal(k0, (n, C, HW), jnp.float32)
    z_all = jax.random.normal(k1, (n_steps, n, C, HW), jnp.float32)

    img = _full_spec((n, C, HW))
    return pl.pallas_call(
        _ddim_loop_kernel,
        out_shape=jax.ShapeDtypeStruct((n, C, HW), jnp.float32),
        grid=(1,),
        in_specs=[
            _smem_spec((n_steps, 3)),                 # per-step DDIM coefficients
            img,                                      # low_fea (condition, raw)
            img,                                      # initial xt noise
            _full_spec((n_steps, n, C, HW)),          # per-step z noise
            _full_spec((HID, C)),                     # W1 (condition half), transposed
            _full_spec((HID, C)),                     # W1 (xt half), transposed
            _full_spec((n_steps, HID, 1)),            # b1 + temb per step
            _full_spec((C, HID)),                     # W2 transposed
            _full_spec((C, 1)),                       # b2 column
        ],
        out_specs=img,
    )(coefs, low_fea_flat, xt0, z_all, p_unet["w1a_t"], p_unet["w1b_t"],
      bias_steps, p_unet["w2_t"], p_unet["b2_col"])


def train_noise(p_unet, heads, e, a, t_float):
    low_R, low_L, low_fea, high_L = heads
    n = low_R.shape[0]
    qcoef = jnp.stack([jnp.sqrt(a), jnp.sqrt(1.0 - a)], axis=1)       # (N, 2) -> SMEM
    temb = timestep_embedding(t_float, HID)                           # (N, HID)
    temb_b1 = (temb + p_unet["b1"][None, :])[:, :, None]              # (N, HID, 1)
    img = _full_spec((n, C, HW))
    return pl.pallas_call(
        _train_noise_kernel,
        out_shape=(jax.ShapeDtypeStruct((n, C, HW), jnp.float32),
                   jax.ShapeDtypeStruct((n, C, HW), jnp.float32)),
        grid=(1,),
        in_specs=[img, img, img, img, img,
                  _smem_spec((n, 2)),
                  _full_spec((n, HID, 1)),
                  _full_spec((HID, C)), _full_spec((HID, C)),
                  _full_spec((C, HID)), _full_spec((C, 1))],
        out_specs=[img, img],
    )(low_R, low_L, low_fea, high_L, e, qcoef, temb_b1,
      p_unet["w1a_t"], p_unet["w1b_t"], p_unet["w2_t"], p_unet["b2_col"])


# ----------------------------- Net.forward ------------------------------------------
def net_forward(params, betas, inputs, key, *, training):
    n, c, h, w = inputs.shape
    x_flat = inputs.reshape(n, c, h * w)              # NCHW -> (N, C, HW): free reshape
    data_dict = {}
    low_R, low_L, low_fea, high_L = ctdn_decom(params["ctdn"], x_flat)
    if training:
        key, k_t, k_e, k_s = jax.random.split(key, 4)
        t_half = jax.random.randint(k_t, (n // 2 + 1,), 0, T_DIFF)
        t = jnp.concatenate([t_half, T_DIFF - t_half - 1], axis=0)[:n]
        a = jnp.cumprod(1.0 - betas)[t]                               # (N,)
        e = jax.random.normal(k_e, (n, c, h * w), jnp.float32)
        noise_output, reference_fea = train_noise(
            params["unet"], (low_R, low_L, low_fea, high_L), e, a, t.astype(jnp.float32))
        pred_fea = ddim_sample(params["unet"], low_fea, betas, k_s)
        data_dict["noise_output"] = noise_output.reshape(n, c, h, w)
        data_dict["e"] = e.reshape(n, c, h, w)
        data_dict["pred_fea"] = pred_fea.reshape(n, c, h, w)
        data_dict["reference_fea"] = reference_fea.reshape(n, c, h, w)
    else:
        key, k_s = jax.random.split(key)
        pred_fea = ddim_sample(params["unet"], low_fea, betas, k_s)
        pred_x = ctdn_reconstruct(params["ctdn"], x_flat, pred_fea)
        data_dict["pred_x"] = pred_x.reshape(n, c, h, w)
    return data_dict


# ----------------------------- params ------------------------------------------------
def init_params(key):
    # Weights are stored directly in "kernel layout" (pre-transposed, bias columns) so no
    # runtime transposes are needed on the forward path.
    ks = jax.random.split(key, 6)
    s = 0.1
    return {
        "ctdn": {
            "w_dec_t": s * jax.random.normal(ks[0], (4 * C, C), jnp.float32),
            "b_dec": jnp.zeros((4 * C, 1), jnp.float32),
            "w_rec_a_t": s * jax.random.normal(ks[1], (C, C), jnp.float32),
            "w_rec_b_t": s * jax.random.normal(ks[2], (C, C), jnp.float32),
            "b_rec": jnp.zeros((C, 1), jnp.float32),
        },
        "unet": {
            "w1a_t": s * jax.random.normal(ks[3], (HID, C), jnp.float32),
            "w1b_t": s * jax.random.normal(ks[4], (HID, C), jnp.float32),
            "b1": jnp.zeros((HID,), jnp.float32),
            "w2_t": s * jax.random.normal(ks[5], (C, HID), jnp.float32),
            "b2_col": jnp.zeros((C, 1), jnp.float32),
        },
    }


if __name__ == "__main__":
    root = jax.random.PRNGKey(0)
    k_param, k_in, k_eval, k_train = jax.random.split(root, 4)

    params = init_params(k_param)
    inputs = jax.random.uniform(k_in, (N_BATCH, C, H, W), jnp.float32)   # image-like, NCHW

    betas = jnp.asarray(
        get_beta_schedule(BETA_SCHEDULE, beta_start=BETA_START, beta_end=BETA_END,
                          num_diffusion_timesteps=T_DIFF),
        dtype=jnp.float32)

    fwd = jax.jit(net_forward, static_argnames=("training",))

    out_eval = fwd(params, betas, inputs, k_eval, training=False)
    out_train = fwd(params, betas, inputs, k_train, training=True)
    jax.block_until_ready((out_eval, out_train))

    assert out_eval["pred_x"].shape == (N_BATCH, C, H, W)
    assert out_train["noise_output"].shape == (N_BATCH, C, H, W)
    assert out_train["pred_fea"].shape == (N_BATCH, C, H, W)
    assert out_train["reference_fea"].shape == (N_BATCH, C, H, W)
    assert bool(jnp.all(jnp.isfinite(out_eval["pred_x"])))
    assert bool(jnp.all(jnp.isfinite(out_train["noise_output"])))
    assert bool(jnp.all(jnp.isfinite(out_train["pred_fea"])))
    print("KERNEL_OK")
</pallas_src>

<mosaic_0001>
module attributes {stable_mosaic.version = 11 : i64} {
  func.func @_ctdn_decom_kernel(%arg0: i32, %arg1: memref<2x4x256xf32, #tpu.memory_space<vmem>>, %arg2: memref<16x4xf32, #tpu.memory_space<vmem>>, %arg3: memref<16x1xf32, #tpu.memory_space<vmem>>, %arg4: memref<2x4x256xf32, #tpu.memory_space<vmem>>, %arg5: memref<2x4x256xf32, #tpu.memory_space<vmem>>, %arg6: memref<2x4x256xf32, #tpu.memory_space<vmem>>, %arg7: memref<2x4x256xf32, #tpu.memory_space<vmem>>) attributes {dimension_semantics = [#tpu.dimension_semantics<arbitrary>], iteration_bounds = array<i64: 1>, scalar_prefetch = 0 : i64, scratch_operands = 0 : i64, tpu.core_type = #tpu.core_type<tc>, window_params = [{pipeline_mode = #tpu.pipeline_mode<synchronous>, transform_indices = @transform_0, window_bounds = array<i64: 2, 4, 256>}, {pipeline_mode = #tpu.pipeline_mode<synchronous>, transform_indices = @transform_1, window_bounds = array<i64: 16, 4>}, {pipeline_mode = #tpu.pipeline_mode<synchronous>, transform_indices = @transform_2, window_bounds = array<i64: 16, 1>}, {pipeline_mode = #tpu.pipeline_mode<synchronous>, transform_indices = @transform_3, window_bounds = array<i64: 2, 4, 256>}, {pipeline_mode = #tpu.pipeline_mode<synchronous>, transform_indices = @transform_4, window_bounds = array<i64: 2, 4, 256>}, {pipeline_mode = #tpu.pipeline_mode<synchronous>, transform_indices = @transform_5, window_bounds = array<i64: 2, 4, 256>}, {pipeline_mode = #tpu.pipeline_mode<synchronous>, transform_indices = @transform_6, window_bounds = array<i64: 2, 4, 256>}]} {
    %c0 = arith.constant 0 : index
    %c0_0 = arith.constant 0 : index
    %0 = vector.load %arg2[%c0, %c0_0] : memref<16x4xf32, #tpu.memory_space<vmem>>, vector<16x4xf32>
    %c0_1 = arith.constant 0 : index
    %c0_2 = arith.constant 0 : index
    %1 = vector.load %arg3[%c0_1, %c0_2] : memref<16x1xf32, #tpu.memory_space<vmem>>, vector<16x1xf32>
    %c0_3 = arith.constant 0 : index
    %c0_4 = arith.constant 0 : index
    %c0_5 = arith.constant 0 : index
    %2 = vector.load %arg1[%c0_3, %c0_4, %c0_5] : memref<2x4x256xf32, #tpu.memory_space<vmem>>, vector<1x4x256xf32>
    %3 = vector.shape_cast %2 : vector<1x4x256xf32> to vector<4x256xf32>
    %cst = arith.constant dense<0.000000e+00> : vector<16x256xf32>
    %4 = tpu.matmul %0, %3, %cst {dimension_numbers = #tpu.dot_dimension_numbers<[1], [0], [0], [1], [0, 0, 1, 1], [], []>} : vector<16x4xf32>, vector<4x256xf32>, vector<16x256xf32> -> vector<16x256xf32>
    %5 = vector.broadcast %1 : vector<16x1xf32> to vector<16x256xf32>
    %6 = arith.addf %4, %5 : vector<16x256xf32>
    %7 = arith.negf %6 : vector<16x256xf32>
    %8 = math.exp %7 : vector<16x256xf32>
    %cst_6 = arith.constant 1.000000e+00 : f32
    %9 = vector.broadcast %cst_6 : f32 to vector<16x256xf32>
    %10 = arith.addf %9, %8 : vector<16x256xf32>
    %11 = arith.divf %9, %10 : vector<16x256xf32>
    %12 = vector.extract_strided_slice %11 {offsets = [0, 0], sizes = [4, 256], strides = [1, 1]} : vector<16x256xf32> to vector<4x256xf32>
    %c0_7 = arith.constant 0 : index
    %c0_8 = arith.constant 0 : index
    %c0_9 = arith.constant 0 : index
    %13 = vector.load %arg4[%c0_7, %c0_8, %c0_9] : memref<2x4x256xf32, #tpu.memory_space<vmem>>, vector<1x4x256xf32>
    %14 = vector.shape_cast %13 : vector<1x4x256xf32> to vector<4x256xf32>
    %15 = vector.shape_cast %12 : vector<4x256xf32> to vector<1x4x256xf32>
    tpu.vector_store %arg4[%c0_7, %c0_8, %c0_9], %15 {strides = array<i32>} : memref<2x4x256xf32, #tpu.memory_space<vmem>>, vector<1x4x256xf32>,
    %16 = vector.extract_strided_slice %11 {offsets = [4, 0], sizes = [4, 256], strides = [1, 1]} : vector<16x256xf32> to vector<4x256xf32>
    %c0_10 = arith.constant 0 : index
    %c0_11 = arith.constant 0 : index
    %c0_12 = arith.constant 0 : index
    %17 = vector.load %arg5[%c0_10, %c0_11, %c0_12] : memref<2x4x256xf32, #tpu.memory_space<vmem>>, vector<1x4x256xf32>
    %18 = vector.shape_cast %17 : vector<1x4x256xf32> to vector<4x256xf32>
    %19 = vector.shape_cast %16 : vector<4x256xf32> to vector<1x4x256xf32>
    tpu.vector_store %arg5[%c0_10, %c0_11, %c0_12], %19 {strides = array<i32>} : memref<2x4x256xf32, #tpu.memory_space<vmem>>, vector<1x4x256xf32>,
    %20 = vector.extract_strided_slice %11 {offsets = [8, 0], sizes = [4, 256], strides = [1, 1]} : vector<16x256xf32> to vector<4x256xf32>
    %c0_13 = arith.constant 0 : index
    %c0_14 = arith.constant 0 : index
    %c0_15 = arith.constant 0 : index
    %21 = vector.load %arg6[%c0_13, %c0_14, %c0_15] : memref<2x4x256xf32, #tpu.memory_space<vmem>>, vector<1x4x256xf32>
    %22 = vector.shape_cast %21 : vector<1x4x256xf32> to vector<4x256xf32>
    %23 = vector.shape_cast %20 : vector<4x256xf32> to vector<1x4x256xf32>
    tpu.vector_store %arg6[%c0_13, %c0_14, %c0_15], %23 {strides = array<i32>} : memref<2x4x256xf32, #tpu.memory_space<vmem>>, vector<1x4x256xf32>,
    %24 = vector.extract_strided_slice %11 {offsets = [12, 0], sizes = [4, 256], strides = [1, 1]} : vector<16x256xf32> to vector<4x256xf32>
    %c0_16 = arith.constant 0 : index
    %c0_17 = arith.constant 0 : index
    %c0_18 = arith.constant 0 : index
    %25 = vector.load %arg7[%c0_16, %c0_17, %c0_18] : memref<2x4x256xf32, #tpu.memory_space<vmem>>, vector<1x4x256xf32>
    %26 = vector.shape_cast %25 : vector<1x4x256xf32> to vector<4x256xf32>
    %27 = vector.shape_cast %24 : vector<4x256xf32> to vector<1x4x256xf32>
    tpu.vector_store %arg7[%c0_16, %c0_17, %c0_18], %27 {strides = array<i32>} : memref<2x4x256xf32, #tpu.memory_space<vmem>>, vector<1x4x256xf32>,
    %c1 = arith.constant 1 : index
    %c0_19 = arith.constant 0 : index
    %c0_20 = arith.constant 0 : index
    %28 = vector.load %arg1[%c1, %c0_19, %c0_20] : memref<2x4x256xf32, #tpu.memory_space<vmem>>, vector<1x4x256xf32>
    %29 = vector.shape_cast %28 : vector<1x4x256xf32> to vector<4x256xf32>
    %cst_21 = arith.constant dense<0.000000e+00> : vector<16x256xf32>
    %30 = tpu.matmul %0, %29, %cst_21 {dimension_numbers = #tpu.dot_dimension_numbers<[1], [0], [0], [1], [0, 0, 1, 1], [], []>} : vector<16x4xf32>, vector<4x256xf32>, vector<16x256xf32> -> vector<16x256xf32>
    %31 = vector.broadcast %1 : vector<16x1xf32> to vector<16x256xf32>
    %32 = arith.addf %30, %31 : vector<16x256xf32>
    %33 = arith.negf %32 : vector<16x256xf32>
    %34 = math.exp %33 : vector<16x256xf32>
    %cst_22 = arith.constant 1.000000e+00 : f32
    %35 = vector.broadcast %cst_22 : f32 to vector<16x256xf32>
    %36 = arith.addf %35, %34 : vector<16x256xf32>
    %37 = arith.divf %35, %36 : vector<16x256xf32>
    %38 = vector.extract_strided_slice %37 {offsets = [0, 0], sizes = [4, 256], strides = [1, 1]} : vector<16x256xf32> to vector<4x256xf32>
    %c1_23 = arith.constant 1 : index
    %c0_24 = arith.constant 0 : index
    %c0_25 = arith.constant 0 : index
    %39 = vector.load %arg4[%c1_23, %c0_24, %c0_25] : memref<2x4x256xf32, #tpu.memory_space<vmem>>, vector<1x4x256xf32>
    %40 = vector.shape_cast %39 : vector<1x4x256xf32> to vector<4x256xf32>
    %41 = vector.shape_cast %38 : vector<4x256xf32> to vector<1x4x256xf32>
    tpu.vector_store %arg4[%c1_23, %c0_24, %c0_25], %41 {strides = array<i32>} : memref<2x4x256xf32, #tpu.memory_space<vmem>>, vector<1x4x256xf32>,
    %42 = vector.extract_strided_slice %37 {offsets = [4, 0], sizes = [4, 256], strides = [1, 1]} : vector<16x256xf32> to vector<4x256xf32>
    %c1_26 = arith.constant 1 : index
    %c0_27 = arith.constant 0 : index
    %c0_28 = arith.constant 0 : index
    %43 = vector.load %arg5[%c1_26, %c0_27, %c0_28] : memref<2x4x256xf32, #tpu.memory_space<vmem>>, vector<1x4x256xf32>
    %44 = vector.shape_cast %43 : vector<1x4x256xf32> to vector<4x256xf32>
    %45 = vector.shape_cast %42 : vector<4x256xf32> to vector<1x4x256xf32>
    tpu.vector_store %arg5[%c1_26, %c0_27, %c0_28], %45 {strides = array<i32>} : memref<2x4x256xf32, #tpu.memory_space<vmem>>, vector<1x4x256xf32>,
    %46 = vector.extract_strided_slice %37 {offsets = [8, 0], sizes = [4, 256], strides = [1, 1]} : vector<16x256xf32> to vector<4x256xf32>
    %c1_29 = arith.constant 1 : index
    %c0_30 = arith.constant 0 : index
    %c0_31 = arith.constant 0 : index
    %47 = vector.load %arg6[%c1_29, %c0_30, %c0_31] : memref<2x4x256xf32, #tpu.memory_space<vmem>>, vector<1x4x256xf32>
    %48 = vector.shape_cast %47 : vector<1x4x256xf32> to vector<4x256xf32>
    %49 = vector.shape_cast %46 : vector<4x256xf32> to vector<1x4x256xf32>
    tpu.vector_store %arg6[%c1_29, %c0_30, %c0_31], %49 {strides = array<i32>} : memref<2x4x256xf32, #tpu.memory_space<vmem>>, vector<1x4x256xf32>,
    %50 = vector.extract_strided_slice %37 {offsets = [12, 0], sizes = [4, 256], strides = [1, 1]} : vector<16x256xf32> to vector<4x256xf32>
    %c1_32 = arith.constant 1 : index
    %c0_33 = arith.constant 0 : index
    %c0_34 = arith.constant 0 : index
    %51 = vector.load %arg7[%c1_32, %c0_33, %c0_34] : memref<2x4x256xf32, #tpu.memory_space<vmem>>, vector<1x4x256xf32>
    %52 = vector.shape_cast %51 : vector<1x4x256xf32> to vector<4x256xf32>
    %53 = vector.shape_cast %50 : vector<4x256xf32> to vector<1x4x256xf32>
    tpu.vector_store %arg7[%c1_32, %c0_33, %c0_34], %53 {strides = array<i32>} : memref<2x4x256xf32, #tpu.memory_space<vmem>>, vector<1x4x256xf32>,
    return
  }
  func.func @transform_0(%arg0: i32) -> (i32, i32, i32) {
    %c0_i32 = arith.constant 0 : i32
    %c0_i32_0 = arith.constant 0 : i32
    %c0_i32_1 = arith.constant 0 : i32
    %c0_i32_2 = arith.constant 0 : i32
    return %c0_i32, %c0_i32_0, %c0_i32_1 : i32, i32, i32
  }
  func.func @transform_1(%arg0: i32) -> (i32, i32) {
    %c0_i32 = arith.constant 0 : i32
    %c0_i32_0 = arith.constant 0 : i32
    %c0_i32_1 = arith.constant 0 : i32
    return %c0_i32, %c0_i32_0 : i32, i32
  }
  func.func @transform_2(%arg0: i32) -> (i32, i32) {
    %c0_i32 = arith.constant 0 : i32
    %c0_i32_0 = arith.constant 0 : i32
    %c0_i32_1 = arith.constant 0 : i32
    return %c0_i32, %c0_i32_0 : i32, i32
  }
  func.func @transform_3(%arg0: i32) -> (i32, i32, i32) {
    %c0_i32 = arith.constant 0 : i32
    %c0_i32_0 = arith.constant 0 : i32
    %c0_i32_1 = arith.constant 0 : i32
    %c0_i32_2 = arith.constant 0 : i32
    return %c0_i32, %c0_i32_0, %c0_i32_1 : i32, i32, i32
  }
  func.func @transform_4(%arg0: i32) -> (i32, i32, i32) {
    %c0_i32 = arith.constant 0 : i32
    %c0_i32_0 = arith.constant 0 : i32
    %c0_i32_1 = arith.constant 0 : i32
    %c0_i32_2 = arith.constant 0 : i32
    return %c0_i32, %c0_i32_0, %c0_i32_1 : i32, i32, i32
  }
  func.func @transform_5(%arg0: i32) -> (i32, i32, i32) {
    %c0_i32 = arith.constant 0 : i32
    %c0_i32_0 = arith.constant 0 : i32
    %c0_i32_1 = arith.constant 0 : i32
    %c0_i32_2 = arith.constant 0 : i32
    return %c0_i32, %c0_i32_0, %c0_i32_1 : i32, i32, i32
  }
  func.func @transform_6(%arg0: i32) -> (i32, i32, i32) {
    %c0_i32 = arith.constant 0 : i32
    %c0_i32_0 = arith.constant 0 : i32
    %c0_i32_1 = arith.constant 0 : i32
    %c0_i32_2 = arith.constant 0 : i32
    return %c0_i32, %c0_i32_0, %c0_i32_1 : i32, i32, i32
  }
}

module attributes {stable_mosaic.version = 11 : i64} {
  func.func @_ddim_loop_kernel(%arg0: i32, %arg1: memref<4x3xf32, #tpu.memory_space<smem>>, %arg2: memref<2x4x256xf32, #tpu.memory_space<vmem>>, %arg3: memref<2x4x256xf32, #tpu.memory_space<vmem>>, %arg4: memref<4x2x4x256xf32, #tpu.memory_space<vmem>>, %arg5: memref<32x4xf32, #tpu.memory_space<vmem>>, %arg6: memref<32x4xf32, #tpu.memory_space<vmem>>, %arg7: memref<4x32x1xf32, #tpu.memory_space<vmem>>, %arg8: memref<4x32xf32, #tpu.memory_space<vmem>>, %arg9: memref<4x1xf32, #tpu.memory_space<vmem>>, %arg10: memref<2x4x256xf32, #tpu.memory_space<vmem>>) attributes {dimension_semantics = [#tpu.dimension_semantics<arbitrary>], iteration_bounds = array<i64: 1>, scalar_prefetch = 0 : i64, scratch_operands = 0 : i64, tpu.core_type = #tpu.core_type<tc>, window_params = [{transform_indices = @transform_0, window_bounds = array<i64: 4, 3>}, {pipeline_mode = #tpu.pipeline_mode<synchronous>, transform_indices = @transform_1, window_bounds = array<i64: 2, 4, 256>}, {pipeline_mode = #tpu.pipeline_mode<synchronous>, transform_indices = @transform_2, window_bounds = array<i64: 2, 4, 256>}, {pipeline_mode = #tpu.pipeline_mode<synchronous>, transform_indices = @transform_3, window_bounds = array<i64: 4, 2, 4, 256>}, {pipeline_mode = #tpu.pipeline_mode<synchronous>, transform_indices = @transform_4, window_bounds = array<i64: 32, 4>}, {pipeline_mode = #tpu.pipeline_mode<synchronous>, transform_indices = @transform_5, window_bounds = array<i64: 32, 4>}, {pipeline_mode = #tpu.pipeline_mode<synchronous>, transform_indices = @transform_6, window_bounds = array<i64: 4, 32, 1>}, {pipeline_mode = #tpu.pipeline_mode<synchronous>, transform_indices = @transform_7, window_bounds = array<i64: 4, 32>}, {pipeline_mode = #tpu.pipeline_mode<synchronous>, transform_indices = @transform_8, window_bounds = array<i64: 4, 1>}, {pipeline_mode = #tpu.pipeline_mode<synchronous>, transform_indices = @transform_9, window_bounds = array<i64: 2, 4, 256>}]} {
    %c0 = arith.constant 0 : index
    %c0_0 = arith.constant 0 : index
    %0 = vector.load %arg5[%c0, %c0_0] : memref<32x4xf32, #tpu.memory_space<vmem>>, vector<32x4xf32>
    %c0_1 = arith.constant 0 : index
    %c0_2 = arith.constant 0 : index
    %1 = vector.load %arg6[%c0_1, %c0_2] : memref<32x4xf32, #tpu.memory_space<vmem>>, vector<32x4xf32>
    %c0_3 = arith.constant 0 : index
    %c0_4 = arith.constant 0 : index
    %2 = vector.load %arg8[%c0_3, %c0_4] : memref<4x32xf32, #tpu.memory_space<vmem>>, vector<4x32xf32>
    %c0_5 = arith.constant 0 : index
    %c0_6 = arith.constant 0 : index
    %3 = vector.load %arg9[%c0_5, %c0_6] : memref<4x1xf32, #tpu.memory_space<vmem>>, vector<4x1xf32>
    %c0_7 = arith.constant 0 : index
    %c0_8 = arith.constant 0 : index
    %c0_9 = arith.constant 0 : index
    %4 = vector.load %arg2[%c0_7, %c0_8, %c0_9] : memref<2x4x256xf32, #tpu.memory_space<vmem>>, vector<1x4x256xf32>
    %5 = vector.shape_cast %4 : vector<1x4x256xf32> to vector<4x256xf32>
    %cst = arith.constant 2.000000e+00 : f32
    %6 = vector.broadcast %cst : f32 to vector<4x256xf32>
    %7 = arith.mulf %6, %5 : vector<4x256xf32>
    %cst_10 = arith.constant 1.000000e+00 : f32
    %8 = vector.broadcast %cst_10 : f32 to vector<4x256xf32>
    %9 = arith.subf %7, %8 : vector<4x256xf32>
    %cst_11 = arith.constant dense<0.000000e+00> : vector<32x256xf32>
    %10 = tpu.matmul %0, %9, %cst_11 {dimension_numbers = #tpu.dot_dimension_numbers<[1], [0], [0], [1], [0, 0, 1, 1], [], []>} : vector<32x4xf32>, vector<4x256xf32>, vector<32x256xf32> -> vector<32x256xf32>
    %c0_12 = arith.constant 0 : index
    %c0_13 = arith.constant 0 : index
    %c0_14 = arith.constant 0 : index
    %11 = vector.load %arg3[%c0_12, %c0_13, %c0_14] : memref<2x4x256xf32, #tpu.memory_space<vmem>>, vector<1x4x256xf32>
    %12 = vector.shape_cast %11 : vector<1x4x256xf32> to vector<4x256xf32>
    %cst_15 = arith.constant dense<0.000000e+00> : vector<32x256xf32>
    %13 = tpu.matmul %1, %12, %cst_15 {dimension_numbers = #tpu.dot_dimension_numbers<[1], [0], [0], [1], [0, 0, 1, 1], [], []>} : vector<32x4xf32>, vector<4x256xf32>, vector<32x256xf32> -> vector<32x256xf32>
    %14 = arith.addf %10, %13 : vector<32x256xf32>
    %c0_16 = arith.constant 0 : index
    %c0_17 = arith.constant 0 : index
    %c0_18 = arith.constant 0 : index
    %15 = vector.load %arg7[%c0_16, %c0_17, %c0_18] : memref<4x32x1xf32, #tpu.memory_space<vmem>>, vector<1x32x1xf32>
    %16 = vector.shape_cast %15 : vector<1x32x1xf32> to vector<32x1xf32>
    %17 = vector.broadcast %16 : vector<32x1xf32> to vector<32x256xf32>
    %18 = arith.addf %14, %17 : vector<32x256xf32>
    %19 = arith.negf %18 : vector<32x256xf32>
    %20 = math.exp %19 : vector<32x256xf32>
    %cst_19 = arith.constant 1.000000e+00 : f32
    %21 = vector.broadcast %cst_19 : f32 to vector<32x256xf32>
    %22 = arith.addf %21, %20 : vector<32x256xf32>
    %23 = arith.divf %21, %22 : vector<32x256xf32>
    %24 = arith.mulf %18, %23 : vector<32x256xf32>
    %cst_20 = arith.constant dense<0.000000e+00> : vector<4x256xf32>
    %25 = tpu.matmul %2, %24, %cst_20 {dimension_numbers = #tpu.dot_dimension_numbers<[1], [0], [0], [1], [0, 0, 1, 1], [], []>} : vector<4x32xf32>, vector<32x256xf32>, vector<4x256xf32> -> vector<4x256xf32>
    %26 = vector.broadcast %3 : vector<4x1xf32> to vector<4x256xf32>
    %27 = arith.addf %25, %26 : vector<4x256xf32>
    %c0_21 = arith.constant 0 : index
    %c0_22 = arith.constant 0 : index
    %28 = memref.load %arg1[%c0_21, %c0_22] : memref<4x3xf32, #tpu.memory_space<smem>>
    %29 = vector.broadcast %28 : f32 to vector<4x256xf32>
    %30 = arith.mulf %29, %12 : vector<4x256xf32>
    %c0_23 = arith.constant 0 : index
    %c1 = arith.constant 1 : index
    %31 = memref.load %arg1[%c0_23, %c1] : memref<4x3xf32, #tpu.memory_space<smem>>
    %32 = vector.broadcast %31 : f32 to vector<4x256xf32>
    %33 = arith.mulf %32, %27 : vector<4x256xf32>
    %34 = arith.addf %30, %33 : vector<4x256xf32>
    %c0_24 = arith.constant 0 : index
    %c2 = arith.constant 2 : index
    %35 = memref.load %arg1[%c0_24, %c2] : memref<4x3xf32, #tpu.memory_space<smem>>
    %c0_25 = arith.constant 0 : index
    %c0_26 = arith.constant 0 : index
    %c0_27 = arith.constant 0 : index
    %c0_28 = arith.constant 0 : index
    %36 = vector.load %arg4[%c0_25, %c0_26, %c0_27, %c0_28] : memref<4x2x4x256xf32, #tpu.memory_space<vmem>>, vector<1x1x4x256xf32>
    %37 = vector.shape_cast %36 : vector<1x1x4x256xf32> to vector<4x256xf32>
    %38 = vector.broadcast %35 : f32 to vector<4x256xf32>
    %39 = arith.mulf %38, %37 : vector<4x256xf32>
    %40 = arith.addf %34, %39 : vector<4x256xf32>
    %cst_29 = arith.constant dense<0.000000e+00> : vector<32x256xf32>
    %41 = tpu.matmul %1, %40, %cst_29 {dimension_numbers = #tpu.dot_dimension_numbers<[1], [0], [0], [1], [0, 0, 1, 1], [], []>} : vector<32x4xf32>, vector<4x256xf32>, vector<32x256xf32> -> vector<32x256xf32>
    %42 = arith.addf %10, %41 : vector<32x256xf32>
    %c1_30 = arith.constant 1 : index
    %c0_31 = arith.constant 0 : index
    %c0_32 = arith.constant 0 : index
    %43 = vector.load %arg7[%c1_30, %c0_31, %c0_32] : memref<4x32x1xf32, #tpu.memory_space<vmem>>, vector<1x32x1xf32>
    %44 = vector.shape_cast %43 : vector<1x32x1xf32> to vector<32x1xf32>
    %45 = vector.broadcast %44 : vector<32x1xf32> to vector<32x256xf32>
    %46 = arith.addf %42, %45 : vector<32x256xf32>
    %47 = arith.negf %46 : vector<32x256xf32>
    %48 = math.exp %47 : vector<32x256xf32>
    %cst_33 = arith.constant 1.000000e+00 : f32
    %49 = vector.broadcast %cst_33 : f32 to vector<32x256xf32>
    %50 = arith.addf %49, %48 : vector<32x256xf32>
    %51 = arith.divf %49, %50 : vector<32x256xf32>
    %52 = arith.mulf %46, %51 : vector<32x256xf32>
    %cst_34 = arith.constant dense<0.000000e+00> : vector<4x256xf32>
    %53 = tpu.matmul %2, %52, %cst_34 {dimension_numbers = #tpu.dot_dimension_numbers<[1], [0], [0], [1], [0, 0, 1, 1], [], []>} : vector<4x32xf32>, vector<32x256xf32>, vector<4x256xf32> -> vector<4x256xf32>
    %54 = vector.broadcast %3 : vector<4x1xf32> to vector<4x256xf32>
    %55 = arith.addf %53, %54 : vector<4x256xf32>
    %c1_35 = arith.constant 1 : index
    %c0_36 = arith.constant 0 : index
    %56 = memref.load %arg1[%c1_35, %c0_36] : memref<4x3xf32, #tpu.memory_space<smem>>
    %57 = vector.broadcast %56 : f32 to vector<4x256xf32>
    %58 = arith.mulf %57, %40 : vector<4x256xf32>
    %c1_37 = arith.constant 1 : index
    %c1_38 = arith.constant 1 : index
    %59 = memref.load %arg1[%c1_37, %c1_38] : memref<4x3xf32, #tpu.memory_space<smem>>
    %60 = vector.broadcast %59 : f32 to vector<4x256xf32>
    %61 = arith.mulf %60, %55 : vector<4x256xf32>
    %62 = arith.addf %58, %61 : vector<4x256xf32>
    %c1_39 = arith.constant 1 : index
    %c2_40 = arith.constant 2 : index
    %63 = memref.load %arg1[%c1_39, %c2_40] : memref<4x3xf32, #tpu.memory_space<smem>>
    %c1_41 = arith.constant 1 : index
    %c0_42 = arith.constant 0 : index
    %c0_43 = arith.constant 0 : index
    %c0_44 = arith.constant 0 : index
    %64 = vector.load %arg4[%c1_41, %c0_42, %c0_43, %c0_44] : memref<4x2x4x256xf32, #tpu.memory_space<vmem>>, vector<1x1x4x256xf32>
    %65 = vector.shape_cast %64 : vector<1x1x4x256xf32> to vector<4x256xf32>
    %66 = vector.broadcast %63 : f32 to vector<4x256xf32>
    %67 = arith.mulf %66, %65 : vector<4x256xf32>
    %68 = arith.addf %62, %67 : vector<4x256xf32>
    %cst_45 = arith.constant dense<0.000000e+00> : vector<32x256xf32>
    %69 = tpu.matmul %1, %68, %cst_45 {dimension_numbers = #tpu.dot_dimension_numbers<[1], [0], [0], [1], [0, 0, 1, 1], [], []>} : vector<32x4xf32>, vector<4x256xf32>, vector<32x256xf32> -> vector<32x256xf32>
    %70 = arith.addf %10, %69 : vector<32x256xf32>
    %c2_46 = arith.constant 2 : index
    %c0_47 = arith.constant 0 : index
    %c0_48 = arith.constant 0 : index
    %71 = vector.load %arg7[%c2_46, %c0_47, %c0_48] : memref<4x32x1xf32, #tpu.memory_space<vmem>>, vector<1x32x1xf32>
    %72 = vector.shape_cast %71 : vector<1x32x1xf32> to vector<32x1xf32>
    %73 = vector.broadcast %72 : vector<32x1xf32> to vector<32x256xf32>
    %74 = arith.addf %70, %73 : vector<32x256xf32>
    %75 = arith.negf %74 : vector<32x256xf32>
    %76 = math.exp %75 : vector<32x256xf32>
    %cst_49 = arith.constant 1.000000e+00 : f32
    %77 = vector.broadcast %cst_49 : f32 to vector<32x256xf32>
    %78 = arith.addf %77, %76 : vector<32x256xf32>
    %79 = arith.divf %77, %78 : vector<32x256xf32>
    %80 = arith.mulf %74, %79 : vector<32x256xf32>
    %cst_50 = arith.constant dense<0.000000e+00> : vector<4x256xf32>
    %81 = tpu.matmul %2, %80, %cst_50 {dimension_numbers = #tpu.dot_dimension_numbers<[1], [0], [0], [1], [0, 0, 1, 1], [], []>} : vector<4x32xf32>, vector<32x256xf32>, vector<4x256xf32> -> vector<4x256xf32>
    %82 = vector.broadcast %3 : vector<4x1xf32> to vector<4x256xf32>
    %83 = arith.addf %81, %82 : vector<4x256xf32>
    %c2_51 = arith.constant 2 : index
    %c0_52 = arith.constant 0 : index
    %84 = memref.load %arg1[%c2_51, %c0_52] : memref<4x3xf32, #tpu.memory_space<smem>>
    %85 = vector.broadcast %84 : f32 to vector<4x256xf32>
    %86 = arith.mulf %85, %68 : vector<4x256xf32>
    %c2_53 = arith.constant 2 : index
    %c1_54 = arith.constant 1 : index
    %87 = memref.load %arg1[%c2_53, %c1_54] : memref<4x3xf32, #tpu.memory_space<smem>>
    %88 = vector.broadcast %87 : f32 to vector<4x256xf32>
    %89 = arith.mulf %88, %83 : vector<4x256xf32>
    %90 = arith.addf %86, %89 : vector<4x256xf32>
    %c2_55 = arith.constant 2 : index
    %c2_56 = arith.constant 2 : index
    %91 = memref.load %arg1[%c2_55, %c2_56] : memref<4x3xf32, #tpu.memory_space<smem>>
    %c2_57 = arith.constant 2 : index
    %c0_58 = arith.constant 0 : index
    %c0_59 = arith.constant 0 : index
    %c0_60 = arith.constant 0 : index
    %92 = vector.load %arg4[%c2_57, %c0_58, %c0_59, %c0_60] : memref<4x2x4x256xf32, #tpu.memory_space<vmem>>, vector<1x1x4x256xf32>
    %93 = vector.shape_cast %92 : vector<1x1x4x256xf32> to vector<4x256xf32>
    %94 = vector.broadcast %91 : f32 to vector<4x256xf32>
    %95 = arith.mulf %94, %93 : vector<4x256xf32>
    %96 = arith.addf %90, %95 : vector<4x256xf32>
    %cst_61 = arith.constant dense<0.000000e+00> : vector<32x256xf32>
    %97 = tpu.matmul %1, %96, %cst_61 {dimension_numbers = #tpu.dot_dimension_numbers<[1], [0], [0], [1], [0, 0, 1, 1], [], []>} : vector<32x4xf32>, vector<4x256xf32>, vector<32x256xf32> -> vector<32x256xf32>
    %98 = arith.addf %10, %97 : vector<32x256xf32>
    %c3 = arith.constant 3 : index
    %c0_62 = arith.constant 0 : index
    %c0_63 = arith.constant 0 : index
    %99 = vector.load %arg7[%c3, %c0_62, %c0_63] : memref<4x32x1xf32, #tpu.memory_space<vmem>>, vector<1x32x1xf32>
    %100 = vector.shape_cast %99 : vector<1x32x1xf32> to vector<32x1xf32>
    %101 = vector.broadcast %100 : vector<32x1xf32> to vector<32x256xf32>
    %102 = arith.addf %98, %101 : vector<32x256xf32>
    %103 = arith.negf %102 : vector<32x256xf32>
    %104 = math.exp %103 : vector<32x256xf32>
    %cst_64 = arith.constant 1.000000e+00 : f32
    %105 = vector.broadcast %cst_64 : f32 to vector<32x256xf32>
    %106 = arith.addf %105, %104 : vector<32x256xf32>
    %107 = arith.divf %105, %106 : vector<32x256xf32>
    %108 = arith.mulf %102, %107 : vector<32x256xf32>
    %cst_65 = arith.constant dense<0.000000e+00> : vector<4x256xf32>
    %109 = tpu.matmul %2, %108, %cst_65 {dimension_numbers = #tpu.dot_dimension_numbers<[1], [0], [0], [1], [0, 0, 1, 1], [], []>} : vector<4x32xf32>, vector<32x256xf32>, vector<4x256xf32> -> vector<4x256xf32>
    %110 = vector.broadcast %3 : vector<4x1xf32> to vector<4x256xf32>
    %111 = arith.addf %109, %110 : vector<4x256xf32>
    %c3_66 = arith.constant 3 : index
    %c0_67 = arith.constant 0 : index
    %112 = memref.load %arg1[%c3_66, %c0_67] : memref<4x3xf32, #tpu.memory_space<smem>>
    %113 = vector.broadcast %112 : f32 to vector<4x256xf32>
    %114 = arith.mulf %113, %96 : vector<4x256xf32>
    %c3_68 = arith.constant 3 : index
    %c1_69 = arith.constant 1 : index
    %115 = memref.load %arg1[%c3_68, %c1_69] : memref<4x3xf32, #tpu.memory_space<smem>>
    %116 = vector.broadcast %115 : f32 to vector<4x256xf32>
    %117 = arith.mulf %116, %111 : vector<4x256xf32>
    %118 = arith.addf %114, %117 : vector<4x256xf32>
    %c3_70 = arith.constant 3 : index
    %c2_71 = arith.constant 2 : index
    %119 = memref.load %arg1[%c3_70, %c2_71] : memref<4x3xf32, #tpu.memory_space<smem>>
    %c3_72 = arith.constant 3 : index
    %c0_73 = arith.constant 0 : index
    %c0_74 = arith.constant 0 : index
    %c0_75 = arith.constant 0 : index
    %120 = vector.load %arg4[%c3_72, %c0_73, %c0_74, %c0_75] : memref<4x2x4x256xf32, #tpu.memory_space<vmem>>, vector<1x1x4x256xf32>
    %121 = vector.shape_cast %120 : vector<1x1x4x256xf32> to vector<4x256xf32>
    %122 = vector.broadcast %119 : f32 to vector<4x256xf32>
    %123 = arith.mulf %122, %121 : vector<4x256xf32>
    %124 = arith.addf %118, %123 : vector<4x256xf32>
    %cst_76 = arith.constant 1.000000e+00 : f32
    %125 = vector.broadcast %cst_76 : f32 to vector<4x256xf32>
    %126 = arith.addf %124, %125 : vector<4x256xf32>
    %cst_77 = arith.constant 5.000000e-01 : f32
    %127 = vector.broadcast %cst_77 : f32 to vector<4x256xf32>
    %128 = arith.mulf %126, %127 : vector<4x256xf32>
    %cst_78 = arith.constant 0.000000e+00 : f32
    %cst_79 = arith.constant 1.000000e+00 : f32
    %129 = vector.broadcast %cst_78 : f32 to vector<4x256xf32>
    %130 = arith.maximumf %129, %128 : vector<4x256xf32>
    %131 = vector.broadcast %cst_79 : f32 to vector<4x256xf32>
    %132 = arith.minimumf %131, %130 : vector<4x256xf32>
    %c0_80 = arith.constant 0 : index
    %c0_81 = arith.constant 0 : index
    %c0_82 = arith.constant 0 : index
    %133 = vector.load %arg10[%c0_80, %c0_81, %c0_82] : memref<2x4x256xf32, #tpu.memory_space<vmem>>, vector<1x4x256xf32>
    %134 = vector.shape_cast %133 : vector<1x4x256xf32> to vector<4x256xf32>
    %135 = vector.shape_cast %132 : vector<4x256xf32> to vector<1x4x256xf32>
    tpu.vector_store %arg10[%c0_80, %c0_81, %c0_82], %135 {strides = array<i32>} : memref<2x4x256xf32, #tpu.memory_space<vmem>>, vector<1x4x256xf32>,
    %c1_83 = arith.constant 1 : index
    %c0_84 = arith.constant 0 : index
    %c0_85 = arith.constant 0 : index
    %136 = vector.load %arg2[%c1_83, %c0_84, %c0_85] : memref<2x4x256xf32, #tpu.memory_space<vmem>>, vector<1x4x256xf32>
    %137 = vector.shape_cast %136 : vector<1x4x256xf32> to vector<4x256xf32>
    %cst_86 = arith.constant 2.000000e+00 : f32
    %138 = vector.broadcast %cst_86 : f32 to vector<4x256xf32>
    %139 = arith.mulf %138, %137 : vector<4x256xf32>
    %cst_87 = arith.constant 1.000000e+00 : f32
    %140 = vector.broadcast %cst_87 : f32 to vector<4x256xf32>
    %141 = arith.subf %139, %140 : vector<4x256xf32>
    %cst_88 = arith.constant dense<0.000000e+00> : vector<32x256xf32>
    %142 = tpu.matmul %0, %141, %cst_88 {dimension_numbers = #tpu.dot_dimension_numbers<[1], [0], [0], [1], [0, 0, 1, 1], [], []>} : vector<32x4xf32>, vector<4x256xf32>, vector<32x256xf32> -> vector<32x256xf32>
    %c1_89 = arith.constant 1 : index
    %c0_90 = arith.constant 0 : index
    %c0_91 = arith.constant 0 : index
    %143 = vector.load %arg3[%c1_89, %c0_90, %c0_91] : memref<2x4x256xf32, #tpu.memory_space<vmem>>, vector<1x4x256xf32>
    %144 = vector.shape_cast %143 : vector<1x4x256xf32> to vector<4x256xf32>
    %cst_92 = arith.constant dense<0.000000e+00> : vector<32x256xf32>
    %145 = tpu.matmul %1, %144, %cst_92 {dimension_numbers = #tpu.dot_dimension_numbers<[1], [0], [0], [1], [0, 0, 1, 1], [], []>} : vector<32x4xf32>, vector<4x256xf32>, vector<32x256xf32> -> vector<32x256xf32>
    %146 = arith.addf %142, %145 : vector<32x256xf32>
    %c0_93 = arith.constant 0 : index
    %c0_94 = arith.constant 0 : index
    %c0_95 = arith.constant 0 : index
    %147 = vector.load %arg7[%c0_93, %c0_94, %c0_95] : memref<4x32x1xf32, #tpu.memory_space<vmem>>, vector<1x32x1xf32>
    %148 = vector.shape_cast %147 : vector<1x32x1xf32> to vector<32x1xf32>
    %149 = vector.broadcast %148 : vector<32x1xf32> to vector<32x256xf32>
    %150 = arith.addf %146, %149 : vector<32x256xf32>
    %151 = arith.negf %150 : vector<32x256xf32>
    %152 = math.exp %151 : vector<32x256xf32>
    %cst_96 = arith.constant 1.000000e+00 : f32
    %153 = vector.broadcast %cst_96 : f32 to vector<32x256xf32>
    %154 = arith.addf %153, %152 : vector<32x256xf32>
    %155 = arith.divf %153, %154 : vector<32x256xf32>
    %156 = arith.mulf %150, %155 : vector<32x256xf32>
    %cst_97 = arith.constant dense<0.000000e+00> : vector<4x256xf32>
    %157 = tpu.matmul %2, %156, %cst_97 {dimension_numbers = #tpu.dot_dimension_numbers<[1], [0], [0], [1], [0, 0, 1, 1], [], []>} : vector<4x32xf32>, vector<32x256xf32>, vector<4x256xf32> -> vector<4x256xf32>
    %158 = vector.broadcast %3 : vector<4x1xf32> to vector<4x256xf32>
    %159 = arith.addf %157, %158 : vector<4x256xf32>
    %c0_98 = arith.constant 0 : index
    %c0_99 = arith.constant 0 : index
    %160 = memref.load %arg1[%c0_98, %c0_99] : memref<4x3xf32, #tpu.memory_space<smem>>
    %161 = vector.broadcast %160 : f32 to vector<4x256xf32>
    %162 = arith.mulf %161, %144 : vector<4x256xf32>
    %c0_100 = arith.constant 0 : index
    %c1_101 = arith.constant 1 : index
    %163 = memref.load %arg1[%c0_100, %c1_101] : memref<4x3xf32, #tpu.memory_space<smem>>
    %164 = vector.broadcast %163 : f32 to vector<4x256xf32>
    %165 = arith.mulf %164, %159 : vector<4x256xf32>
    %166 = arith.addf %162, %165 : vector<4x256xf32>
    %c0_102 = arith.constant 0 : index
    %c2_103 = arith.constant 2 : index
    %167 = memref.load %arg1[%c0_102, %c2_103] : memref<4x3xf32, #tpu.memory_space<smem>>
    %c0_104 = arith.constant 0 : index
    %c1_105 = arith.constant 1 : index
    %c0_106 = arith.constant 0 : index
    %c0_107 = arith.constant 0 : index
    %168 = vector.load %arg4[%c0_104, %c1_105, %c0_106, %c0_107] : memref<4x2x4x256xf32, #tpu.memory_space<vmem>>, vector<1x1x4x256xf32>
    %169 = vector.shape_cast %168 : vector<1x1x4x256xf32> to vector<4x256xf32>
    %170 = vector.broadcast %167 : f32 to vector<4x256xf32>
    %171 = arith.mulf %170, %169 : vector<4x256xf32>
    %172 = arith.addf %166, %171 : vector<4x256xf32>
    %cst_108 = arith.constant dense<0.000000e+00> : vector<32x256xf32>
    %173 = tpu.matmul %1, %172, %cst_108 {dimension_numbers = #tpu.dot_dimension_numbers<[1], [0], [0], [1], [0, 0, 1, 1], [], []>} : vector<32x4xf32>, vector<4x256xf32>, vector<32x256xf32> -> vector<32x256xf32>
    %174 = arith.addf %142, %173 : vector<32x256xf32>
    %c1_109 = arith.constant 1 : index
    %c0_110 = arith.constant 0 : index
    %c0_111 = arith.constant 0 : index
    %175 = vector.load %arg7[%c1_109, %c0_110, %c0_111] : memref<4x32x1xf32, #tpu.memory_space<vmem>>, vector<1x32x1xf32>
    %176 = vector.shape_cast %175 : vector<1x32x1xf32> to vector<32x1xf32>
    %177 = vector.broadcast %176 : vector<32x1xf32> to vector<32x256xf32>
    %178 = arith.addf %174, %177 : vector<32x256xf32>
    %179 = arith.negf %178 : vector<32x256xf32>
    %180 = math.exp %179 : vector<32x256xf32>
    %cst_112 = arith.constant 1.000000e+00 : f32
    %181 = vector.broadcast %cst_112 : f32 to vector<32x256xf32>
    %182 = arith.addf %181, %180 : vector<32x256xf32>
    %183 = arith.divf %181, %182 : vector<32x256xf32>
    %184 = arith.mulf %178, %183 : vector<32x256xf32>
    %cst_113 = arith.constant dense<0.000000e+00> : vector<4x256xf32>
    %185 = tpu.matmul %2, %184, %cst_113 {dimension_numbers = #tpu.dot_dimension_numbers<[1], [0], [0], [1], [0, 0, 1, 1], [], []>} : vector<4x32xf32>, vector<32x256xf32>, vector<4x256xf32> -> vector<4x256xf32>
    %186 = vector.broadcast %3 : vector<4x1xf32> to vector<4x256xf32>
    %187 = arith.addf %185, %186 : vector<4x256xf32>
    %c1_114 = arith.constant 1 : index
    %c0_115 = arith.constant 0 : index
    %188 = memref.load %arg1[%c1_114, %c0_115] : memref<4x3xf32, #tpu.memory_space<smem>>
    %189 = vector.broadcast %188 : f32 to vector<4x256xf32>
    %190 = arith.mulf %189, %172 : vector<4x256xf32>
    %c1_116 = arith.constant 1 : index
    %c1_117 = arith.constant 1 : index
    %191 = memref.load %arg1[%c1_116, %c1_117] : memref<4x3xf32, #tpu.memory_space<smem>>
    %192 = vector.broadcast %191 : f32 to vector<4x256xf32>
    %193 = arith.mulf %192, %187 : vector<4x256xf32>
    %194 = arith.addf %190, %193 : vector<4x256xf32>
    %c1_118 = arith.constant 1 : index
    %c2_119 = arith.constant 2 : index
    %195 = memref.load %arg1[%c1_118, %c2_119] : memref<4x3xf32, #tpu.memory_space<smem>>
    %c1_120 = arith.constant 1 : index
    %c1_121 = arith.constant 1 : index
    %c0_122 = arith.constant 0 : index
    %c0_123 = arith.constant 0 : index
    %196 = vector.load %arg4[%c1_120, %c1_121, %c0_122, %c0_123] : memref<4x2x4x256xf32, #tpu.memory_space<vmem>>, vector<1x1x4x256xf32>
    %197 = vector.shape_cast %196 : vector<1x1x4x256xf32> to vector<4x256xf32>
    %198 = vector.broadcast %195 : f32 to vector<4x256xf32>
    %199 = arith.mulf %198, %197 : vector<4x256xf32>
    %200 = arith.addf %194, %199 : vector<4x256xf32>
    %cst_124 = arith.constant dense<0.000000e+00> : vector<32x256xf32>
    %201 = tpu.matmul %1, %200, %cst_124 {dimension_numbers = #tpu.dot_dimension_numbers<[1], [0], [0], [1], [0, 0, 1, 1], [], []>} : vector<32x4xf32>, vector<4x256xf32>, vector<32x256xf32> -> vector<32x256xf32>
    %202 = arith.addf %142, %201 : vector<32x256xf32>
    %c2_125 = arith.constant 2 : index
    %c0_126 = arith.constant 0 : index
    %c0_127 = arith.constant 0 : index
    %203 = vector.load %arg7[%c2_125, %c0_126, %c0_127] : memref<4x32x1xf32, #tpu.memory_space<vmem>>, vector<1x32x1xf32>
    %204 = vector.shape_cast %203 : vector<1x32x1xf32> to vector<32x1xf32>
    %205 = vector.broadcast %204 : vector<32x1xf32> to vector<32x256xf32>
    %206 = arith.addf %202, %205 : vector<32x256xf32>
    %207 = arith.negf %206 : vector<32x256xf32>
    %208 = math.exp %207 : vector<32x256xf32>
    %cst_128 = arith.constant 1.000000e+00 : f32
    %209 = vector.broadcast %cst_128 : f32 to vector<32x256xf32>
    %210 = arith.addf %209, %208 : vector<32x256xf32>
    %211 = arith.divf %209, %210 : vector<32x256xf32>
    %212 = arith.mulf %206, %211 : vector<32x256xf32>
    %cst_129 = arith.constant dense<0.000000e+00> : vector<4x256xf32>
    %213 = tpu.matmul %2, %212, %cst_129 {dimension_numbers = #tpu.dot_dimension_numbers<[1], [0], [0], [1], [0, 0, 1, 1], [], []>} : vector<4x32xf32>, vector<32x256xf32>, vector<4x256xf32> -> vector<4x256xf32>
    %214 = vector.broadcast %3 : vector<4x1xf32> to vector<4x256xf32>
    %215 = arith.addf %213, %214 : vector<4x256xf32>
    %c2_130 = arith.constant 2 : index
    %c0_131 = arith.constant 0 : index
    %216 = memref.load %arg1[%c2_130, %c0_131] : memref<4x3xf32, #tpu.memory_space<smem>>
    %217 = vector.broadcast %216 : f32 to vector<4x256xf32>
    %218 = arith.mulf %217, %200 : vector<4x256xf32>
    %c2_132 = arith.constant 2 : index
    %c1_133 = arith.constant 1 : index
    %219 = memref.load %arg1[%c2_132, %c1_133] : memref<4x3xf32, #tpu.memory_space<smem>>
    %220 = vector.broadcast %219 : f32 to vector<4x256xf32>
    %221 = arith.mulf %220, %215 : vector<4x256xf32>
    %222 = arith.addf %218, %221 : vector<4x256xf32>
    %c2_134 = arith.constant 2 : index
    %c2_135 = arith.constant 2 : index
    %223 = memref.load %arg1[%c2_134, %c2_135] : memref<4x3xf32, #tpu.memory_space<smem>>
    %c2_136 = arith.constant 2 : index
    %c1_137 = arith.constant 1 : index
    %c0_138 = arith.constant 0 : index
    %c0_139 = arith.constant 0 : index
    %224 = vector.load %arg4[%c2_136, %c1_137, %c0_138, %c0_139] : memref<4x2x4x256xf32, #tpu.memory_space<vmem>>, vector<1x1x4x256xf32>
    %225 = vector.shape_cast %224 : vector<1x1x4x256xf32> to vector<4x256xf32>
    %226 = vector.broadcast %223 : f32 to vector<4x256xf32>
    %227 = arith.mulf %226, %225 : vector<4x256xf32>
    %228 = arith.addf %222, %227 : vector<4x256xf32>
    %cst_140 = arith.constant dense<0.000000e+00> : vector<32x256xf32>
    %229 = tpu.matmul %1, %228, %cst_140 {dimension_numbers = #tpu.dot_dimension_numbers<[1], [0], [0], [1], [0, 0, 1, 1], [], []>} : vector<32x4xf32>, vector<4x256xf32>, vector<32x256xf32> -> vector<32x256xf32>
    %230 = arith.addf %142, %229 : vector<32x256xf32>
    %c3_141 = arith.constant 3 : index
    %c0_142 = arith.constant 0 : index
    %c0_143 = arith.constant 0 : index
    %231 = vector.load %arg7[%c3_141, %c0_142, %c0_143] : memref<4x32x1xf32, #tpu.memory_space<vmem>>, vector<1x32x1xf32>
    %232 = vector.shape_cast %231 : vector<1x32x1xf32> to vector<32x1xf32>
    %233 = vector.broadcast %232 : vector<32x1xf32> to vector<32x256xf32>
    %234 = arith.addf %230, %233 : vector<32x256xf32>
    %235 = arith.negf %234 : vector<32x256xf32>
    %236 = math.exp %235 : vector<32x256xf32>
    %cst_144 = arith.constant 1.000000e+00 : f32
    %237 = vector.broadcast %cst_144 : f32 to vector<32x256xf32>
    %238 = arith.addf %237, %236 : vector<32x256xf32>
    %239 = arith.divf %237, %238 : vector<32x256xf32>
    %240 = arith.mulf %234, %239 : vector<32x256xf32>
    %cst_145 = arith.constant dense<0.000000e+00> : vector<4x256xf32>
    %241 = tpu.matmul %2, %240, %cst_145 {dimension_numbers = #tpu.dot_dimension_numbers<[1], [0], [0], [1], [0, 0, 1, 1], [], []>} : vector<4x32xf32>, vector<32x256xf32>, vector<4x256xf32> -> vector<4x256xf32>
    %242 = vector.broadcast %3 : vector<4x1xf32> to vector<4x256xf32>
    %243 = arith.addf %241, %242 : vector<4x256xf32>
    %c3_146 = arith.constant 3 : index
    %c0_147 = arith.constant 0 : index
    %244 = memref.load %arg1[%c3_146, %c0_147] : memref<4x3xf32, #tpu.memory_space<smem>>
    %245 = vector.broadcast %244 : f32 to vector<4x256xf32>
    %246 = arith.mulf %245, %228 : vector<4x256xf32>
    %c3_148 = arith.constant 3 : index
    %c1_149 = arith.constant 1 : index
    %247 = memref.load %arg1[%c3_148, %c1_149] : memref<4x3xf32, #tpu.memory_space<smem>>
    %248 = vector.broadcast %247 : f32 to vector<4x256xf32>
    %249 = arith.mulf %248, %243 : vector<4x256xf32>
    %250 = arith.addf %246, %249 : vector<4x256xf32>
    %c3_150 = arith.constant 3 : index
    %c2_151 = arith.constant 2 : index
    %251 = memref.load %arg1[%c3_150, %c2_151] : memref<4x3xf32, #tpu.memory_space<smem>>
    %c3_152 = arith.constant 3 : index
    %c1_153 = arith.constant 1 : index
    %c0_154 = arith.constant 0 : index
    %c0_155 = arith.constant 0 : index
    %252 = vector.load %arg4[%c3_152, %c1_153, %c0_154, %c0_155] : memref<4x2x4x256xf32, #tpu.memory_space<vmem>>, vector<1x1x4x256xf32>
    %253 = vector.shape_cast %252 : vector<1x1x4x256xf32> to vector<4x256xf32>
    %254 = vector.broadcast %251 : f32 to vector<4x256xf32>
    %255 = arith.mulf %254, %253 : vector<4x256xf32>
    %256 = arith.addf %250, %255 : vector<4x256xf32>
    %cst_156 = arith.constant 1.000000e+00 : f32
    %257 = vector.broadcast %cst_156 : f32 to vector<4x256xf32>
    %258 = arith.addf %256, %257 : vector<4x256xf32>
    %cst_157 = arith.constant 5.000000e-01 : f32
    %259 = vector.broadcast %cst_157 : f32 to vector<4x256xf32>
    %260 = arith.mulf %258, %259 : vector<4x256xf32>
    %cst_158 = arith.constant 0.000000e+00 : f32
    %cst_159 = arith.constant 1.000000e+00 : f32
    %261 = vector.broadcast %cst_158 : f32 to vector<4x256xf32>
    %262 = arith.maximumf %261, %260 : vector<4x256xf32>
    %263 = vector.broadcast %cst_159 : f32 to vector<4x256xf32>
    %264 = arith.minimumf %263, %262 : vector<4x256xf32>
    %c1_160 = arith.constant 1 : index
    %c0_161 = arith.constant 0 : index
    %c0_162 = arith.constant 0 : index
    %265 = vector.load %arg10[%c1_160, %c0_161, %c0_162] : memref<2x4x256xf32, #tpu.memory_space<vmem>>, vector<1x4x256xf32>
    %266 = vector.shape_cast %265 : vector<1x4x256xf32> to vector<4x256xf32>
    %267 = vector.shape_cast %264 : vector<4x256xf32> to vector<1x4x256xf32>
    tpu.vector_store %arg10[%c1_160, %c0_161, %c0_162], %267 {strides = array<i32>} : memref<2x4x256xf32, #tpu.memory_space<vmem>>, vector<1x4x256xf32>,
    return
  }
  func.func @transform_0(%arg0: i32) -> (i32, i32) {
    %c0_i32 = arith.constant 0 : i32
    %c0_i32_0 = arith.constant 0 : i32
    %c0_i32_1 = arith.constant 0 : i32
    return %c0_i32, %c0_i32_0 : i32, i32
  }
  func.func @transform_1(%arg0: i32) -> (i32, i32, i32) {
    %c0_i32 = arith.constant 0 : i32
    %c0_i32_0 = arith.constant 0 : i32
    %c0_i32_1 = arith.constant 0 : i32
    %c0_i32_2 = arith.constant 0 : i32
    return %c0_i32, %c0_i32_0, %c0_i32_1 : i32, i32, i32
  }
  func.func @transform_2(%arg0: i32) -> (i32, i32, i32) {
    %c0_i32 = arith.constant 0 : i32
    %c0_i32_0 = arith.constant 0 : i32
    %c0_i32_1 = arith.constant 0 : i32
    %c0_i32_2 = arith.constant 0 : i32
    return %c0_i32, %c0_i32_0, %c0_i32_1 : i32, i32, i32
  }
  func.func @transform_3(%arg0: i32) -> (i32, i32, i32, i32) {
    %c0_i32 = arith.constant 0 : i32
    %c0_i32_0 = arith.constant 0 : i32
    %c0_i32_1 = arith.constant 0 : i32
    %c0_i32_2 = arith.constant 0 : i32
    %c0_i32_3 = arith.constant 0 : i32
    return %c0_i32, %c0_i32_0, %c0_i32_1, %c0_i32_2 : i32, i32, i32, i32
  }
  func.func @transform_4(%arg0: i32) -> (i32, i32) {
    %c0_i32 = arith.constant 0 : i32
    %c0_i32_0 = arith.constant 0 : i32
    %c0_i32_1 = arith.constant 0 : i32
    return %c0_i32, %c0_i32_0 : i32, i32
  }
  func.func @transform_5(%arg0: i32) -> (i32, i32) {
    %c0_i32 = arith.constant 0 : i32
    %c0_i32_0 = arith.constant 0 : i32
    %c0_i32_1 = arith.constant 0 : i32
    return %c0_i32, %c0_i32_0 : i32, i32
  }
  func.func @transform_6(%arg0: i32) -> (i32, i32, i32) {
    %c0_i32 = arith.constant 0 : i32
    %c0_i32_0 = arith.constant 0 : i32
    %c0_i32_1 = arith.constant 0 : i32
    %c0_i32_2 = arith.constant 0 : i32
    return %c0_i32, %c0_i32_0, %c0_i32_1 : i32, i32, i32
  }
  func.func @transform_7(%arg0: i32) -> (i32, i32) {
    %c0_i32 = arith.constant 0 : i32
    %c0_i32_0 = arith.constant 0 : i32
    %c0_i32_1 = arith.constant 0 : i32
    return %c0_i32, %c0_i32_0 : i32, i32
  }
  func.func @transform_8(%arg0: i32) -> (i32, i32) {
    %c0_i32 = arith.constant 0 : i32
    %c0_i32_0 = arith.constant 0 : i32
    %c0_i32_1 = arith.constant 0 : i32
    return %c0_i32, %c0_i32_0 : i32, i32
  }
  func.func @transform_9(%arg0: i32) -> (i32, i32, i32) {
    %c0_i32 = arith.constant 0 : i32
    %c0_i32_0 = arith.constant 0 : i32
    %c0_i32_1 = arith.constant 0 : i32
    %c0_i32_2 = arith.constant 0 : i32
    return %c0_i32, %c0_i32_0, %c0_i32_1 : i32, i32, i32
  }
}

module attributes {stable_mosaic.version = 11 : i64} {
  func.func @_ctdn_rec_kernel(%arg0: i32, %arg1: memref<2x4x256xf32, #tpu.memory_space<vmem>>, %arg2: memref<2x4x256xf32, #tpu.memory_space<vmem>>, %arg3: memref<4x4xf32, #tpu.memory_space<vmem>>, %arg4: memref<4x4xf32, #tpu.memory_space<vmem>>, %arg5: memref<4x1xf32, #tpu.memory_space<vmem>>, %arg6: memref<2x4x256xf32, #tpu.memory_space<vmem>>) attributes {dimension_semantics = [#tpu.dimension_semantics<arbitrary>], iteration_bounds = array<i64: 1>, scalar_prefetch = 0 : i64, scratch_operands = 0 : i64, tpu.core_type = #tpu.core_type<tc>, window_params = [{pipeline_mode = #tpu.pipeline_mode<synchronous>, transform_indices = @transform_0, window_bounds = array<i64: 2, 4, 256>}, {pipeline_mode = #tpu.pipeline_mode<synchronous>, transform_indices = @transform_1, window_bounds = array<i64: 2, 4, 256>}, {pipeline_mode = #tpu.pipeline_mode<synchronous>, transform_indices = @transform_2, window_bounds = array<i64: 4, 4>}, {pipeline_mode = #tpu.pipeline_mode<synchronous>, transform_indices = @transform_3, window_bounds = array<i64: 4, 4>}, {pipeline_mode = #tpu.pipeline_mode<synchronous>, transform_indices = @transform_4, window_bounds = array<i64: 4, 1>}, {pipeline_mode = #tpu.pipeline_mode<synchronous>, transform_indices = @transform_5, window_bounds = array<i64: 2, 4, 256>}]} {
    %c0 = arith.constant 0 : index
    %c0_0 = arith.constant 0 : index
    %0 = vector.load %arg3[%c0, %c0_0] : memref<4x4xf32, #tpu.memory_space<vmem>>, vector<4x4xf32>
    %c0_1 = arith.constant 0 : index
    %c0_2 = arith.constant 0 : index
    %1 = vector.load %arg4[%c0_1, %c0_2] : memref<4x4xf32, #tpu.memory_space<vmem>>, vector<4x4xf32>
    %c0_3 = arith.constant 0 : index
    %c0_4 = arith.constant 0 : index
    %2 = vector.load %arg5[%c0_3, %c0_4] : memref<4x1xf32, #tpu.memory_space<vmem>>, vector<4x1xf32>
    %c0_5 = arith.constant 0 : index
    %c0_6 = arith.constant 0 : index
    %c0_7 = arith.constant 0 : index
    %3 = vector.load %arg1[%c0_5, %c0_6, %c0_7] : memref<2x4x256xf32, #tpu.memory_space<vmem>>, vector<1x4x256xf32>
    %4 = vector.shape_cast %3 : vector<1x4x256xf32> to vector<4x256xf32>
    %cst = arith.constant dense<0.000000e+00> : vector<4x256xf32>
    %5 = tpu.matmul %0, %4, %cst {dimension_numbers = #tpu.dot_dimension_numbers<[1], [0], [0], [1], [0, 0, 1, 1], [], []>} : vector<4x4xf32>, vector<4x256xf32>, vector<4x256xf32> -> vector<4x256xf32>
    %c0_8 = arith.constant 0 : index
    %c0_9 = arith.constant 0 : index
    %c0_10 = arith.constant 0 : index
    %6 = vector.load %arg2[%c0_8, %c0_9, %c0_10] : memref<2x4x256xf32, #tpu.memory_space<vmem>>, vector<1x4x256xf32>
    %7 = vector.shape_cast %6 : vector<1x4x256xf32> to vector<4x256xf32>
    %cst_11 = arith.constant dense<0.000000e+00> : vector<4x256xf32>
    %8 = tpu.matmul %1, %7, %cst_11 {dimension_numbers = #tpu.dot_dimension_numbers<[1], [0], [0], [1], [0, 0, 1, 1], [], []>} : vector<4x4xf32>, vector<4x256xf32>, vector<4x256xf32> -> vector<4x256xf32>
    %9 = arith.addf %5, %8 : vector<4x256xf32>
    %10 = vector.broadcast %2 : vector<4x1xf32> to vector<4x256xf32>
    %11 = arith.addf %9, %10 : vector<4x256xf32>
    %12 = arith.negf %11 : vector<4x256xf32>
    %13 = math.exp %12 : vector<4x256xf32>
    %cst_12 = arith.constant 1.000000e+00 : f32
    %14 = vector.broadcast %cst_12 : f32 to vector<4x256xf32>
    %15 = arith.addf %14, %13 : vector<4x256xf32>
    %16 = arith.divf %14, %15 : vector<4x256xf32>
    %c0_13 = arith.constant 0 : index
    %c0_14 = arith.constant 0 : index
    %c0_15 = arith.constant 0 : index
    %17 = vector.load %arg6[%c0_13, %c0_14, %c0_15] : memref<2x4x256xf32, #tpu.memory_space<vmem>>, vector<1x4x256xf32>
    %18 = vector.shape_cast %17 : vector<1x4x256xf32> to vector<4x256xf32>
    %19 = vector.shape_cast %16 : vector<4x256xf32> to vector<1x4x256xf32>
    tpu.vector_store %arg6[%c0_13, %c0_14, %c0_15], %19 {strides = array<i32>} : memref<2x4x256xf32, #tpu.memory_space<vmem>>, vector<1x4x256xf32>,
    %c1 = arith.constant 1 : index
    %c0_16 = arith.constant 0 : index
    %c0_17 = arith.constant 0 : index
    %20 = vector.load %arg1[%c1, %c0_16, %c0_17] : memref<2x4x256xf32, #tpu.memory_space<vmem>>, vector<1x4x256xf32>
    %21 = vector.shape_cast %20 : vector<1x4x256xf32> to vector<4x256xf32>
    %cst_18 = arith.constant dense<0.000000e+00> : vector<4x256xf32>
    %22 = tpu.matmul %0, %21, %cst_18 {dimension_numbers = #tpu.dot_dimension_numbers<[1], [0], [0], [1], [0, 0, 1, 1], [], []>} : vector<4x4xf32>, vector<4x256xf32>, vector<4x256xf32> -> vector<4x256xf32>
    %c1_19 = arith.constant 1 : index
    %c0_20 = arith.constant 0 : index
    %c0_21 = arith.constant 0 : index
    %23 = vector.load %arg2[%c1_19, %c0_20, %c0_21] : memref<2x4x256xf32, #tpu.memory_space<vmem>>, vector<1x4x256xf32>
    %24 = vector.shape_cast %23 : vector<1x4x256xf32> to vector<4x256xf32>
    %cst_22 = arith.constant dense<0.000000e+00> : vector<4x256xf32>
    %25 = tpu.matmul %1, %24, %cst_22 {dimension_numbers = #tpu.dot_dimension_numbers<[1], [0], [0], [1], [0, 0, 1, 1], [], []>} : vector<4x4xf32>, vector<4x256xf32>, vector<4x256xf32> -> vector<4x256xf32>
    %26 = arith.addf %22, %25 : vector<4x256xf32>
    %27 = vector.broadcast %2 : vector<4x1xf32> to vector<4x256xf32>
    %28 = arith.addf %26, %27 : vector<4x256xf32>
    %29 = arith.negf %28 : vector<4x256xf32>
    %30 = math.exp %29 : vector<4x256xf32>
    %cst_23 = arith.constant 1.000000e+00 : f32
    %31 = vector.broadcast %cst_23 : f32 to vector<4x256xf32>
    %32 = arith.addf %31, %30 : vector<4x256xf32>
    %33 = arith.divf %31, %32 : vector<4x256xf32>
    %c1_24 = arith.constant 1 : index
    %c0_25 = arith.constant 0 : index
    %c0_26 = arith.constant 0 : index
    %34 = vector.load %arg6[%c1_24, %c0_25, %c0_26] : memref<2x4x256xf32, #tpu.memory_space<vmem>>, vector<1x4x256xf32>
    %35 = vector.shape_cast %34 : vector<1x4x256xf32> to vector<4x256xf32>
    %36 = vector.shape_cast %33 : vector<4x256xf32> to vector<1x4x256xf32>
    tpu.vector_store %arg6[%c1_24, %c0_25, %c0_26], %36 {strides = array<i32>} : memref<2x4x256xf32, #tpu.memory_space<vmem>>, vector<1x4x256xf32>,
    return
  }
  func.func @transform_0(%arg0: i32) -> (i32, i32, i32) {
    %c0_i32 = arith.constant 0 : i32
    %c0_i32_0 = arith.constant 0 : i32
    %c0_i32_1 = arith.constant 0 : i32
    %c0_i32_2 = arith.constant 0 : i32
    return %c0_i32, %c0_i32_0, %c0_i32_1 : i32, i32, i32
  }
  func.func @transform_1(%arg0: i32) -> (i32, i32, i32) {
    %c0_i32 = arith.constant 0 : i32
    %c0_i32_0 = arith.constant 0 : i32
    %c0_i32_1 = arith.constant 0 : i32
    %c0_i32_2 = arith.constant 0 : i32
    return %c0_i32, %c0_i32_0, %c0_i32_1 : i32, i32, i32
  }
  func.func @transform_2(%arg0: i32) -> (i32, i32) {
    %c0_i32 = arith.constant 0 : i32
    %c0_i32_0 = arith.constant 0 : i32
    %c0_i32_1 = arith.constant 0 : i32
    return %c0_i32, %c0_i32_0 : i32, i32
  }
  func.func @transform_3(%arg0: i32) -> (i32, i32) {
    %c0_i32 = arith.constant 0 : i32
    %c0_i32_0 = arith.constant 0 : i32
    %c0_i32_1 = arith.constant 0 : i32
    return %c0_i32, %c0_i32_0 : i32, i32
  }
  func.func @transform_4(%arg0: i32) -> (i32, i32) {
    %c0_i32 = arith.constant 0 : i32
    %c0_i32_0 = arith.constant 0 : i32
    %c0_i32_1 = arith.constant 0 : i32
    return %c0_i32, %c0_i32_0 : i32, i32
  }
  func.func @transform_5(%arg0: i32) -> (i32, i32, i32) {
    %c0_i32 = arith.constant 0 : i32
    %c0_i32_0 = arith.constant 0 : i32
    %c0_i32_1 = arith.constant 0 : i32
    %c0_i32_2 = arith.constant 0 : i32
    return %c0_i32, %c0_i32_0, %c0_i32_1 : i32, i32, i32
  }
}

</mosaic_0001>

<bundles_post_ra>
// kernel: net_forward.3
= control target key start
LH: loop header
LB: loop body
LE: loop exit
PB: predicated region body
PF: predicated region fallthrough
CT: control target
= control target key end

     0   :  { %12 = vsyncpa [#allocation3], 0  ;;  %vm44_vm0 = vcmask 1043456   ;;  %v476_v4 = vmov 0.0   ;;  %vm37_vm1 = vcmask 31744   ;;  %v477_v6 = vmov 0   ;;  %s612_s0 = inlined_call_operand.vmem [shape: f32[2,4,256], index: 0, kind: input, shape index: {}]   ;;  %s613_s1 = inlined_call_operand.vmem [shape: f32[16,4], index: 1, kind: input, shape index: {}]   ;;  %s614_s2 = inlined_call_operand.vmem [shape: f32[16,1], index: 2, kind: input, shape index: {}]   ;;  %s615_s3 = inlined_call_operand.hbm [shape: f32[2,4,256], index: 3, kind: output, shape index: {0}]   ;;  %s616_s4 = inlined_call_operand.hbm [shape: f32[2,4,256], index: 4, kind: output, shape index: {1}]   ;;  %s617_s5 = inlined_call_operand.vmem [shape: f32[2,4,256], index: 5, kind: output, shape index: {2}]   ;;  %s618_s6 = inlined_call_operand.hbm [shape: f32[2,4,256], index: 6, kind: output, shape index: {3}]  }
   0x1   :  { %v24_v0 = vld [vmem:[%s612_s0] sm:$0xff]  ;;  %v354_v1 = vld [vmem:[%s612_s0 + $0x8] sm:$0xff]  ;;  %113 = vmatprep.mubr.f32.mxu0 %v476_v4  ;;  %238 = vmatprep.mubr.f32.mxu1 %v476_v4 }
   0x2   :  { %v36_v2 = vcombine.high %v24_v0, %v24_v0  ;;  %v169_v3 = vcombine.high %v354_v1, %v354_v1  ;;  %v20_v5 = vld [vmem:[%s613_s1] sm:$0xff]  ;;  %371 = vset.pattern.permute.xlu0 %v477_v6 }
   0x3   :  { %13 = vsyncpa [#allocation5], 0  ;;  %v22_v7 = vld [vmem:[%s614_s2] sm:$0xff]  ;;  %v21_v8 = vld [vmem:[%s613_s1 + $0x8] sm:$0xff]  ;;  %s478_s1 = smov [#allocation4]   ;;  %s479_s8 = smov [#allocation2]  }
   0x4   :  { %346 = vmatprep.subr.msk.mxu0 %vm44_vm0, %v36_v2  ;;  %355 = vmatprep.subr.msk.mxu1 %vm44_vm0, %v169_v3  ;;  %v23_v9 = vld [vmem:[%s614_s2 + $0x8] sm:$0xff]  ;;  %s312_s2 = sshll.u32 %s478_s1, 4  ;;  %s300_s9 = sshll.u32 %s479_s8, 4  ;;  %s540_s2 = int_to_ptr.vmem [resolvable:$true] %s312_s2  ;;  %s542_s9 = int_to_ptr.vmem [resolvable:$true] %s300_s9 }
   0x5   :  { %347 = vmatpush1.msk.msra.mxu0 %vm44_vm0, %v24_v0  ;;  %356 = vmatpush1.msk.msra.mxu1 %vm44_vm0, %v354_v1  ;;  %s480_s10 = smov [#allocation6]   ;;  %s406_s12 = scalar_lea.vmem %s540_s2, 256 }
   0x6   :  { %348 = vmatmul.mubr.msk.f32.vlgmr.msra.gmra.mrb[0].mxu0 %vm37_vm1, %v20_v5  ;;  %357 = vmatmul.mubr.msk.f32.vlgmr.msra.gmra.mrb[0].mxu1 %vm37_vm1, %v20_v5  ;;  %s326_s11 = sshll.u32 %s480_s10, 4  ;;  %p407_p0 = scmp.ne.s32.totalorder %s540_s2, %s406_s12  ;;  %s544_s11 = int_to_ptr.vmem [resolvable:$true] %s326_s11 }
   0x7   :  { %119 = vmatprep.mubr.f32.mxu0 %v476_v4  ;;  %244 = vmatprep.mubr.f32.mxu1 %v476_v4  ;;  %p411_p1 = scmp.lt.s32.totalorder %s540_s2, %s540_s2  ;;  %p412_p2 = scmp.lt.s32.totalorder %s406_s12, %s406_s12 }
   0x8   :  { %27 = vperm.xlu0 %371, %v22_v7  }
   0x9   :  { %p413_p3 = por %p412_p2, %p411_p1 }
   0xa   :  { %349 = vmatmul.mubr.msk.f32.gmra.mrb[2].mxu0 %vm37_vm1, %v21_v8  ;;  %358 = vmatmul.mubr.msk.f32.gmra.mrb[2].mxu1 %vm37_vm1, %v21_v8 }
   0xb   :  { %p414_p4 = pnand %p413_p3, %p407_p0 }
   0xc   :  { %32 = vperm.xlu0 %371, %v23_v9  }
  0x87   :  { %v28_v10 = vpop.permute.xlu0 %27 }
  0x8b   :  { %v33_v21 = vpop.permute.xlu0 %32 }
  0xd9   :  { %v115_v11 = vpop.f32.mrb[0].mxu0  ;;  %v240_v12 = vpop.f32.mrb[0].mxu1 }
  0xda   :  { %v116_v13 = vadd.f32 %v115_v11, %v28_v10  ;;  %v241_v14 = vadd.f32 %v240_v12, %v28_v10  ;;  %v117_v15 = vpop.f32.mrb[1].mxu0  ;;  %v242_v16 = vpop.f32.mrb[1].mxu1 }
  0xdb   :  { %v118_v17 = vadd.f32 %v117_v15, %v28_v10  ;;  %v243_v18 = vadd.f32 %v242_v16, %v28_v10 }
  0xdc   :  { %v350_v19 = vmul.f32 -1.442695, %v116_v13  ;;  %v359_v20 = vmul.f32 -1.442695, %v241_v14 }
  0xdd   :  { %v351_v22 = vmul.f32 -1.442695, %v118_v17  ;;  %v360_v23 = vmul.f32 -1.442695, %v243_v18  ;;  %v121_v24 = vpop.f32.mrb[2].mxu0  ;;  %v246_v25 = vpop.f32.mrb[2].mxu1 }
  0xde   :  { %374 = vpow2.f32 %v350_v19  ;;  %v122_v26 = vadd.f32 %v121_v24, %v33_v21  ;;  %v247_v27 = vadd.f32 %v246_v25, %v33_v21  ;;  %v123_v28 = vpop.f32.mrb[3].mxu0  ;;  %v248_v29 = vpop.f32.mrb[3].mxu1 }
  0xdf   :  { %376 = vpow2.f32 %v359_v20  ;;  %v124_v30 = vadd.f32 %v123_v28, %v33_v21  ;;  %v249_v31 = vadd.f32 %v248_v29, %v33_v21 }
  0xe0   :  { %378 = vpow2.f32 %v351_v22  ;;  %v352_v32 = vmul.f32 -1.442695, %v122_v26  ;;  %v361_v33 = vmul.f32 -1.442695, %v247_v27 }
  0xe1   :  { %380 = vpow2.f32 %v360_v23  ;;  %v353_v34 = vmul.f32 -1.442695, %v124_v30  ;;  %v362_v35 = vmul.f32 -1.442695, %v249_v31 }
  0xe2   :  { %382 = vpow2.f32 %v352_v32 }
  0xe3   :  { %384 = vpow2.f32 %v361_v33 }
  0xe4   :  { %386 = vpow2.f32 %v353_v34 }
  0xe5   :  { %388 = vpow2.f32 %v362_v35 }
  0xe8   :  { %v375_v36 = vpop.eup %374 }
  0xe9   :  { %v377_v37 = vpop.eup %376  ;;  %v138_v38 = vadd.f32 1.0, %v375_v36 }
  0xea   :  { %v379_v39 = vpop.eup %378  ;;  %v263_v40 = vadd.f32 1.0, %v377_v37 }
  0xeb   :  { %v381_v41 = vpop.eup %380  ;;  %390 = vrcp.f32 %v138_v38  ;;  %v139_v42 = vadd.f32 1.0, %v379_v39 }
  0xec   :  { %v383_v43 = vpop.eup %382  ;;  %392 = vrcp.f32 %v263_v40  ;;  %v264_v44 = vadd.f32 1.0, %v381_v41 }
  0xed   :  { %v385_v45 = vpop.eup %384  ;;  %394 = vrcp.f32 %v139_v42  ;;  %v140_v46 = vadd.f32 1.0, %v383_v43 }
  0xee   :  { %v387_v47 = vpop.eup %386  ;;  %396 = vrcp.f32 %v264_v44  ;;  %v265_v48 = vadd.f32 1.0, %v385_v45 }
  0xef   :  { %v389_v49 = vpop.eup %388  ;;  %398 = vrcp.f32 %v140_v46  ;;  %v141_v50 = vadd.f32 1.0, %v387_v47 }
  0xf0   :  { %400 = vrcp.f32 %v265_v48  ;;  %v266_v51 = vadd.f32 1.0, %v389_v49 }
  0xf1   :  { %402 = vrcp.f32 %v141_v50 }
  0xf2   :  { %404 = vrcp.f32 %v266_v51 }
  0xf5   :  { %v391_v52 = vpop.eup %390 }
  0xf6   :  { %v393_v53 = vpop.eup %392 }
  0xf7   :  { %v395_v54 = vpop.eup %394 }
  0xf8   :  { %v397_v55 = vpop.eup %396  ;;  %v155_v56 = vcombine.high %v391_v52, %v395_v54  ;;  %v152_v57 = vcombine.low %v391_v52, %v395_v54 }
  0xf9   :  { %v399_v58 = vpop.eup %398  ;;  %v281_v59 = vcombine.high %v393_v53, %v397_v55  ;;  %v277_v60 = vcombine.low %v393_v53, %v397_v55 }
  0xfa   :  { %v401_v61 = vpop.eup %400  ;;  %157 = vst [vmem:[#allocation4] sm:$0xff] %v155_v56  ;;  %154 = vst [vmem:[#allocation2] sm:$0xff] %v152_v57 }
  0xfb   :  { %v403_v62 = vpop.eup %402  ;;  %284 = vst [vmem:[#allocation4 + $0x8] sm:$0xff] %v281_v59  ;;  %280 = vst [vmem:[#allocation2 + $0x8] sm:$0xff] %v277_v60 }
  0xfc   :  { %v405_v63 = vpop.eup %404  ;;  %v160_v0 = vcombine.low %v399_v58, %v403_v62 }
  0xfd   :  { %417 = shalt.err (!%p414_p4)
}
  0xfe   :  { %s418_s15 = scalar_lea.hbm %s616_s4, 256 }
  0xff   :  { %p419_p5 = scmp.ne.s32.totalorder %s616_s4, %s418_s15  ;;  %p422_p6 = scmp.lt.u32.totalorder %s418_s15, %s616_s4 }
 0x101   :  { %p424_p7 = pnand %p422_p6, %p419_p5 }
 0x103   :  { %427 = shalt.err (!%p424_p7)
}
 0x104   :  { %s481_s20 = smov 128   ;;  %s482_s21 = smov 8   ;;  %v163_v1 = vcombine.high %v399_v58, %v403_v62  ;;  %v287_v2 = vcombine.low %v401_v61, %v405_v63 }
 0x105   :  { %318 = dma.vmem_to_hbm [thread:$0]  %s540_s2, 256, %s616_s4, [#allocation5], %s481_s20, %s481_s20, %s482_s21  }
 0x106   :  { %s428_s24 = scalar_lea.vmem %s542_s9, 256  ;;  %p433_p9 = scmp.lt.s32.totalorder %s542_s9, %s542_s9 }
 0x107   :  { %p429_p8 = scmp.ne.s32.totalorder %s542_s9, %s428_s24  ;;  %p434_p10 = scmp.lt.s32.totalorder %s428_s24, %s428_s24 }
 0x109   :  { %p435_p11 = por %p434_p10, %p433_p9 }
 0x10b   :  { %p436_p12 = pnand %p435_p11, %p429_p8 }
 0x10d   :  { %439 = shalt.err (!%p436_p12)
}
 0x10e   :  { %s440_s27 = scalar_lea.hbm %s615_s3, 256 }
 0x10f   :  { %p441_p13 = scmp.ne.s32.totalorder %s615_s3, %s440_s27  ;;  %p444_p0 = scmp.lt.u32.totalorder %s440_s27, %s615_s3 }
 0x111   :  { %p446_p1 = pnand %p444_p0, %p441_p13 }
 0x113   :  { %449 = shalt.err (!%p446_p1)
}
 0x114   :  { %306 = dma.vmem_to_hbm [thread:$0]  %s542_s9, 256, %s615_s3, [#allocation3], %s481_s20, %s481_s20, %s482_s21   ;;  %v291_v3 = vcombine.high %v401_v61, %v405_v63  ;;  %165 = vst [vmem:[#allocation6] sm:$0xff] %v163_v1 }
 0x115   :  { %162 = vst [vmem:[%s617_s5] sm:$0xff] %v160_v0  ;;  %363 = vst [vmem:[%s617_s5 + $0x8] sm:$0xff] %v287_v2  ;;  %s450_s12 = scalar_lea.vmem %s544_s11, 256  ;;  %p455_p3 = scmp.lt.s32.totalorder %s544_s11, %s544_s11 }
 0x116   :  { %294 = vst [vmem:[#allocation6 + $0x8] sm:$0xff] %v291_v3  ;;  %p451_p2 = scmp.ne.s32.totalorder %s544_s11, %s450_s12  ;;  %p456_p4 = scmp.lt.s32.totalorder %s450_s12, %s450_s12 }
 0x118   :  { %p457_p5 = por %p456_p4, %p455_p3 }
 0x11a   :  { %p458_p6 = pnand %p457_p5, %p451_p2 }
 0x11c   :  { %461 = shalt.err (!%p458_p6)
}
 0x11d   :  { %s462_s13 = scalar_lea.hbm %s618_s6, 256 }
 0x11e   :  { %p463_p7 = scmp.ne.s32.totalorder %s618_s6, %s462_s13  ;;  %p466_p8 = scmp.lt.u32.totalorder %s462_s13, %s618_s6 }
 0x120   :  { %p468_p9 = pnand %p466_p8, %p463_p7 }
 0x122   :  { %471 = shalt.err (!%p468_p9)
}
 0x123   :  { %332 = dma.vmem_to_hbm [thread:$0]  %s544_s11, 256, %s618_s6, [#allocation5], %s481_s20, %s481_s20, %s482_s21  }
 0x124   :  { %472 = dma.done.wait [#allocation3], 256  }
 0x125   :  { %473 = vsyncadd [#allocation3], 4294967040 }
 0x126   :  { %474 = dma.done.wait [#allocation5], 512  }
 0x127   :  { %475 = vsyncadd [#allocation5], 4294966784 }
 0x128   :  { %344 = vsyncpa [#allocation3], 1 }
 0x129   :  { %345 = vsyncpa [#allocation5], 1 }

// kernel: net_forward.5
= control target key start
LH: loop header
LB: loop body
LE: loop exit
PB: predicated region body
PF: predicated region fallthrough
CT: control target
= control target key end

     0   :  { %vm31_vm0 = vcmask 1043456   ;;  %v439_v2 = vmov 0.0   ;;  %v440_v7 = vmov 0   ;;  %vm27_vm1 = vcmask 31744   ;;  %s510_s1 = inlined_call_operand.vmem [shape: f32[2,4,256], index: 1, kind: input, shape index: {}]   ;;  %s511_s3 = inlined_call_operand.vmem [shape: f32[4,4], index: 3, kind: input, shape index: {}]   ;;  %s512_s0 = inlined_call_operand.vmem [shape: f32[2,4,256], index: 0, kind: input, shape index: {}]   ;;  %s513_s4 = inlined_call_operand.vmem [shape: f32[4,1], index: 4, kind: input, shape index: {}]   ;;  %s514_s2 = inlined_call_operand.vmem [shape: f32[4,4], index: 2, kind: input, shape index: {}]   ;;  %s515_s5 = inlined_call_operand.vmem [shape: f32[2,4,256], index: 5, kind: output, shape index: {}]  }
   0x1   :  { %v24_v0 = vld [vmem:[%s510_s1] sm:$0xff]  ;;  %v402_v1 = vld [vmem:[%s510_s1 + $0x8] sm:$0xff]  ;;  %100 = vmatprep.mubr.f32.mxu0 %v439_v2  ;;  %285 = vmatprep.mubr.f32.mxu1 %v439_v2 }
   0x2   :  { %v26_v3 = vcombine.high %v24_v0, %v24_v0  ;;  %v216_v4 = vcombine.high %v402_v1, %v402_v1  ;;  %v23_v5 = vld [vmem:[%s512_s0] sm:$0xff]  ;;  %v401_v6 = vld [vmem:[%s512_s0 + $0x8] sm:$0xff]  ;;  %418 = vset.pattern.permute.xlu0 %v440_v7 }
   0x3   :  { %v21_v8 = vld [vmem:[%s511_s3] sm:$0xf]  ;;  %v108_v9 = vcombine.high %v23_v5, %v23_v5  ;;  %v293_v10 = vcombine.high %v401_v6, %v401_v6 }
   0x4   :  { %393 = vmatprep.subr.msk.mxu0 %vm31_vm0, %v26_v3  ;;  %403 = vmatprep.subr.msk.mxu1 %vm31_vm0, %v216_v4  ;;  %v22_v11 = vld [vmem:[%s513_s4] sm:$0xf] }
   0x5   :  { %394 = vmatpush1.msk.msra.mxu0 %vm31_vm0, %v24_v0  ;;  %404 = vmatpush1.msk.msra.mxu1 %vm31_vm0, %v402_v1  ;;  %v20_v12 = vld [vmem:[%s514_s2] sm:$0xf] }
   0x6   :  { %395 = vmatmul.mubr.msk.f32.vlgmr.msra.gmra.mrb[0].mxu0 %vm27_vm1, %v21_v8  ;;  %396 = vmatprep.subr.msk.mxu0 %vm31_vm0, %v108_v9 }
   0x7   :  { %405 = vmatmul.mubr.msk.f32.vlgmr.msra.gmra.mrb[0].mxu1 %vm27_vm1, %v21_v8  ;;  %406 = vmatprep.subr.msk.mxu1 %vm31_vm0, %v293_v10 }
   0x8   :  { %397 = vmatpush1.msk.msra.mxu0 %vm31_vm0, %v23_v5  ;;  %407 = vmatpush1.msk.msra.mxu1 %vm31_vm0, %v401_v6 }
   0x9   :  { %180 = vmatprep.mubr.f32.mxu0 %v439_v2  ;;  %362 = vmatprep.mubr.f32.mxu1 %v439_v2 }
   0xa   :  { %189 = vperm.xlu0 %418, %v22_v11  }
   0xe   :  { %398 = vmatmul.mubr.msk.f32.vlgmr.msra.gmra.mrb[0].mxu0 %vm27_vm1, %v20_v12 }
   0xf   :  { %408 = vmatmul.mubr.msk.f32.vlgmr.msra.gmra.mrb[0].mxu1 %vm27_vm1, %v20_v12 }
  0x89   :  { %v190_v13 = vpop.permute.xlu0 %189 }
  0xe1   :  { %v182_v14 = vpop.f32.mrb[0].mxu0 }
  0xe2   :  { %v192_v15 = vadd.f32 %v190_v13, %v182_v14  ;;  %v364_v16 = vpop.f32.mrb[0].mxu1  ;;  %v184_v17 = vpop.f32.mrb[1].mxu0 }
  0xe3   :  { %v369_v18 = vadd.f32 %v364_v16, %v190_v13  ;;  %v193_v19 = vadd.f32 %v190_v13, %v184_v17  ;;  %v366_v20 = vpop.f32.mrb[1].mxu1 }
  0xe4   :  { %v399_v21 = vmul.f32 -1.442695, %v192_v15  ;;  %v370_v22 = vadd.f32 %v366_v20, %v190_v13 }
  0xe5   :  { %v409_v23 = vmul.f32 -1.442695, %v369_v18  ;;  %v400_v24 = vmul.f32 -1.442695, %v193_v19 }
  0xe6   :  { %423 = vpow2.f32 %v399_v21  ;;  %v410_v25 = vmul.f32 -1.442695, %v370_v22 }
  0xe7   :  { %425 = vpow2.f32 %v409_v23 }
  0xe8   :  { %427 = vpow2.f32 %v400_v24 }
  0xe9   :  { %429 = vpow2.f32 %v410_v25 }
  0xf0   :  { %v424_v26 = vpop.eup %423 }
  0xf1   :  { %v426_v27 = vpop.eup %425  ;;  %v200_v28 = vadd.f32 1.0, %v424_v26 }
  0xf2   :  { %v428_v29 = vpop.eup %427  ;;  %v377_v30 = vadd.f32 1.0, %v426_v27 }
  0xf3   :  { %v430_v31 = vpop.eup %429  ;;  %431 = vrcp.f32 %v200_v28  ;;  %v201_v32 = vadd.f32 1.0, %v428_v29 }
  0xf4   :  { %433 = vrcp.f32 %v377_v30  ;;  %v378_v33 = vadd.f32 1.0, %v430_v31 }
  0xf5   :  { %435 = vrcp.f32 %v201_v32 }
  0xf6   :  { %437 = vrcp.f32 %v378_v33 }
  0xfd   :  { %v432_v34 = vpop.eup %431 }
  0xfe   :  { %v434_v35 = vpop.eup %433 }
  0xff   :  { %v436_v36 = vpop.eup %435 }
 0x100   :  { %v438_v37 = vpop.eup %437  ;;  %v208_v38 = vcombine.low %v432_v34, %v436_v36 }
 0x101   :  { %v385_v39 = vcombine.low %v434_v35, %v438_v37 }
 0x102   :  { %210 = vst [vmem:[%s515_s5] sm:$0xff] %v208_v38 }
 0x103   :  { %411 = vst [vmem:[%s515_s5 + $0x8] sm:$0xff] %v385_v39 }

// kernel: net_forward.4
= control target key start
LH: loop header
LB: loop body
LE: loop exit
PB: predicated region body
PF: predicated region fallthrough
CT: control target
= control target key end

     0   :  { %14 = vsyncpa [#allocation3], 0  ;;  %s3770_s0 = inlined_call_operand.vmem [shape: f32[4,3], index: 0, kind: input, shape index: {}]   ;;  %s3771_s1 = inlined_call_operand.vmem [shape: f32[2,4,256], index: 1, kind: input, shape index: {}]   ;;  %s3772_s2 = inlined_call_operand.vmem [shape: f32[2,4,256], index: 2, kind: input, shape index: {}]   ;;  %s3773_s3 = inlined_call_operand.vmem [shape: f32[4,2,4,256], index: 3, kind: input, shape index: {}]   ;;  %s3774_s4 = inlined_call_operand.vmem [shape: f32[32,4], index: 4, kind: input, shape index: {}]   ;;  %s3775_s5 = inlined_call_operand.vmem [shape: f32[32,4], index: 5, kind: input, shape index: {}]   ;;  %s3776_s6 = inlined_call_operand.vmem [shape: f32[4,32,1], index: 6, kind: input, shape index: {}]   ;;  %s3777_s7 = inlined_call_operand.vmem [shape: f32[4,32], index: 7, kind: input, shape index: {}]   ;;  %s3778_s8 = inlined_call_operand.vmem [shape: f32[4,1], index: 8, kind: input, shape index: {}]   ;;  %s3779_s9 = inlined_call_operand.vmem [shape: f32[2,4,256], index: 9, kind: output, shape index: {}]  }
   0x1   :  { %s21_s11 = sshll.u32 %s3770_s0, 4  ;;  %s22_s11 = int_to_ptr.vmem [resolvable:$true] %s21_s11 }
   0x2   :  { %s3074_s12 = scalar_lea.vmem %s22_s11, 64  ;;  %p3079_p1 = scmp.lt.s32.totalorder %s22_s11, %s22_s11 }
   0x3   :  { %p3075_p0 = scmp.ne.s32.totalorder %s22_s11, %s3074_s12  ;;  %p3080_p2 = scmp.lt.s32.totalorder %s3074_s12, %s3074_s12 }
   0x5   :  { %p3081_p3 = por %p3080_p2, %p3079_p1 }
   0x7   :  { %p3082_p4 = pnand %p3081_p3, %p3075_p0 }
   0x9   :  { %3085 = shalt.err (!%p3082_p4)
}
   0xa   :  { %s3088_s13 = smov [#allocation2]  }
   0xb   :  { %24 = dma.vmem_to_smem %s22_s11, 64, %s3088_s13, [#allocation3]  }
   0xc   :  { %3086 = dma.done.wait [#allocation3], 64  }
   0xd   :  { %3087 = vsyncadd [#allocation3], 4294967232 }
   0xe   :  { %44 = sfence }
   0xf   :  { %vm73_vm0 = vcmask 1043456   ;;  %v3147_v0 = vld [vmem:[%s3772_s2] sm:$0xff]  ;;  %v3089_v4 = vmov 0.0   ;;  %vm60_vm1 = vcmask 31744   ;;  %v3090_v6 = vmov 0   ;;  %v285_v9 = vld [vmem:[%s3776_s6 + $0x10] sm:$0xff] }
  0x10   :  { %v55_v1 = vld [vmem:[%s3771_s1] sm:$0xff]  ;;  %v169_v2 = vcombine.high %v3147_v0, %v3147_v0  ;;  %250 = vmatprep.mubr.f32.mxu1 %v3089_v4  ;;  %142 = vmatprep.mubr.f32.mxu0 %v3089_v4  ;;  %v284_v11 = vld [vmem:[%s3776_s6 + $0x8] sm:$0xff]  ;;  %v286_v14 = vld [vmem:[%s3776_s6 + $0x18] sm:$0xff]  ;;  %vm376_vm2 = vcmask 261120   ;;  %s2570_s22 = sld [smem:[#allocation2 + $0x1]]  ;;  %s451_s23 = sld [smem:[#allocation2]] }
  0x11   :  { %v56_v3 = vmul.f32 2.0, %v55_v1  ;;  %v3159_v5 = vld [vmem:[%s3775_s5] sm:$0xff]  ;;  %2805 = vset.pattern.permute.xlu0 %v3090_v6  ;;  %2806 = vset.pattern.permute.xlu1 %v3090_v6  ;;  %v3182_v13 = vld [vmem:[%s3775_s5 + $0x8] sm:$0xff]  ;;  %v3203_v17 = vld [vmem:[%s3775_s5 + $0x10] sm:$0xff]  ;;  %s3304_s24 = sld [smem:[#allocation2 + $0x2]]  ;;  %s2592_s27 = sld [smem:[#allocation2 + $0x81]] }
  0x12   :  { %2555 = vmatprep.subr.msk.mxu1 %vm73_vm0, %v169_v2  ;;  %v283_v8 = vld [vmem:[%s3776_s6] sm:$0xff]  ;;  %299 = vperm.xlu1 %2806, %v285_v9   ;;  %v46_v16 = vld [vmem:[%s3774_s4 + $0x8] sm:$0xff]  ;;  %v47_v20 = vld [vmem:[%s3774_s4 + $0x10] sm:$0xff]  ;;  %s3359_s28 = sld [smem:[#allocation2 + $0x80]]  ;;  %s3361_s29 = sld [smem:[#allocation2 + $0x82]] }
  0x13   :  { %v2548_v7 = vadd.f32 -1.0, %v56_v3  ;;  %2556 = vmatpush1.msk.msra.mxu1 %vm73_vm0, %v3147_v0  ;;  %289 = vperm.xlu0 %2805, %v283_v8   ;;  %v45_v12 = vld [vmem:[%s3774_s4] sm:$0xff]  ;;  %v2579_v19 = vld [vmem:[%s3776_s6 + $0x28] sm:$0xff]  ;;  %v3222_v21 = vld [vmem:[%s3775_s5 + $0x18] sm:$0xff]  ;;  %s2615_s11 = sld [smem:[#allocation2 + $0x101]]  ;;  %s3417_s12 = sld [smem:[#allocation2 + $0x100]] }
  0x14   :  { %2557 = vmatmul.mubr.msk.f32.vlgmr.msra.gmra.mrb[0].mxu1 %vm60_vm1, %v3159_v5  ;;  %v54_v15 = vld [vmem:[%s3778_s8] sm:$0xf]  ;;  %v2580_v22 = vld [vmem:[%s3776_s6 + $0x30] sm:$0xff]  ;;  %v2581_v23 = vld [vmem:[%s3776_s6 + $0x38] sm:$0xff]  ;;  %s3419_s13 = sld [smem:[#allocation2 + $0x102]]  ;;  %s3522_s25 = sld [smem:[#allocation2 + $0x180]] }
  0x15   :  { %v59_v10 = vcombine.high %v2548_v7, %v2548_v7  ;;  %256 = vmatprep.mubr.f32.mxu1 %v3089_v4  ;;  %v2578_v18 = vld [vmem:[%s3776_s6 + $0x20] sm:$0xff]  ;;  %v48_v24 = vld [vmem:[%s3774_s4 + $0x18] sm:$0xff]  ;;  %v2602_v26 = vld [vmem:[%s3776_s6 + $0x48] sm:$0xff]  ;;  %s3524_s26 = sld [smem:[#allocation2 + $0x182]]  ;;  %s1679_s15 = sld [smem:[#allocation2]] }
  0x16   :  { %304 = vperm.xlu1 %2806, %v286_v14   ;;  %v2601_v25 = vld [vmem:[%s3776_s6 + $0x40] sm:$0xff]  ;;  %v2603_v27 = vld [vmem:[%s3776_s6 + $0x50] sm:$0xff]  ;;  %v2604_v28 = vld [vmem:[%s3776_s6 + $0x58] sm:$0xff] }
  0x17   :  { %2549 = vmatprep.subr.msk.mxu0 %vm73_vm0, %v59_v10  ;;  %294 = vperm.xlu0 %2805, %v284_v11   ;;  %v2624_v29 = vld [vmem:[%s3776_s6 + $0x60] sm:$0xff]  ;;  %v2625_v30 = vld [vmem:[%s3776_s6 + $0x68] sm:$0xff]  ;;  %v2626_v31 = vld [vmem:[%s3776_s6 + $0x70] sm:$0xff] }
  0x18   :  { %2550 = vmatpush1.msk.msra.mxu0 %vm73_vm0, %v2548_v7  ;;  %2558 = vmatmul.mubr.msk.f32.gmra.mrb[2].mxu1 %vm60_vm1, %v3182_v13  ;;  %v2627_v32 = vld [vmem:[%s3776_s6 + $0x78] sm:$0xff] }
  0x19   :  { %2551 = vmatmul.mubr.msk.f32.vlgmr.msra.gmra.mrb[0].mxu0 %vm60_vm1, %v45_v12  ;;  %262 = vmatprep.mubr.f32.mxu1 %v3089_v4 }
  0x1a   :  { %148 = vmatprep.mubr.f32.mxu0 %v3089_v4  ;;  %578 = vperm.xlu1 %2806, %v2578_v18  }
  0x1b   :  { %373 = vperm.xlu0 %2805, %v54_v15  }
  0x1c   :  { %2559 = vmatmul.mubr.msk.f32.gmra.mrb[4].mxu1 %vm60_vm1, %v3203_v17 }
  0x1d   :  { %2552 = vmatmul.mubr.msk.f32.gmra.mrb[2].mxu0 %vm60_vm1, %v46_v16  ;;  %268 = vmatprep.mubr.f32.mxu1 %v3089_v4 }
  0x1e   :  { %154 = vmatprep.mubr.f32.mxu0 %v3089_v4  ;;  %588 = vperm.xlu1 %2806, %v2580_v22  }
  0x1f   :  { %583 = vperm.xlu0 %2805, %v2579_v19  }
  0x20   :  { %2560 = vmatmul.mubr.msk.f32.gmra.mrb[6].mxu1 %vm60_vm1, %v3222_v21 }
  0x21   :  { %2553 = vmatmul.mubr.msk.f32.gmra.mrb[4].mxu0 %vm60_vm1, %v47_v20  ;;  %444 = vmatprep.mubr.f32.mxu1 %v3089_v4 }
  0x22   :  { %160 = vmatprep.mubr.f32.mxu0 %v3089_v4  ;;  %859 = vperm.xlu1 %2806, %v2601_v25  }
  0x23   :  { %593 = vperm.xlu0 %2805, %v2581_v23  }
  0x25   :  { %2554 = vmatmul.mubr.msk.f32.gmra.mrb[6].mxu0 %vm60_vm1, %v48_v24 }
  0x26   :  { %724 = vmatprep.mubr.f32.mxu0 %v3089_v4  ;;  %869 = vperm.xlu1 %2806, %v2603_v27  }
  0x27   :  { %864 = vperm.xlu0 %2805, %v2602_v26  }
  0x2a   :  { %1140 = vperm.xlu1 %2806, %v2624_v29  }
  0x2b   :  { %874 = vperm.xlu0 %2805, %v2604_v28  }
  0x2e   :  { %1150 = vperm.xlu1 %2806, %v2626_v31  }
  0x2f   :  { %1145 = vperm.xlu0 %2805, %v2625_v30  }
  0x32   :  { %1526 = vperm.xlu1 %2806, %v283_v8  }
  0x33   :  { %1155 = vperm.xlu0 %2805, %v2627_v32  }
  0x36   :  { %1536 = vperm.xlu1 %2806, %v285_v9  }
  0x37   :  { %1531 = vperm.xlu0 %2805, %v284_v11  }
  0x3a   :  { %1806 = vperm.xlu1 %2806, %v2578_v18  }
  0x3b   :  { %1541 = vperm.xlu0 %2805, %v286_v14  }
  0x3e   :  { %1816 = vperm.xlu1 %2806, %v2580_v22  }
  0x3f   :  { %1811 = vperm.xlu0 %2805, %v2579_v19  }
  0x42   :  { %2086 = vperm.xlu1 %2806, %v2601_v25  }
  0x43   :  { %1821 = vperm.xlu0 %2805, %v2581_v23  }
  0x46   :  { %2096 = vperm.xlu1 %2806, %v2603_v27  }
  0x47   :  { %2091 = vperm.xlu0 %2805, %v2602_v26  }
  0x4a   :  { %2366 = vperm.xlu1 %2806, %v2624_v29  }
  0x4b   :  { %2101 = vperm.xlu0 %2805, %v2604_v28  }
  0x4e   :  { %2376 = vperm.xlu1 %2806, %v2626_v31  }
  0x4f   :  { %2371 = vperm.xlu0 %2805, %v2625_v30  }
  0x53   :  { %2381 = vperm.xlu0 %2805, %v2627_v32  }
  0x91   :  { %v300_v53 = vpop.permute.xlu1 %299 }
  0x92   :  { %v290_v35 = vpop.permute.xlu0 %289 }
  0x95   :  { %v305_v9 = vpop.permute.xlu1 %304 }
  0x96   :  { %v295_v50 = vpop.permute.xlu0 %294 }
  0xe7   :  { %v252_v33 = vpop.f32.mrb[0].mxu1 }
  0xe8   :  { %v254_v34 = vpop.f32.mrb[1].mxu1 }
  0xeb   :  { %v258_v37 = vpop.f32.mrb[2].mxu1 }
  0xec   :  { %v3264_v36 = vpop.f32.mrb[0].mxu0  ;;  %v260_v40 = vpop.f32.mrb[3].mxu1 }
  0xed   :  { %v275_v38 = vadd.f32 %v252_v33, %v3264_v36  ;;  %v3267_v39 = vpop.f32.mrb[1].mxu0 }
  0xee   :  { %v276_v41 = vadd.f32 %v254_v34, %v3267_v39 }
  0xef   :  { %v3270_v42 = vadd.f32 %v290_v35, %v275_v38  ;;  %v264_v45 = vpop.f32.mrb[4].mxu1 }
  0xf0   :  { %v3272_v43 = vadd.f32 %v290_v35, %v276_v41  ;;  %v3274_v44 = vpop.f32.mrb[2].mxu0  ;;  %v266_v49 = vpop.f32.mrb[5].mxu1 }
  0xf1   :  { %v2561_v46 = vmul.f32 -1.442695, %v3270_v42  ;;  %v277_v47 = vadd.f32 %v258_v37, %v3274_v44  ;;  %v3278_v48 = vpop.f32.mrb[3].mxu0 }
  0xf2   :  { %v2562_v51 = vmul.f32 -1.442695, %v3272_v43  ;;  %v278_v52 = vadd.f32 %v260_v40, %v3278_v48 }
  0xf3   :  { %2809 = vpow2.f32 %v2561_v46  ;;  %v309_v54 = vadd.f32 %v295_v50, %v277_v47  ;;  %v270_v57 = vpop.f32.mrb[6].mxu1 }
  0xf4   :  { %2811 = vpow2.f32 %v2562_v51  ;;  %v310_v55 = vadd.f32 %v295_v50, %v278_v52  ;;  %v3282_v56 = vpop.f32.mrb[4].mxu0  ;;  %v272_v61 = vpop.f32.mrb[7].mxu1 }
  0xf5   :  { %v2563_v58 = vmul.f32 -1.442695, %v309_v54  ;;  %v279_v59 = vadd.f32 %v264_v45, %v3282_v56  ;;  %v3285_v60 = vpop.f32.mrb[5].mxu0 }
  0xf6   :  { %v2564_v62 = vmul.f32 -1.442695, %v310_v55  ;;  %v280_v63 = vadd.f32 %v266_v49, %v3285_v60 }
  0xf7   :  { %2813 = vpow2.f32 %v2563_v58  ;;  %v311_v1 = vadd.f32 %v300_v53, %v279_v59 }
  0xf8   :  { %2815 = vpow2.f32 %v2564_v62  ;;  %v312_v2 = vadd.f32 %v300_v53, %v280_v63  ;;  %v3288_v3 = vpop.f32.mrb[6].mxu0 }
  0xf9   :  { %v2565_v6 = vmul.f32 -1.442695, %v311_v1  ;;  %v281_v7 = vadd.f32 %v270_v57, %v3288_v3  ;;  %v3291_v8 = vpop.f32.mrb[7].mxu0 }
  0xfa   :  { %v2566_v10 = vmul.f32 -1.442695, %v312_v2  ;;  %v282_v11 = vadd.f32 %v272_v61, %v3291_v8 }
  0xfb   :  { %2817 = vpow2.f32 %v2565_v6  ;;  %v313_v12 = vadd.f32 %v305_v9, %v281_v7 }
  0xfc   :  { %2819 = vpow2.f32 %v2566_v10  ;;  %v314_v14 = vadd.f32 %v305_v9, %v282_v11  ;;  %v464_v11 = vld [vmem:[%s3773_s3] sm:$0xff] }
  0xfd   :  { %v2810_v15 = vpop.eup %2809  ;;  %v2567_v16 = vmul.f32 -1.442695, %v313_v12 }
  0xfe   :  { %v2812_v18 = vpop.eup %2811  ;;  %v339_v19 = vadd.f32 1.0, %v2810_v15  ;;  %v2568_v20 = vmul.f32 -1.442695, %v314_v14 }
  0xff   :  { %v340_v22 = vadd.f32 1.0, %v2812_v18  ;;  %2821 = vpow2.f32 %v2567_v16 }
 0x100   :  { %2823 = vrcp.f32 %v339_v19 }
 0x101   :  { %v2814_v23 = vpop.eup %2813  ;;  %2825 = vpow2.f32 %v2568_v20 }
 0x102   :  { %v2816_v24 = vpop.eup %2815  ;;  %v341_v25 = vadd.f32 1.0, %v2814_v23  ;;  %2827 = vrcp.f32 %v340_v22 }
 0x103   :  { %v342_v26 = vadd.f32 1.0, %v2816_v24 }
 0x104   :  { %2829 = vrcp.f32 %v341_v25  ;;  %v579_v25 = vpop.permute.xlu1 %578 }
 0x105   :  { %v2818_v27 = vpop.eup %2817  ;;  %2831 = vrcp.f32 %v342_v26 }
 0x106   :  { %v2820_v28 = vpop.eup %2819  ;;  %v343_v29 = vadd.f32 1.0, %v2818_v27 }
 0x107   :  { %v344_v31 = vadd.f32 1.0, %v2820_v28 }
 0x108   :  { %2833 = vrcp.f32 %v343_v29 }
 0x109   :  { %v2822_v30 = vpop.eup %2821 }
 0x10a   :  { %v345_v32 = vadd.f32 1.0, %v2822_v30  ;;  %v2824_v33 = vpop.eup %2823 }
 0x10b   :  { %v2826_v34 = vpop.eup %2825  ;;  %v363_v41 = vmul.f32 %v2824_v33, %v3270_v42  ;;  %v3299_v42 = vld [vmem:[%s3777_s7] sm:$0xf] }
 0x10c   :  { %2835 = vrcp.f32 %v345_v32  ;;  %v2828_v35 = vpop.eup %2827  ;;  %v346_v37 = vadd.f32 1.0, %v2826_v34 }
 0x10d   :  { %2837 = vrcp.f32 %v344_v31  ;;  %v364_v46 = vmul.f32 %v2828_v35, %v3272_v43  ;;  %v3306_v43 = vpop.permute.xlu0 %373 }
 0x10e   :  { %v2830_v38 = vpop.eup %2829  ;;  %2839 = vrcp.f32 %v346_v37 }
 0x10f   :  { %v2832_v40 = vpop.eup %2831  ;;  %v365_v45 = vmul.f32 %v2830_v38, %v309_v54 }
 0x110   :  { %v366_v47 = vmul.f32 %v2832_v40, %v310_v55  ;;  %v3308_v55 = vstv %s2570_s22 }
 0x111   :  { %v2740_v49 = vpack.c.bf16 %v365_v45, %v363_v41  ;;  %v584_v33 = vpop.permute.xlu0 %583 }
 0x112   :  { %v2738_v50 = vpack.c.bf16 %v366_v47, %v364_v46  ;;  %v2834_v51 = vpop.eup %2833  ;;  %v589_v47 = vpop.permute.xlu1 %588 }
 0x113   :  { %v367_v57 = vmul.f32 %v2834_v51, %v311_v1  ;;  %v452_v1 = vstv %s451_s23  ;;  %s2638_s23 = sld [smem:[#allocation2 + $0x181]] }
 0x114   :  { %2739 = vmatprep.subr.bf16.mxu1 %v2738_v50 }
 0x115   :  { %2741 = vmatpush1.bf16.msra.mxu1 %v2740_v49 }
 0x116   :  { %v2836_v52 = vpop.eup %2835 }
 0x117   :  { %v2838_v53 = vpop.eup %2837  ;;  %v369_v58 = vmul.f32 %v2836_v52, %v313_v12  ;;  %v465_v12 = vstv %s3304_s24 }
 0x118   :  { %v2840_v59 = vpop.eup %2839  ;;  %v368_v62 = vmul.f32 %v2838_v53, %v312_v2  ;;  %v466_v18 = vmul.f32 %v465_v12, %v464_v11 }
 0x119   :  { %v2744_v61 = vpack.c.bf16 %v369_v58, %v367_v57  ;;  %v370_v63 = vmul.f32 %v2840_v59, %v314_v14  ;;  %v453_v14 = vmul.f32 %v452_v1, %v3147_v0 }
 0x11b   :  { %v2742_v6 = vpack.c.bf16 %v370_v63, %v368_v62 }
 0x11d   :  { %2743 = vmatprep.subr.bf16.mxu1 %v2742_v6 }
 0x11e   :  { %2745 = vmatpush1.bf16.msra.mxu1 %v2744_v61  ;;  %v594_v61 = vpop.permute.xlu0 %593 }
 0x121   :  { %2569 = vmatmul.mubr.msk.f32.vlgmr.msra.gmra.mrb[8].mxu1 %vm376_vm2, %v3299_v42 }
 0x122   :  { %538 = vmatprep.mubr.f32.mxu1 %v3089_v4 }
 0x1f4   :  { %v446_v54 = vpop.f32.mrb[8].mxu1 }
 0x1f5   :  { %v447_v2 = vadd.f32 %v446_v54, %v3306_v43  ;;  %v448_v7 = vpop.f32.mrb[9].mxu1 }
 0x1f6   :  { %v449_v9 = vadd.f32 %v448_v7, %v3306_v43 }
 0x1f7   :  { %v456_v10 = vmul.f32 %v3308_v55, %v447_v2 }
 0x1f8   :  { %v457_v15 = vmul.f32 %v3308_v55, %v449_v9 }
 0x1fa   :  { %v460_v16 = vcombine.low %v456_v10, %v457_v15 }
 0x1fc   :  { %v462_v19 = vadd.f32 %v460_v16, %v453_v14 }
 0x1fe   :  { %v3321_v20 = vadd.f32 %v466_v18, %v462_v19 }
 0x200   :  { %v469_v22 = vcombine.high %v3321_v20, %v3321_v20 }
 0x202   :  { %2572 = vmatprep.subr.msk.mxu1 %vm73_vm0, %v469_v22 }
 0x203   :  { %2573 = vmatpush1.msk.msra.mxu1 %vm73_vm0, %v3321_v20 }
 0x204   :  { %2574 = vmatmul.mubr.msk.f32.vlgmr.msra.gmra.mrb[10].mxu1 %vm60_vm1, %v3159_v5 }
 0x205   :  { %544 = vmatprep.mubr.f32.mxu1 %v3089_v4 }
 0x208   :  { %2575 = vmatmul.mubr.msk.f32.gmra.mrb[12].mxu1 %vm60_vm1, %v3182_v13 }
 0x209   :  { %550 = vmatprep.mubr.f32.mxu1 %v3089_v4 }
 0x20c   :  { %2576 = vmatmul.mubr.msk.f32.gmra.mrb[14].mxu1 %vm60_vm1, %v3203_v17 }
 0x20d   :  { %556 = vmatprep.mubr.f32.mxu1 %v3089_v4 }
 0x210   :  { %2577 = vmatmul.mubr.msk.f32.gmra.mrb[16].mxu1 %vm60_vm1, %v3222_v21 }
 0x211   :  { %1005 = vmatprep.mubr.f32.mxu1 %v3089_v4 }
 0x2d7   :  { %v540_v0 = vpop.f32.mrb[10].mxu1 }
 0x2d8   :  { %v563_v23 = vadd.f32 %v540_v0, %v3264_v36  ;;  %v542_v24 = vpop.f32.mrb[11].mxu1 }
 0x2d9   :  { %v564_v26 = vadd.f32 %v542_v24, %v3267_v39 }
 0x2da   :  { %v3342_v27 = vadd.f32 %v579_v25, %v563_v23 }
 0x2db   :  { %v3344_v28 = vadd.f32 %v579_v25, %v564_v26  ;;  %v546_v29 = vpop.f32.mrb[12].mxu1 }
 0x2dc   :  { %v2582_v30 = vmul.f32 -1.442695, %v3342_v27  ;;  %v565_v31 = vadd.f32 %v546_v29, %v3274_v44  ;;  %v548_v32 = vpop.f32.mrb[13].mxu1 }
 0x2dd   :  { %v2583_v34 = vmul.f32 -1.442695, %v3344_v28  ;;  %v566_v35 = vadd.f32 %v548_v32, %v3278_v48 }
 0x2de   :  { %2841 = vpow2.f32 %v2582_v30  ;;  %v598_v37 = vadd.f32 %v584_v33, %v565_v31 }
 0x2df   :  { %2843 = vpow2.f32 %v2583_v34  ;;  %v599_v38 = vadd.f32 %v584_v33, %v566_v35  ;;  %v552_v40 = vpop.f32.mrb[14].mxu1 }
 0x2e0   :  { %v2584_v41 = vmul.f32 -1.442695, %v598_v37  ;;  %v567_v45 = vadd.f32 %v552_v40, %v3282_v56  ;;  %v554_v46 = vpop.f32.mrb[15].mxu1 }
 0x2e1   :  { %v2585_v49 = vmul.f32 -1.442695, %v599_v38  ;;  %v568_v50 = vadd.f32 %v554_v46, %v3285_v60 }
 0x2e2   :  { %2845 = vpow2.f32 %v2584_v41  ;;  %v600_v51 = vadd.f32 %v589_v47, %v567_v45 }
 0x2e3   :  { %2847 = vpow2.f32 %v2585_v49  ;;  %v601_v52 = vadd.f32 %v589_v47, %v568_v50  ;;  %v558_v53 = vpop.f32.mrb[16].mxu1 }
 0x2e4   :  { %v2586_v57 = vmul.f32 -1.442695, %v600_v51  ;;  %v569_v58 = vadd.f32 %v558_v53, %v3288_v3  ;;  %v560_v59 = vpop.f32.mrb[17].mxu1 }
 0x2e5   :  { %v2587_v62 = vmul.f32 -1.442695, %v601_v52  ;;  %v570_v63 = vadd.f32 %v560_v59, %v3291_v8 }
 0x2e6   :  { %2849 = vpow2.f32 %v2586_v57  ;;  %v602_v6 = vadd.f32 %v594_v61, %v569_v58 }
 0x2e7   :  { %2851 = vpow2.f32 %v2587_v62  ;;  %v603_v54 = vadd.f32 %v594_v61, %v570_v63 }
 0x2e8   :  { %v2842_v1 = vpop.eup %2841  ;;  %v2588_v2 = vmul.f32 -1.442695, %v602_v6 }
 0x2e9   :  { %v2844_v7 = vpop.eup %2843  ;;  %v628_v9 = vadd.f32 1.0, %v2842_v1  ;;  %v2589_v10 = vmul.f32 -1.442695, %v603_v54  ;;  %v746_v1 = vstv %s3361_s29 }
 0x2ea   :  { %v629_v11 = vadd.f32 1.0, %v2844_v7  ;;  %2853 = vpow2.f32 %v2588_v2 }
 0x2eb   :  { %2855 = vrcp.f32 %v628_v9 }
 0x2ec   :  { %v2846_v14 = vpop.eup %2845  ;;  %2857 = vpow2.f32 %v2589_v10 }
 0x2ed   :  { %v2848_v15 = vpop.eup %2847  ;;  %v630_v16 = vadd.f32 1.0, %v2846_v14  ;;  %2859 = vrcp.f32 %v629_v11 }
 0x2ee   :  { %v631_v18 = vadd.f32 1.0, %v2848_v15 }
 0x2ef   :  { %2861 = vrcp.f32 %v630_v16 }
 0x2f0   :  { %v2850_v19 = vpop.eup %2849  ;;  %2863 = vrcp.f32 %v631_v18 }
 0x2f1   :  { %v2852_v22 = vpop.eup %2851  ;;  %v632_v0 = vadd.f32 1.0, %v2850_v19  ;;  %v860_v19 = vpop.permute.xlu1 %859 }
 0x2f2   :  { %v633_v24 = vadd.f32 1.0, %v2852_v22 }
 0x2f3   :  { %2865 = vrcp.f32 %v632_v0 }
 0x2f4   :  { %v2854_v23 = vpop.eup %2853 }
 0x2f5   :  { %v634_v25 = vadd.f32 1.0, %v2854_v23  ;;  %v2856_v26 = vpop.eup %2855 }
 0x2f6   :  { %v2858_v29 = vpop.eup %2857  ;;  %v652_v34 = vmul.f32 %v2856_v26, %v3342_v27 }
 0x2f7   :  { %2867 = vrcp.f32 %v634_v25  ;;  %v2860_v30 = vpop.eup %2859  ;;  %v635_v31 = vadd.f32 1.0, %v2858_v29 }
 0x2f8   :  { %2869 = vrcp.f32 %v633_v24  ;;  %v653_v40 = vmul.f32 %v2860_v30, %v3344_v28  ;;  %v3363_v28 = vstv %s2592_s27  ;;  %v865_v30 = vpop.permute.xlu0 %864 }
 0x2f9   :  { %v2862_v32 = vpop.eup %2861  ;;  %2871 = vrcp.f32 %v635_v31 }
 0x2fa   :  { %v2864_v33 = vpop.eup %2863  ;;  %v654_v35 = vmul.f32 %v2862_v32, %v598_v37 }
 0x2fb   :  { %v655_v41 = vmul.f32 %v2864_v33, %v599_v38 }
 0x2fc   :  { %v2748_v45 = vpack.c.bf16 %v654_v35, %v652_v34 }
 0x2fd   :  { %v2746_v46 = vpack.c.bf16 %v655_v41, %v653_v40  ;;  %v2866_v47 = vpop.eup %2865 }
 0x2fe   :  { %v656_v53 = vmul.f32 %v2866_v47, %v600_v51 }
 0x2ff   :  { %2747 = vmatprep.subr.bf16.mxu0 %v2746_v46  ;;  %v870_v46 = vpop.permute.xlu1 %869 }
 0x300   :  { %2749 = vmatpush1.bf16.msra.mxu0 %v2748_v45 }
 0x301   :  { %v2868_v49 = vpop.eup %2867 }
 0x302   :  { %v2870_v50 = vpop.eup %2869  ;;  %v658_v57 = vmul.f32 %v2868_v49, %v602_v6  ;;  %v732_v6 = vstv %s3359_s28 }
 0x303   :  { %v2872_v58 = vpop.eup %2871  ;;  %v657_v61 = vmul.f32 %v2870_v50, %v601_v52  ;;  %v733_v7 = vmul.f32 %v732_v6, %v3321_v20 }
 0x304   :  { %v2752_v59 = vpack.c.bf16 %v658_v57, %v656_v53  ;;  %v659_v62 = vmul.f32 %v2872_v58, %v603_v54  ;;  %v2594_v54 = vld [vmem:[%s3773_s3 + $0x10] sm:$0xff] }
 0x305   :  { %v747_v10 = vmul.f32 %v2594_v54, %v746_v1 }
 0x306   :  { %v2750_v63 = vpack.c.bf16 %v659_v62, %v657_v61  ;;  %v875_v62 = vpop.permute.xlu0 %874 }
 0x308   :  { %2751 = vmatprep.subr.bf16.mxu0 %v2750_v63 }
 0x309   :  { %2753 = vmatpush1.bf16.msra.mxu0 %v2752_v59 }
 0x30c   :  { %2590 = vmatmul.mubr.msk.f32.vlgmr.msra.gmra.mrb[8].mxu0 %vm376_vm2, %v3299_v42 }
 0x30d   :  { %819 = vmatprep.mubr.f32.mxu0 %v3089_v4 }
 0x3df   :  { %v726_v27 = vpop.f32.mrb[8].mxu0 }
 0x3e0   :  { %v727_v37 = vadd.f32 %v726_v27, %v3306_v43  ;;  %v728_v38 = vpop.f32.mrb[9].mxu0 }
 0x3e1   :  { %v729_v51 = vadd.f32 %v728_v38, %v3306_v43 }
 0x3e2   :  { %v736_v52 = vmul.f32 %v3363_v28, %v727_v37 }
 0x3e3   :  { %v737_v2 = vmul.f32 %v3363_v28, %v729_v51 }
 0x3e5   :  { %v740_v9 = vcombine.low %v736_v52, %v737_v2 }
 0x3e7   :  { %v742_v11 = vadd.f32 %v740_v9, %v733_v7 }
 0x3e9   :  { %v3379_v14 = vadd.f32 %v747_v10, %v742_v11 }
 0x3eb   :  { %v750_v15 = vcombine.high %v3379_v14, %v3379_v14 }
 0x3ed   :  { %2595 = vmatprep.subr.msk.mxu0 %vm73_vm0, %v750_v15 }
 0x3ee   :  { %2596 = vmatpush1.msk.msra.mxu0 %vm73_vm0, %v3379_v14 }
 0x3ef   :  { %2597 = vmatmul.mubr.msk.f32.vlgmr.msra.gmra.mrb[10].mxu0 %vm60_vm1, %v3159_v5 }
 0x3f0   :  { %825 = vmatprep.mubr.f32.mxu0 %v3089_v4 }
 0x3f3   :  { %2598 = vmatmul.mubr.msk.f32.gmra.mrb[12].mxu0 %vm60_vm1, %v3182_v13 }
 0x3f4   :  { %831 = vmatprep.mubr.f32.mxu0 %v3089_v4 }
 0x3f7   :  { %2599 = vmatmul.mubr.msk.f32.gmra.mrb[14].mxu0 %vm60_vm1, %v3203_v17 }
 0x3f8   :  { %837 = vmatprep.mubr.f32.mxu0 %v3089_v4 }
 0x3fb   :  { %2600 = vmatmul.mubr.msk.f32.gmra.mrb[16].mxu0 %vm60_vm1, %v3222_v21 }
 0x3fc   :  { %1286 = vmatprep.mubr.f32.mxu0 %v3089_v4 }
 0x4c2   :  { %v821_v20 = vpop.f32.mrb[10].mxu0 }
 0x4c3   :  { %v844_v16 = vadd.f32 %v821_v20, %v3264_v36  ;;  %v823_v18 = vpop.f32.mrb[11].mxu0 }
 0x4c4   :  { %v845_v22 = vadd.f32 %v823_v18, %v3267_v39 }
 0x4c5   :  { %v3400_v0 = vadd.f32 %v860_v19, %v844_v16 }
 0x4c6   :  { %v3402_v23 = vadd.f32 %v860_v19, %v845_v22  ;;  %v827_v24 = vpop.f32.mrb[12].mxu0 }
 0x4c7   :  { %v2605_v25 = vmul.f32 -1.442695, %v3400_v0  ;;  %v846_v26 = vadd.f32 %v827_v24, %v3274_v44  ;;  %v829_v29 = vpop.f32.mrb[13].mxu0 }
 0x4c8   :  { %v2606_v31 = vmul.f32 -1.442695, %v3402_v23  ;;  %v847_v32 = vadd.f32 %v829_v29, %v3278_v48 }
 0x4c9   :  { %2873 = vpow2.f32 %v2605_v25  ;;  %v879_v33 = vadd.f32 %v865_v30, %v846_v26 }
 0x4ca   :  { %2875 = vpow2.f32 %v2606_v31  ;;  %v880_v34 = vadd.f32 %v865_v30, %v847_v32  ;;  %v833_v35 = vpop.f32.mrb[14].mxu0 }
 0x4cb   :  { %v2607_v40 = vmul.f32 -1.442695, %v879_v33  ;;  %v848_v41 = vadd.f32 %v833_v35, %v3282_v56  ;;  %v835_v45 = vpop.f32.mrb[15].mxu0 }
 0x4cc   :  { %v2608_v47 = vmul.f32 -1.442695, %v880_v34  ;;  %v849_v49 = vadd.f32 %v835_v45, %v3285_v60 }
 0x4cd   :  { %2877 = vpow2.f32 %v2607_v40  ;;  %v881_v50 = vadd.f32 %v870_v46, %v848_v41 }
 0x4ce   :  { %2879 = vpow2.f32 %v2608_v47  ;;  %v882_v53 = vadd.f32 %v870_v46, %v849_v49  ;;  %v839_v57 = vpop.f32.mrb[16].mxu0 }
 0x4cf   :  { %v2609_v58 = vmul.f32 -1.442695, %v881_v50  ;;  %v850_v59 = vadd.f32 %v839_v57, %v3288_v3  ;;  %v841_v61 = vpop.f32.mrb[17].mxu0 }
 0x4d0   :  { %v2610_v63 = vmul.f32 -1.442695, %v882_v53  ;;  %v851_v27 = vadd.f32 %v841_v61, %v3291_v8 }
 0x4d1   :  { %2881 = vpow2.f32 %v2609_v58  ;;  %v883_v37 = vadd.f32 %v875_v62, %v850_v59 }
 0x4d2   :  { %2883 = vpow2.f32 %v2610_v63  ;;  %v884_v38 = vadd.f32 %v875_v62, %v851_v27 }
 0x4d3   :  { %v2874_v51 = vpop.eup %2873  ;;  %v2611_v52 = vmul.f32 -1.442695, %v883_v37 }
 0x4d4   :  { %v2876_v54 = vpop.eup %2875  ;;  %v909_v2 = vadd.f32 1.0, %v2874_v51  ;;  %v2612_v7 = vmul.f32 -1.442695, %v884_v38 }
 0x4d5   :  { %v910_v9 = vadd.f32 1.0, %v2876_v54  ;;  %2885 = vpow2.f32 %v2611_v52 }
 0x4d6   :  { %2887 = vrcp.f32 %v909_v2  ;;  %v1027_v2 = vstv %s3419_s13 }
 0x4d7   :  { %v2878_v10 = vpop.eup %2877  ;;  %2889 = vpow2.f32 %v2612_v7 }
 0x4d8   :  { %v2880_v11 = vpop.eup %2879  ;;  %v911_v15 = vadd.f32 1.0, %v2878_v10  ;;  %2891 = vrcp.f32 %v910_v9 }
 0x4d9   :  { %v912_v20 = vadd.f32 1.0, %v2880_v11 }
 0x4da   :  { %2893 = vrcp.f32 %v911_v15 }
 0x4db   :  { %v2882_v16 = vpop.eup %2881  ;;  %2895 = vrcp.f32 %v912_v20 }
 0x4dc   :  { %v2884_v18 = vpop.eup %2883  ;;  %v913_v19 = vadd.f32 1.0, %v2882_v16 }
 0x4dd   :  { %v914_v24 = vadd.f32 1.0, %v2884_v18 }
 0x4de   :  { %2897 = vrcp.f32 %v913_v19 }
 0x4df   :  { %v2886_v22 = vpop.eup %2885 }
 0x4e0   :  { %v915_v25 = vadd.f32 1.0, %v2886_v22  ;;  %v2888_v26 = vpop.eup %2887 }
 0x4e1   :  { %v2890_v29 = vpop.eup %2889  ;;  %v933_v40 = vmul.f32 %v2888_v26, %v3400_v0 }
 0x4e2   :  { %2899 = vrcp.f32 %v915_v25  ;;  %v2892_v30 = vpop.eup %2891  ;;  %v916_v31 = vadd.f32 1.0, %v2890_v29 }
 0x4e3   :  { %2901 = vrcp.f32 %v914_v24  ;;  %v934_v45 = vmul.f32 %v2892_v30, %v3402_v23  ;;  %v3421_v23 = vstv %s2615_s11  ;;  %v1141_v24 = vpop.permute.xlu1 %1140 }
 0x4e4   :  { %v2894_v32 = vpop.eup %2893  ;;  %2903 = vrcp.f32 %v916_v31 }
 0x4e5   :  { %v2896_v35 = vpop.eup %2895  ;;  %v935_v41 = vmul.f32 %v2894_v32, %v879_v33 }
 0x4e6   :  { %v936_v46 = vmul.f32 %v2896_v35, %v880_v34 }
 0x4e7   :  { %v2756_v47 = vpack.c.bf16 %v935_v41, %v933_v40 }
 0x4e8   :  { %v2754_v49 = vpack.c.bf16 %v936_v46, %v934_v45  ;;  %v2898_v57 = vpop.eup %2897 }
 0x4e9   :  { %v937_v61 = vmul.f32 %v2898_v57, %v881_v50 }
 0x4ea   :  { %2755 = vmatprep.subr.bf16.mxu1 %v2754_v49 }
 0x4eb   :  { %2757 = vmatpush1.bf16.msra.mxu1 %v2756_v47  ;;  %v1151_v47 = vpop.permute.xlu1 %1150 }
 0x4ec   :  { %v2900_v58 = vpop.eup %2899 }
 0x4ed   :  { %v2902_v59 = vpop.eup %2901  ;;  %v939_v62 = vmul.f32 %v2900_v58, %v883_v37  ;;  %v1013_v37 = vstv %s3417_s12 }
 0x4ee   :  { %v2904_v63 = vpop.eup %2903  ;;  %v938_v51 = vmul.f32 %v2902_v59, %v882_v53  ;;  %v1014_v9 = vmul.f32 %v1013_v37, %v3379_v14  ;;  %v3459_v14 = vld [vmem:[%s3772_s2 + $0x8] sm:$0xff] }
 0x4ef   :  { %v2760_v27 = vpack.c.bf16 %v939_v62, %v937_v61  ;;  %v940_v52 = vmul.f32 %v2904_v63, %v884_v38  ;;  %v2617_v38 = vld [vmem:[%s3773_s3 + $0x20] sm:$0xff]  ;;  %v1418_v18 = vcombine.high %v3459_v14, %v3459_v14 }
 0x4f0   :  { %v1028_v11 = vmul.f32 %v2617_v38, %v1027_v2 }
 0x4f1   :  { %v2758_v54 = vpack.c.bf16 %v940_v52, %v938_v51 }
 0x4f3   :  { %2759 = vmatprep.subr.bf16.mxu1 %v2758_v54 }
 0x4f4   :  { %2761 = vmatpush1.bf16.msra.mxu1 %v2760_v27 }
 0x4f7   :  { %2613 = vmatmul.mubr.msk.f32.vlgmr.msra.gmra.mrb[18].mxu1 %vm376_vm2, %v3299_v42 }
 0x4f8   :  { %1100 = vmatprep.mubr.f32.mxu1 %v3089_v4 }
 0x5ca   :  { %v1007_v0 = vpop.f32.mrb[18].mxu1 }
 0x5cb   :  { %v1008_v33 = vadd.f32 %v1007_v0, %v3306_v43  ;;  %v1009_v34 = vpop.f32.mrb[19].mxu1 }
 0x5cc   :  { %v1010_v50 = vadd.f32 %v1009_v34, %v3306_v43 }
 0x5cd   :  { %v1017_v53 = vmul.f32 %v3421_v23, %v1008_v33 }
 0x5ce   :  { %v1018_v7 = vmul.f32 %v3421_v23, %v1010_v50 }
 0x5d0   :  { %v1021_v10 = vcombine.low %v1017_v53, %v1018_v7 }
 0x5d2   :  { %v1023_v15 = vadd.f32 %v1021_v10, %v1014_v9 }
 0x5d4   :  { %v3437_v20 = vadd.f32 %v1028_v11, %v1023_v15 }
 0x5d6   :  { %v1031_v16 = vcombine.high %v3437_v20, %v3437_v20 }
 0x5d8   :  { %2618 = vmatprep.subr.msk.mxu1 %vm73_vm0, %v1031_v16 }
 0x5d9   :  { %2619 = vmatpush1.msk.msra.mxu1 %vm73_vm0, %v3437_v20 }
 0x5da   :  { %2620 = vmatmul.mubr.msk.f32.vlgmr.msra.gmra.mrb[20].mxu1 %vm60_vm1, %v3159_v5  ;;  %2650 = vmatprep.subr.msk.mxu1 %vm73_vm0, %v1418_v18 }
 0x5db   :  { %1106 = vmatprep.mubr.f32.mxu1 %v3089_v4  ;;  %2651 = vmatpush1.msk.msra.mxu1 %vm73_vm0, %v3459_v14 }
 0x5de   :  { %2621 = vmatmul.mubr.msk.f32.gmra.mrb[22].mxu1 %vm60_vm1, %v3182_v13 }
 0x5df   :  { %1112 = vmatprep.mubr.f32.mxu1 %v3089_v4 }
 0x5e2   :  { %2622 = vmatmul.mubr.msk.f32.gmra.mrb[24].mxu1 %vm60_vm1, %v3203_v17 }
 0x5e3   :  { %1118 = vmatprep.mubr.f32.mxu1 %v3089_v4 }
 0x5e6   :  { %2623 = vmatmul.mubr.msk.f32.gmra.mrb[26].mxu1 %vm60_vm1, %v3222_v21 }
 0x5e7   :  { %1487 = vmatprep.mubr.f32.mxu1 %v3089_v4 }
 0x5ea   :  { %2652 = vmatmul.mubr.msk.f32.vlgmr.msra.gmra.mrb[28].mxu1 %vm60_vm1, %v3159_v5 }
 0x5eb   :  { %1493 = vmatprep.mubr.f32.mxu1 %v3089_v4 }
 0x5ee   :  { %2653 = vmatmul.mubr.msk.f32.gmra.mrb[30].mxu1 %vm60_vm1, %v3182_v13 }
 0x5ef   :  { %1499 = vmatprep.mubr.f32.mxu1 %v3089_v4 }
 0x5f2   :  { %2654 = vmatmul.mubr.msk.f32.gmra.mrb[32].mxu1 %vm60_vm1, %v3203_v17 }
 0x5f3   :  { %1505 = vmatprep.mubr.f32.mxu1 %v3089_v4 }
 0x5f6   :  { %2655 = vmatmul.mubr.msk.f32.gmra.mrb[34].mxu1 %vm60_vm1, %v3222_v21  ;;  %v1146_v21 = vpop.permute.xlu0 %1145 }
 0x5f7   :  { %1952 = vmatprep.mubr.f32.mxu1 %v3089_v4 }
 0x5fa   :  { %v1156_v63 = vpop.permute.xlu0 %1155 }
 0x6ad   :  { %v1102_v19 = vpop.f32.mrb[20].mxu1 }
 0x6ae   :  { %v1125_v5 = vadd.f32 %v1102_v19, %v3264_v36  ;;  %v1104_v22 = vpop.f32.mrb[21].mxu1 }
 0x6af   :  { %v1126_v25 = vadd.f32 %v1104_v22, %v3267_v39 }
 0x6b0   :  { %v3480_v13 = vadd.f32 %v1141_v24, %v1125_v5 }
 0x6b1   :  { %v3482_v26 = vadd.f32 %v1141_v24, %v1126_v25  ;;  %v1108_v29 = vpop.f32.mrb[22].mxu1 }
 0x6b2   :  { %v2628_v17 = vmul.f32 -1.442695, %v3480_v13  ;;  %v1127_v30 = vadd.f32 %v1108_v29, %v3274_v44  ;;  %v1110_v31 = vpop.f32.mrb[23].mxu1 }
 0x6b3   :  { %v2629_v32 = vmul.f32 -1.442695, %v3482_v26  ;;  %v1128_v35 = vadd.f32 %v1110_v31, %v3278_v48 }
 0x6b4   :  { %2905 = vpow2.f32 %v2628_v17  ;;  %v1160_v36 = vadd.f32 %v1146_v21, %v1127_v30 }
 0x6b5   :  { %2907 = vpow2.f32 %v2629_v32  ;;  %v1161_v40 = vadd.f32 %v1146_v21, %v1128_v35  ;;  %v1114_v39 = vpop.f32.mrb[24].mxu1  ;;  %v2641_v32 = vld [vmem:[%s3771_s1 + $0x8] sm:$0xff] }
 0x6b6   :  { %v2630_v41 = vmul.f32 -1.442695, %v1160_v36  ;;  %v1129_v45 = vadd.f32 %v1114_v39, %v3282_v56  ;;  %v1116_v46 = vpop.f32.mrb[25].mxu1 }
 0x6b7   :  { %v2631_v49 = vmul.f32 -1.442695, %v1161_v40  ;;  %v1130_v57 = vadd.f32 %v1116_v46, %v3285_v60 }
 0x6b8   :  { %2909 = vpow2.f32 %v2630_v41  ;;  %v1162_v44 = vadd.f32 %v1151_v47, %v1129_v45  ;;  %v1318_v41 = vmul.f32 2.0, %v2641_v32  ;;  %v1532_v32 = vpop.permute.xlu0 %1531 }
 0x6b9   :  { %2911 = vpow2.f32 %v2631_v49  ;;  %v1163_v58 = vadd.f32 %v1151_v47, %v1130_v57  ;;  %v1120_v59 = vpop.f32.mrb[26].mxu1 }
 0x6ba   :  { %v2632_v61 = vmul.f32 -1.442695, %v1162_v44  ;;  %v1131_v48 = vadd.f32 %v1120_v59, %v3288_v3  ;;  %v1122_v62 = vpop.f32.mrb[27].mxu1 }
 0x6bb   :  { %v2633_v27 = vmul.f32 -1.442695, %v1163_v58  ;;  %v1132_v51 = vadd.f32 %v1122_v62, %v3291_v8 }
 0x6bc   :  { %2913 = vpow2.f32 %v2632_v61  ;;  %v1164_v56 = vadd.f32 %v1156_v63, %v1131_v48  ;;  %v3068_v48 = vld [vmem:[%s3774_s4 + $0x18] sm:$0xff] }
 0x6bd   :  { %2915 = vpow2.f32 %v2633_v27  ;;  %v1165_v52 = vadd.f32 %v1156_v63, %v1132_v51  ;;  %v1489_v62 = vpop.f32.mrb[28].mxu1 }
 0x6be   :  { %v2906_v54 = vpop.eup %2905  ;;  %v2634_v0 = vmul.f32 -1.442695, %v1164_v56  ;;  %v1491_v63 = vpop.f32.mrb[29].mxu1 }
 0x6bf   :  { %v2908_v60 = vpop.eup %2907  ;;  %v1190_v33 = vadd.f32 1.0, %v2906_v54  ;;  %v2635_v34 = vmul.f32 -1.442695, %v1165_v52 }
 0x6c0   :  { %v1191_v50 = vadd.f32 1.0, %v2908_v60  ;;  %2917 = vpow2.f32 %v2634_v0 }
 0x6c1   :  { %2919 = vrcp.f32 %v1190_v33  ;;  %v1495_v27 = vpop.f32.mrb[30].mxu1  ;;  %v3526_v33 = vstv %s2638_s23 }
 0x6c2   :  { %v2910_v53 = vpop.eup %2909  ;;  %2921 = vpow2.f32 %v2635_v34  ;;  %v1497_v51 = vpop.f32.mrb[31].mxu1 }
 0x6c3   :  { %v2912_v38 = vpop.eup %2911  ;;  %v1192_v3 = vadd.f32 1.0, %v2910_v53  ;;  %2923 = vrcp.f32 %v1191_v50 }
 0x6c4   :  { %v1193_v7 = vadd.f32 1.0, %v2912_v38 }
 0x6c5   :  { %2925 = vrcp.f32 %v1192_v3  ;;  %v1294_v3 = vstv %s3522_s25 }
 0x6c6   :  { %v2914_v8 = vpop.eup %2913  ;;  %2927 = vrcp.f32 %v1193_v7  ;;  %v2640_v7 = vld [vmem:[%s3773_s3 + $0x30] sm:$0xff] }
 0x6c7   :  { %v2916_v9 = vpop.eup %2915  ;;  %v1194_v10 = vadd.f32 1.0, %v2914_v8  ;;  %v1308_v8 = vstv %s3524_s26 }
 0x6c8   :  { %v1195_v15 = vadd.f32 1.0, %v2916_v9 }
 0x6c9   :  { %2929 = vrcp.f32 %v1194_v10 }
 0x6ca   :  { %v2918_v11 = vpop.eup %2917 }
 0x6cb   :  { %v1196_v16 = vadd.f32 1.0, %v2918_v11  ;;  %v2920_v18 = vpop.eup %2919 }
 0x6cc   :  { %v2922_v19 = vpop.eup %2921  ;;  %v1214_v29 = vmul.f32 %v2920_v18, %v3480_v13  ;;  %v2642_v13 = vadd.f32 -1.0, %v1318_v41  ;;  %v1295_v18 = vmul.f32 %v1294_v3, %v3437_v20 }
 0x6cd   :  { %2931 = vrcp.f32 %v1196_v16  ;;  %v2924_v5 = vpop.eup %2923  ;;  %v1197_v22 = vadd.f32 1.0, %v2922_v19  ;;  %v1527_v16 = vpop.permute.xlu1 %1526 }
 0x6ce   :  { %2933 = vrcp.f32 %v1195_v15  ;;  %v1215_v30 = vmul.f32 %v2924_v5, %v3482_v26  ;;  %v1321_v61 = vcombine.high %v2642_v13, %v2642_v13  ;;  %v1309_v5 = vmul.f32 %v2640_v7, %v1308_v8 }
 0x6cf   :  { %v2926_v24 = vpop.eup %2925  ;;  %2935 = vrcp.f32 %v1197_v22 }
 0x6d0   :  { %v2928_v25 = vpop.eup %2927  ;;  %v1216_v17 = vmul.f32 %v2926_v24, %v1160_v36 }
 0x6d1   :  { %v1217_v31 = vmul.f32 %v2928_v25, %v1161_v40 }
 0x6d2   :  { %v2764_v21 = vpack.c.bf16 %v1216_v17, %v1214_v29 }
 0x6d3   :  { %v2762_v35 = vpack.c.bf16 %v1217_v31, %v1215_v30  ;;  %v2930_v39 = vpop.eup %2929 }
 0x6d4   :  { %v1218_v47 = vmul.f32 %v2930_v39, %v1162_v44  ;;  %v3065_v44 = vld [vmem:[%s3774_s4] sm:$0xff] }
 0x6d5   :  { %2763 = vmatprep.subr.bf16.mxu0 %v2762_v35 }
 0x6d6   :  { %2765 = vmatpush1.bf16.msra.mxu0 %v2764_v21 }
 0x6d7   :  { %v2932_v45 = vpop.eup %2931 }
 0x6d8   :  { %v2934_v46 = vpop.eup %2933  ;;  %v1220_v49 = vmul.f32 %v2932_v45, %v1164_v56  ;;  %v1501_v56 = vpop.f32.mrb[32].mxu1 }
 0x6d9   :  { %v2936_v36 = vpop.eup %2935  ;;  %v1219_v59 = vmul.f32 %v2934_v46, %v1163_v58  ;;  %v3066_v58 = vld [vmem:[%s3774_s4 + $0x8] sm:$0xff] }
 0x6da   :  { %v2768_v57 = vpack.c.bf16 %v1220_v49, %v1218_v47  ;;  %v1221_v26 = vmul.f32 %v2936_v36, %v1165_v52  ;;  %v1503_v52 = vpop.f32.mrb[33].mxu1 }
 0x6db   :  { %v1507_v54 = vpop.f32.mrb[34].mxu1 }
 0x6dc   :  { %v2766_v40 = vpack.c.bf16 %v1221_v26, %v1219_v59  ;;  %v1509_v0 = vpop.f32.mrb[35].mxu1 }
 0x6de   :  { %2767 = vmatprep.subr.bf16.mxu0 %v2766_v40 }
 0x6df   :  { %2769 = vmatpush1.bf16.msra.mxu0 %v2768_v57  ;;  %v1537_v57 = vpop.permute.xlu1 %1536 }
 0x6e0   :  { %2643 = vmatprep.subr.msk.mxu0 %vm73_vm0, %v1321_v61 }
 0x6e2   :  { %2636 = vmatmul.mubr.msk.f32.vlgmr.msra.gmra.mrb[18].mxu0 %vm376_vm2, %v3299_v42  ;;  %v3067_v42 = vld [vmem:[%s3774_s4 + $0x10] sm:$0xff] }
 0x6e3   :  { %2644 = vmatpush1.msk.msra.mxu0 %vm73_vm0, %v2642_v13  ;;  %1390 = vmatprep.mubr.f32.mxu0 %v3089_v4 }
 0x6e6   :  { %2645 = vmatmul.mubr.msk.f32.vlgmr.msra.gmra.mrb[20].mxu0 %vm60_vm1, %v3065_v44 }
 0x6e7   :  { %1396 = vmatprep.mubr.f32.mxu0 %v3089_v4 }
 0x6ea   :  { %2646 = vmatmul.mubr.msk.f32.gmra.mrb[22].mxu0 %vm60_vm1, %v3066_v58 }
 0x6eb   :  { %1402 = vmatprep.mubr.f32.mxu0 %v3089_v4 }
 0x6ee   :  { %2647 = vmatmul.mubr.msk.f32.gmra.mrb[24].mxu0 %vm60_vm1, %v3067_v42 }
 0x6ef   :  { %1408 = vmatprep.mubr.f32.mxu0 %v3089_v4 }
 0x6f2   :  { %2648 = vmatmul.mubr.msk.f32.gmra.mrb[26].mxu0 %vm60_vm1, %v3068_v48 }
 0x6f3   :  { %1672 = vmatprep.mubr.f32.mxu0 %v3089_v4 }
 0x7b5   :  { %v1288_v60 = vpop.f32.mrb[18].mxu0 }
 0x7b6   :  { %v1289_v34 = vadd.f32 %v1288_v60, %v3306_v43  ;;  %v1290_v50 = vpop.f32.mrb[19].mxu0 }
 0x7b7   :  { %v1291_v53 = vadd.f32 %v1290_v50, %v3306_v43 }
 0x7b8   :  { %v1298_v38 = vmul.f32 %v3526_v33, %v1289_v34 }
 0x7b9   :  { %v1299_v9 = vmul.f32 %v3526_v33, %v1291_v53  ;;  %v3537_v10 = vpop.f32.mrb[20].mxu0 }
 0x7ba   :  { %v1512_v11 = vadd.f32 %v1489_v62, %v3537_v10  ;;  %v3540_v15 = vpop.f32.mrb[21].mxu0 }
 0x7bb   :  { %v1302_v19 = vcombine.low %v1298_v38, %v1299_v9  ;;  %v1513_v22 = vadd.f32 %v1491_v63, %v3540_v15 }
 0x7bc   :  { %v3548_v24 = vadd.f32 %v1527_v16, %v1512_v11 }
 0x7bd   :  { %v1304_v25 = vadd.f32 %v1302_v19, %v1295_v18  ;;  %v3550_v29 = vadd.f32 %v1527_v16, %v1513_v22  ;;  %v3552_v17 = vpop.f32.mrb[22].mxu0 }
 0x7be   :  { %v2656_v30 = vmul.f32 -1.442695, %v3548_v24  ;;  %v1514_v31 = vadd.f32 %v1495_v27, %v3552_v17  ;;  %v3556_v21 = vpop.f32.mrb[23].mxu0  ;;  %v1542_v27 = vpop.permute.xlu0 %1541 }
 0x7bf   :  { %v1310_v20 = vadd.f32 %v1309_v5, %v1304_v25  ;;  %v2657_v35 = vmul.f32 -1.442695, %v3550_v29  ;;  %v1515_v39 = vadd.f32 %v1497_v51, %v3556_v21 }
 0x7c0   :  { %2937 = vpow2.f32 %v2656_v30  ;;  %v3560_v41 = vadd.f32 %v1532_v32, %v1514_v31 }
 0x7c1   :  { %v1311_v45 = vadd.f32 1.0, %v1310_v20  ;;  %2939 = vpow2.f32 %v2657_v35  ;;  %v1547_v46 = vadd.f32 %v1532_v32, %v1515_v39  ;;  %v3562_v47 = vpop.f32.mrb[24].mxu0 }
 0x7c2   :  { %v2658_v49 = vmul.f32 -1.442695, %v3560_v41  ;;  %v1516_v13 = vadd.f32 %v1501_v56, %v3562_v47  ;;  %v3566_v36 = vpop.f32.mrb[25].mxu0 }
 0x7c3   :  { %v1312_v59 = vmul.f32 0.5, %v1311_v45  ;;  %v2659_v26 = vmul.f32 -1.442695, %v1547_v46  ;;  %v1517_v40 = vadd.f32 %v1503_v52, %v3566_v36 }
 0x7c4   :  { %2941 = vpow2.f32 %v2658_v49  ;;  %v1548_v61 = vadd.f32 %v1537_v57, %v1516_v13 }
 0x7c5   :  { %v1313_v44 = vmax.f32 %v1312_v59, 0.0  ;;  %2943 = vpow2.f32 %v2659_v26  ;;  %v1549_v58 = vadd.f32 %v1537_v57, %v1517_v40  ;;  %v3569_v42 = vpop.f32.mrb[26].mxu0 }
 0x7c6   :  { %v2660_v48 = vmul.f32 -1.442695, %v1548_v61  ;;  %v1518_v62 = vadd.f32 %v1507_v54, %v3569_v42  ;;  %v3572_v63 = vpop.f32.mrb[27].mxu0 }
 0x7c7   :  { %v1314_v51 = vmin.f32 %v1313_v44, 1.0  ;;  %v2661_v56 = vmul.f32 -1.442695, %v1549_v58  ;;  %v1519_v60 = vadd.f32 %v1509_v0, %v3572_v63 }
 0x7c8   :  { %2945 = vpow2.f32 %v2660_v48  ;;  %v1550_v34 = vadd.f32 %v1542_v27, %v1518_v62 }
 0x7c9   :  { %1315 = vst [vmem:[%s3779_s9] sm:$0xff] %v1314_v51  ;;  %2947 = vpow2.f32 %v2661_v56  ;;  %v1551_v52 = vadd.f32 %v1542_v27, %v1519_v60 }
 0x7ca   :  { %v2938_v50 = vpop.eup %2937  ;;  %v2662_v53 = vmul.f32 -1.442695, %v1550_v34 }
 0x7cb   :  { %v2940_v38 = vpop.eup %2939  ;;  %v1576_v7 = vadd.f32 1.0, %v2938_v50  ;;  %v2663_v54 = vmul.f32 -1.442695, %v1551_v52 }
 0x7cc   :  { %v1577_v9 = vadd.f32 1.0, %v2940_v38  ;;  %2949 = vpow2.f32 %v2662_v53 }
 0x7cd   :  { %2951 = vrcp.f32 %v1576_v7 }
 0x7ce   :  { %v2942_v11 = vpop.eup %2941  ;;  %2953 = vpow2.f32 %v2663_v54 }
 0x7cf   :  { %v2944_v16 = vpop.eup %2943  ;;  %v1578_v18 = vadd.f32 1.0, %v2942_v11  ;;  %2955 = vrcp.f32 %v1577_v9 }
 0x7d0   :  { %v1579_v0 = vadd.f32 1.0, %v2944_v16 }
 0x7d1   :  { %2957 = vrcp.f32 %v1578_v18 }
 0x7d2   :  { %v2946_v19 = vpop.eup %2945  ;;  %2959 = vrcp.f32 %v1579_v0 }
 0x7d3   :  { %v2948_v5 = vpop.eup %2947  ;;  %v1580_v22 = vadd.f32 1.0, %v2946_v19 }
 0x7d4   :  { %v1581_v30 = vadd.f32 1.0, %v2948_v5  ;;  %v3633_v5 = vld [vmem:[%s3775_s5 + $0x18] sm:$0xff] }
 0x7d5   :  { %2961 = vrcp.f32 %v1580_v22 }
 0x7d6   :  { %v2950_v25 = vpop.eup %2949 }
 0x7d7   :  { %v1582_v31 = vadd.f32 1.0, %v2950_v25  ;;  %v2952_v32 = vpop.eup %2951 }
 0x7d8   :  { %v2954_v20 = vpop.eup %2953  ;;  %v1600_v13 = vmul.f32 %v2952_v32, %v3548_v24  ;;  %v3584_v24 = vld [vmem:[%s3777_s7] sm:$0xf] }
 0x7d9   :  { %2963 = vrcp.f32 %v1582_v31  ;;  %v2956_v35 = vpop.eup %2955  ;;  %v1583_v39 = vadd.f32 1.0, %v2954_v20  ;;  %v1807_v31 = vpop.permute.xlu1 %1806 }
 0x7da   :  { %2965 = vrcp.f32 %v1581_v30  ;;  %v1601_v59 = vmul.f32 %v2956_v35, %v3550_v29 }
 0x7db   :  { %v2958_v45 = vpop.eup %2957  ;;  %2967 = vrcp.f32 %v1583_v39 }
 0x7dc   :  { %v2960_v49 = vpop.eup %2959  ;;  %v1602_v57 = vmul.f32 %v2958_v45, %v3560_v41 }
 0x7dd   :  { %v1603_v26 = vmul.f32 %v2960_v49, %v1547_v46 }
 0x7de   :  { %v2772_v40 = vpack.c.bf16 %v1602_v57, %v1600_v13  ;;  %v1812_v57 = vpop.permute.xlu0 %1811 }
 0x7df   :  { %v2770_v44 = vpack.c.bf16 %v1603_v26, %v1601_v59  ;;  %v2962_v48 = vpop.eup %2961 }
 0x7e0   :  { %v1604_v51 = vmul.f32 %v2962_v48, %v1548_v61  ;;  %v1680_v61 = vstv %s1679_s15 }
 0x7e1   :  { %2771 = vmatprep.subr.bf16.mxu0 %v2770_v44  ;;  %v1681_v54 = vmul.f32 %v3459_v14, %v1680_v61  ;;  %v3609_v14 = vld [vmem:[%s3775_s5] sm:$0xff] }
 0x7e2   :  { %2773 = vmatpush1.bf16.msra.mxu0 %v2772_v40  ;;  %v1822_v61 = vpop.permute.xlu0 %1821 }
 0x7e3   :  { %v2964_v62 = vpop.eup %2963 }
 0x7e4   :  { %v2966_v27 = vpop.eup %2965  ;;  %v1606_v56 = vmul.f32 %v2964_v62, %v1550_v34 }
 0x7e5   :  { %v2968_v60 = vpop.eup %2967  ;;  %v1605_v53 = vmul.f32 %v2966_v27, %v1549_v58 }
 0x7e6   :  { %v2776_v50 = vpack.c.bf16 %v1606_v56, %v1604_v51  ;;  %v1607_v38 = vmul.f32 %v2968_v60, %v1551_v52  ;;  %v2667_v52 = vld [vmem:[%s3773_s3 + $0x8] sm:$0xff]  ;;  %v1817_v56 = vpop.permute.xlu1 %1816 }
 0x7e7   :  { %v1695_v16 = vmul.f32 %v2667_v52, %v465_v12  ;;  %v3625_v12 = vld [vmem:[%s3775_s5 + $0x10] sm:$0xff] }
 0x7e8   :  { %v2774_v7 = vpack.c.bf16 %v1607_v38, %v1605_v53 }
 0x7ea   :  { %2775 = vmatprep.subr.bf16.mxu0 %v2774_v7 }
 0x7eb   :  { %2777 = vmatpush1.bf16.msra.mxu0 %v2776_v50 }
 0x7ee   :  { %2664 = vmatmul.mubr.msk.f32.vlgmr.msra.gmra.mrb[28].mxu0 %vm376_vm2, %v3584_v24 }
 0x7ef   :  { %1767 = vmatprep.mubr.f32.mxu0 %v3089_v4 }
 0x8c1   :  { %v1674_v29 = vpop.f32.mrb[28].mxu0 }
 0x8c2   :  { %v1675_v41 = vadd.f32 %v1674_v29, %v3306_v43  ;;  %v1676_v46 = vpop.f32.mrb[29].mxu0 }
 0x8c3   :  { %v1677_v58 = vadd.f32 %v1676_v46, %v3306_v43 }
 0x8c4   :  { %v1684_v34 = vmul.f32 %v1675_v41, %v3308_v55 }
 0x8c5   :  { %v1685_v9 = vmul.f32 %v1677_v58, %v3308_v55  ;;  %v3617_v55 = vld [vmem:[%s3775_s5 + $0x8] sm:$0xff] }
 0x8c7   :  { %v1688_v11 = vcombine.low %v1684_v34, %v1685_v9 }
 0x8c9   :  { %v1690_v18 = vadd.f32 %v1688_v11, %v1681_v54 }
 0x8cb   :  { %v3599_v0 = vadd.f32 %v1695_v16, %v1690_v18 }
 0x8cd   :  { %v1698_v19 = vcombine.high %v3599_v0, %v3599_v0 }
 0x8cf   :  { %2668 = vmatprep.subr.msk.mxu0 %vm73_vm0, %v1698_v19 }
 0x8d0   :  { %2669 = vmatpush1.msk.msra.mxu0 %vm73_vm0, %v3599_v0 }
 0x8d1   :  { %2670 = vmatmul.mubr.msk.f32.vlgmr.msra.gmra.mrb[30].mxu0 %vm60_vm1, %v3609_v14 }
 0x8d2   :  { %1773 = vmatprep.mubr.f32.mxu0 %v3089_v4 }
 0x8d5   :  { %2671 = vmatmul.mubr.msk.f32.gmra.mrb[32].mxu0 %vm60_vm1, %v3617_v55 }
 0x8d6   :  { %1779 = vmatprep.mubr.f32.mxu0 %v3089_v4 }
 0x8d9   :  { %2672 = vmatmul.mubr.msk.f32.gmra.mrb[34].mxu0 %vm60_vm1, %v3625_v12 }
 0x8da   :  { %1785 = vmatprep.mubr.f32.mxu0 %v3089_v4 }
 0x8dd   :  { %2673 = vmatmul.mubr.msk.f32.gmra.mrb[36].mxu0 %vm60_vm1, %v3633_v5 }
 0x8de   :  { %2232 = vmatprep.mubr.f32.mxu0 %v3089_v4 }
 0x9a4   :  { %v1769_v22 = vpop.f32.mrb[30].mxu0 }
 0x9a5   :  { %v1792_v25 = vadd.f32 %v1769_v22, %v3537_v10  ;;  %v1771_v30 = vpop.f32.mrb[31].mxu0 }
 0x9a6   :  { %v1793_v32 = vadd.f32 %v1771_v30, %v3540_v15 }
 0x9a7   :  { %v3640_v20 = vadd.f32 %v1807_v31, %v1792_v25 }
 0x9a8   :  { %v3642_v35 = vadd.f32 %v1807_v31, %v1793_v32  ;;  %v1775_v39 = vpop.f32.mrb[32].mxu0 }
 0x9a9   :  { %v2678_v45 = vmul.f32 -1.442695, %v3640_v20  ;;  %v1794_v49 = vadd.f32 %v1775_v39, %v3552_v17  ;;  %v1777_v13 = vpop.f32.mrb[33].mxu0 }
 0x9aa   :  { %v2679_v59 = vmul.f32 -1.442695, %v3642_v35  ;;  %v1795_v26 = vadd.f32 %v1777_v13, %v3556_v21 }
 0x9ab   :  { %2969 = vpow2.f32 %v2678_v45  ;;  %v1826_v40 = vadd.f32 %v1812_v57, %v1794_v49 }
 0x9ac   :  { %2971 = vpow2.f32 %v2679_v59  ;;  %v1827_v44 = vadd.f32 %v1812_v57, %v1795_v26  ;;  %v1781_v48 = vpop.f32.mrb[34].mxu0 }
 0x9ad   :  { %v2680_v62 = vmul.f32 -1.442695, %v1826_v40  ;;  %v1796_v27 = vadd.f32 %v1781_v48, %v3562_v47  ;;  %v1783_v51 = vpop.f32.mrb[35].mxu0 }
 0x9ae   :  { %v2681_v60 = vmul.f32 -1.442695, %v1827_v44  ;;  %v1797_v50 = vadd.f32 %v1783_v51, %v3566_v36 }
 0x9af   :  { %2973 = vpow2.f32 %v2680_v62  ;;  %v1828_v53 = vadd.f32 %v1817_v56, %v1796_v27 }
 0x9b0   :  { %2975 = vpow2.f32 %v2681_v60  ;;  %v1829_v38 = vadd.f32 %v1817_v56, %v1797_v50  ;;  %v1787_v7 = vpop.f32.mrb[36].mxu0 }
 0x9b1   :  { %v2682_v29 = vmul.f32 -1.442695, %v1828_v53  ;;  %v1798_v41 = vadd.f32 %v1787_v7, %v3569_v42  ;;  %v1789_v46 = vpop.f32.mrb[37].mxu0 }
 0x9b2   :  { %v2683_v58 = vmul.f32 -1.442695, %v1829_v38  ;;  %v1799_v34 = vadd.f32 %v1789_v46, %v3572_v63 }
 0x9b3   :  { %2977 = vpow2.f32 %v2682_v29  ;;  %v1830_v52 = vadd.f32 %v1822_v61, %v1798_v41 }
 0x9b4   :  { %2979 = vpow2.f32 %v2683_v58  ;;  %v1831_v54 = vadd.f32 %v1822_v61, %v1799_v34 }
 0x9b5   :  { %v2970_v9 = vpop.eup %2969  ;;  %v2684_v11 = vmul.f32 -1.442695, %v1830_v52 }
 0x9b6   :  { %v2972_v16 = vpop.eup %2971  ;;  %v1856_v18 = vadd.f32 1.0, %v2970_v9  ;;  %v2685_v19 = vmul.f32 -1.442695, %v1831_v54 }
 0x9b7   :  { %v1857_v22 = vadd.f32 1.0, %v2972_v16  ;;  %2981 = vpow2.f32 %v2684_v11 }
 0x9b8   :  { %2983 = vrcp.f32 %v1856_v18 }
 0x9b9   :  { %v2974_v25 = vpop.eup %2973  ;;  %2985 = vpow2.f32 %v2685_v19 }
 0x9ba   :  { %v2976_v30 = vpop.eup %2975  ;;  %v1858_v31 = vadd.f32 1.0, %v2974_v25  ;;  %2987 = vrcp.f32 %v1857_v22  ;;  %v1961_v25 = vmul.f32 %v3599_v0, %v732_v6  ;;  %v2087_v0 = vpop.permute.xlu1 %2086 }
 0x9bb   :  { %v1859_v32 = vadd.f32 1.0, %v2976_v30 }
 0x9bc   :  { %2989 = vrcp.f32 %v1858_v31 }
 0x9bd   :  { %v2978_v39 = vpop.eup %2977  ;;  %2991 = vrcp.f32 %v1859_v32 }
 0x9be   :  { %v2980_v45 = vpop.eup %2979  ;;  %v1860_v49 = vadd.f32 1.0, %v2978_v39 }
 0x9bf   :  { %v1861_v57 = vadd.f32 1.0, %v2980_v45 }
 0x9c0   :  { %2993 = vrcp.f32 %v1860_v49 }
 0x9c1   :  { %v2982_v13 = vpop.eup %2981 }
 0x9c2   :  { %v1862_v59 = vadd.f32 1.0, %v2982_v13  ;;  %v2984_v26 = vpop.eup %2983 }
 0x9c3   :  { %v2986_v48 = vpop.eup %2985  ;;  %v1880_v60 = vmul.f32 %v2984_v26, %v3640_v20 }
 0x9c4   :  { %2995 = vrcp.f32 %v1862_v59  ;;  %v2988_v62 = vpop.eup %2987  ;;  %v1863_v27 = vadd.f32 1.0, %v2986_v48 }
 0x9c5   :  { %2997 = vrcp.f32 %v1861_v57  ;;  %v1881_v7 = vmul.f32 %v2988_v62, %v3642_v35 }
 0x9c6   :  { %v2990_v51 = vpop.eup %2989  ;;  %2999 = vrcp.f32 %v1863_v27  ;;  %v2092_v27 = vpop.permute.xlu0 %2091 }
 0x9c7   :  { %v2992_v56 = vpop.eup %2991  ;;  %v1882_v50 = vmul.f32 %v2990_v51, %v1826_v40 }
 0x9c8   :  { %v1883_v29 = vmul.f32 %v2992_v56, %v1827_v44 }
 0x9c9   :  { %v2780_v41 = vpack.c.bf16 %v1882_v50, %v1880_v60 }
 0x9ca   :  { %v2778_v46 = vpack.c.bf16 %v1883_v29, %v1881_v7  ;;  %v2994_v61 = vpop.eup %2993 }
 0x9cb   :  { %v1884_v9 = vmul.f32 %v2994_v61, %v1828_v53  ;;  %v2097_v61 = vpop.permute.xlu1 %2096 }
 0x9cc   :  { %2779 = vmatprep.subr.bf16.mxu1 %v2778_v46 }
 0x9cd   :  { %2781 = vmatpush1.bf16.msra.mxu1 %v2780_v41 }
 0x9ce   :  { %v2996_v58 = vpop.eup %2995 }
 0x9cf   :  { %v2998_v34 = vpop.eup %2997  ;;  %v1886_v11 = vmul.f32 %v2996_v58, %v1830_v52 }
 0x9d0   :  { %v3000_v16 = vpop.eup %2999  ;;  %v1885_v19 = vmul.f32 %v2998_v34, %v1829_v38  ;;  %v2690_v38 = vld [vmem:[%s3773_s3 + $0x18] sm:$0xff] }
 0x9d1   :  { %v2784_v18 = vpack.c.bf16 %v1886_v11, %v1884_v9  ;;  %v1887_v20 = vmul.f32 %v3000_v16, %v1831_v54  ;;  %v1975_v31 = vmul.f32 %v2690_v38, %v746_v1 }
 0x9d3   :  { %v2782_v40 = vpack.c.bf16 %v1887_v20, %v1885_v19 }
 0x9d5   :  { %2783 = vmatprep.subr.bf16.mxu1 %v2782_v40  ;;  %v2102_v40 = vpop.permute.xlu0 %2101 }
 0x9d6   :  { %2785 = vmatpush1.bf16.msra.mxu1 %v2784_v18 }
 0x9d9   :  { %2686 = vmatmul.mubr.msk.f32.vlgmr.msra.gmra.mrb[36].mxu1 %vm376_vm2, %v3584_v24 }
 0x9da   :  { %2047 = vmatprep.mubr.f32.mxu1 %v3089_v4 }
 0xaac   :  { %v1954_v35 = vpop.f32.mrb[36].mxu1 }
 0xaad   :  { %v1955_v44 = vadd.f32 %v1954_v35, %v3306_v43  ;;  %v1956_v22 = vpop.f32.mrb[37].mxu1 }
 0xaae   :  { %v1957_v53 = vadd.f32 %v1956_v22, %v3306_v43 }
 0xaaf   :  { %v1964_v52 = vmul.f32 %v1955_v44, %v3363_v28 }
 0xab0   :  { %v1965_v54 = vmul.f32 %v1957_v53, %v3363_v28 }
 0xab2   :  { %v1968_v30 = vcombine.low %v1964_v52, %v1965_v54 }
 0xab4   :  { %v1970_v32 = vadd.f32 %v1968_v30, %v1961_v25 }
 0xab6   :  { %v3669_v39 = vadd.f32 %v1975_v31, %v1970_v32 }
 0xab8   :  { %v1978_v45 = vcombine.high %v3669_v39, %v3669_v39 }
 0xaba   :  { %2691 = vmatprep.subr.msk.mxu1 %vm73_vm0, %v1978_v45 }
 0xabb   :  { %2692 = vmatpush1.msk.msra.mxu1 %vm73_vm0, %v3669_v39 }
 0xabc   :  { %2693 = vmatmul.mubr.msk.f32.vlgmr.msra.gmra.mrb[38].mxu1 %vm60_vm1, %v3609_v14 }
 0xabd   :  { %2053 = vmatprep.mubr.f32.mxu1 %v3089_v4 }
 0xac0   :  { %2694 = vmatmul.mubr.msk.f32.gmra.mrb[40].mxu1 %vm60_vm1, %v3617_v55 }
 0xac1   :  { %2059 = vmatprep.mubr.f32.mxu1 %v3089_v4 }
 0xac4   :  { %2695 = vmatmul.mubr.msk.f32.gmra.mrb[42].mxu1 %vm60_vm1, %v3625_v12 }
 0xac5   :  { %2065 = vmatprep.mubr.f32.mxu1 %v3089_v4 }
 0xac8   :  { %2696 = vmatmul.mubr.msk.f32.gmra.mrb[44].mxu1 %vm60_vm1, %v3633_v5 }
 0xac9   :  { %2512 = vmatprep.mubr.f32.mxu1 %v3089_v4 }
 0xb8f   :  { %v2049_v28 = vpop.f32.mrb[38].mxu1 }
 0xb90   :  { %v2072_v6 = vadd.f32 %v2049_v28, %v3537_v10  ;;  %v2051_v1 = vpop.f32.mrb[39].mxu1 }
 0xb91   :  { %v2073_v49 = vadd.f32 %v2051_v1, %v3540_v15 }
 0xb92   :  { %v3690_v13 = vadd.f32 %v2087_v0, %v2072_v6 }
 0xb93   :  { %v3692_v57 = vadd.f32 %v2087_v0, %v2073_v49  ;;  %v2055_v59 = vpop.f32.mrb[40].mxu1 }
 0xb94   :  { %v2701_v26 = vmul.f32 -1.442695, %v3690_v13  ;;  %v2074_v48 = vadd.f32 %v2055_v59, %v3552_v17  ;;  %v2057_v62 = vpop.f32.mrb[41].mxu1 }
 0xb95   :  { %v2702_v51 = vmul.f32 -1.442695, %v3692_v57  ;;  %v2075_v56 = vadd.f32 %v2057_v62, %v3556_v21 }
 0xb96   :  { %3001 = vpow2.f32 %v2701_v26  ;;  %v2106_v60 = vadd.f32 %v2092_v27, %v2074_v48 }
 0xb97   :  { %3003 = vpow2.f32 %v2702_v51  ;;  %v2107_v50 = vadd.f32 %v2092_v27, %v2075_v56  ;;  %v2061_v7 = vpop.f32.mrb[42].mxu1 }
 0xb98   :  { %v2703_v29 = vmul.f32 -1.442695, %v2106_v60  ;;  %v2076_v41 = vadd.f32 %v2061_v7, %v3562_v47  ;;  %v2063_v46 = vpop.f32.mrb[43].mxu1 }
 0xb99   :  { %v2704_v58 = vmul.f32 -1.442695, %v2107_v50  ;;  %v2077_v34 = vadd.f32 %v2063_v46, %v3566_v36 }
 0xb9a   :  { %3005 = vpow2.f32 %v2703_v29  ;;  %v2108_v9 = vadd.f32 %v2097_v61, %v2076_v41 }
 0xb9b   :  { %3007 = vpow2.f32 %v2704_v58  ;;  %v2109_v11 = vadd.f32 %v2097_v61, %v2077_v34  ;;  %v2067_v16 = vpop.f32.mrb[44].mxu1 }
 0xb9c   :  { %v2705_v18 = vmul.f32 -1.442695, %v2108_v9  ;;  %v2078_v19 = vadd.f32 %v2067_v16, %v3569_v42  ;;  %v2069_v20 = vpop.f32.mrb[45].mxu1 }
 0xb9d   :  { %v2706_v35 = vmul.f32 -1.442695, %v2109_v11  ;;  %v2079_v44 = vadd.f32 %v2069_v20, %v3572_v63 }
 0xb9e   :  { %3009 = vpow2.f32 %v2705_v18  ;;  %v2110_v22 = vadd.f32 %v2102_v40, %v2078_v19 }
 0xb9f   :  { %3011 = vpow2.f32 %v2706_v35  ;;  %v2111_v53 = vadd.f32 %v2102_v40, %v2079_v44 }
 0xba0   :  { %v3002_v52 = vpop.eup %3001  ;;  %v2707_v38 = vmul.f32 -1.442695, %v2110_v22 }
 0xba1   :  { %v3004_v54 = vpop.eup %3003  ;;  %v2136_v25 = vadd.f32 1.0, %v3002_v52  ;;  %v2708_v30 = vmul.f32 -1.442695, %v2111_v53 }
 0xba2   :  { %v2137_v31 = vadd.f32 1.0, %v3004_v54  ;;  %3013 = vpow2.f32 %v2707_v38 }
 0xba3   :  { %3015 = vrcp.f32 %v2136_v25  ;;  %v2241_v25 = vmul.f32 %v3669_v39, %v1013_v37 }
 0xba4   :  { %v3006_v32 = vpop.eup %3005  ;;  %3017 = vpow2.f32 %v2708_v30 }
 0xba5   :  { %v3008_v45 = vpop.eup %3007  ;;  %v2138_v28 = vadd.f32 1.0, %v3006_v32  ;;  %3019 = vrcp.f32 %v2137_v31 }
 0xba6   :  { %v2139_v6 = vadd.f32 1.0, %v3008_v45 }
 0xba7   :  { %3021 = vrcp.f32 %v2138_v28 }
 0xba8   :  { %v3010_v1 = vpop.eup %3009  ;;  %3023 = vrcp.f32 %v2139_v6 }
 0xba9   :  { %v3012_v0 = vpop.eup %3011  ;;  %v2140_v49 = vadd.f32 1.0, %v3010_v1 }
 0xbaa   :  { %v2141_v26 = vadd.f32 1.0, %v3012_v0 }
 0xbab   :  { %3025 = vrcp.f32 %v2140_v49  ;;  %v2372_v49 = vpop.permute.xlu0 %2371 }
 0xbac   :  { %v3014_v59 = vpop.eup %3013 }
 0xbad   :  { %v2142_v48 = vadd.f32 1.0, %v3014_v59  ;;  %v3016_v62 = vpop.eup %3015 }
 0xbae   :  { %v3018_v27 = vpop.eup %3017  ;;  %v2160_v41 = vmul.f32 %v3016_v62, %v3690_v13 }
 0xbaf   :  { %3027 = vrcp.f32 %v2142_v48  ;;  %v3020_v51 = vpop.eup %3019  ;;  %v2143_v56 = vadd.f32 1.0, %v3018_v27 }
 0xbb0   :  { %3029 = vrcp.f32 %v2141_v26  ;;  %v2161_v61 = vmul.f32 %v3020_v51, %v3692_v57 }
 0xbb1   :  { %v3022_v7 = vpop.eup %3021  ;;  %3031 = vrcp.f32 %v2143_v56 }
 0xbb2   :  { %v3024_v29 = vpop.eup %3023  ;;  %v2162_v46 = vmul.f32 %v3022_v7, %v2106_v60 }
 0xbb3   :  { %v2163_v58 = vmul.f32 %v3024_v29, %v2107_v50 }
 0xbb4   :  { %v2788_v34 = vpack.c.bf16 %v2162_v46, %v2160_v41 }
 0xbb5   :  { %v2786_v16 = vpack.c.bf16 %v2163_v58, %v2161_v61  ;;  %v3026_v18 = vpop.eup %3025  ;;  %v2382_v58 = vpop.permute.xlu0 %2381 }
 0xbb6   :  { %v2164_v40 = vmul.f32 %v3026_v18, %v2108_v9 }
 0xbb7   :  { %2787 = vmatprep.subr.bf16.mxu0 %v2786_v16 }
 0xbb8   :  { %2789 = vmatpush1.bf16.msra.mxu0 %v2788_v34 }
 0xbb9   :  { %v3028_v19 = vpop.eup %3027 }
 0xbba   :  { %v3030_v20 = vpop.eup %3029  ;;  %v2166_v35 = vmul.f32 %v3028_v19, %v2110_v22 }
 0xbbb   :  { %v3032_v44 = vpop.eup %3031  ;;  %v2165_v38 = vmul.f32 %v3030_v20, %v2109_v11  ;;  %v2713_v11 = vld [vmem:[%s3773_s3 + $0x28] sm:$0xff] }
 0xbbc   :  { %v2792_v52 = vpack.c.bf16 %v2166_v35, %v2164_v40  ;;  %v2167_v13 = vmul.f32 %v3032_v44, %v2111_v53  ;;  %v2255_v31 = vmul.f32 %v2713_v11, %v1027_v2 }
 0xbbe   :  { %v2790_v60 = vpack.c.bf16 %v2167_v13, %v2165_v38 }
 0xbc0   :  { %2791 = vmatprep.subr.bf16.mxu0 %v2790_v60 }
 0xbc1   :  { %2793 = vmatpush1.bf16.msra.mxu0 %v2792_v52 }
 0xbc4   :  { %2709 = vmatmul.mubr.msk.f32.vlgmr.msra.gmra.mrb[38].mxu0 %vm376_vm2, %v3584_v24 }
 0xbc5   :  { %2327 = vmatprep.mubr.f32.mxu0 %v3089_v4 }
 0xc97   :  { %v2234_v57 = vpop.f32.mrb[38].mxu0 }
 0xc98   :  { %v2235_v50 = vadd.f32 %v2234_v57, %v3306_v43  ;;  %v2236_v54 = vpop.f32.mrb[39].mxu0 }
 0xc99   :  { %v2237_v9 = vadd.f32 %v2236_v54, %v3306_v43 }
 0xc9a   :  { %v2244_v22 = vmul.f32 %v2235_v50, %v3421_v23 }
 0xc9b   :  { %v2245_v53 = vmul.f32 %v2237_v9, %v3421_v23 }
 0xc9d   :  { %v2248_v30 = vcombine.low %v2244_v22, %v2245_v53 }
 0xc9f   :  { %v2250_v32 = vadd.f32 %v2248_v30, %v2241_v25 }
 0xca1   :  { %v3719_v45 = vadd.f32 %v2255_v31, %v2250_v32 }
 0xca3   :  { %v2258_v28 = vcombine.high %v3719_v45, %v3719_v45 }
 0xca5   :  { %2714 = vmatprep.subr.msk.mxu0 %vm73_vm0, %v2258_v28 }
 0xca6   :  { %2715 = vmatpush1.msk.msra.mxu0 %vm73_vm0, %v3719_v45 }
 0xca7   :  { %2716 = vmatmul.mubr.msk.f32.vlgmr.msra.gmra.mrb[40].mxu0 %vm60_vm1, %v3609_v14  ;;  %v2367_v14 = vpop.permute.xlu1 %2366 }
 0xca8   :  { %2333 = vmatprep.mubr.f32.mxu0 %v3089_v4 }
 0xcab   :  { %2717 = vmatmul.mubr.msk.f32.gmra.mrb[42].mxu0 %vm60_vm1, %v3617_v55  ;;  %v2377_v51 = vpop.permute.xlu1 %2376 }
 0xcac   :  { %2339 = vmatprep.mubr.f32.mxu0 %v3089_v4 }
 0xcaf   :  { %2718 = vmatmul.mubr.msk.f32.gmra.mrb[44].mxu0 %vm60_vm1, %v3625_v12 }
 0xcb0   :  { %2345 = vmatprep.mubr.f32.mxu0 %v3089_v4 }
 0xcb3   :  { %2719 = vmatmul.mubr.msk.f32.gmra.mrb[46].mxu0 %vm60_vm1, %v3633_v5 }
 0xd7a   :  { %v2329_v23 = vpop.f32.mrb[40].mxu0 }
 0xd7b   :  { %v2352_v37 = vadd.f32 %v2329_v23, %v3537_v10  ;;  %v2331_v2 = vpop.f32.mrb[41].mxu0 }
 0xd7c   :  { %v2353_v39 = vadd.f32 %v2331_v2, %v3540_v15 }
 0xd7d   :  { %v3739_v6 = vadd.f32 %v2367_v14, %v2352_v37 }
 0xd7e   :  { %v3741_v55 = vadd.f32 %v2367_v14, %v2353_v39  ;;  %v2335_v1 = vpop.f32.mrb[42].mxu0 }
 0xd7f   :  { %v2724_v0 = vmul.f32 -1.442695, %v3739_v6  ;;  %v2354_v12 = vadd.f32 %v2335_v1, %v3552_v17  ;;  %v2337_v4 = vpop.f32.mrb[43].mxu0 }
 0xd80   :  { %v2725_v5 = vmul.f32 -1.442695, %v3741_v55  ;;  %v2355_v59 = vadd.f32 %v2337_v4, %v3556_v21 }
 0xd81   :  { %3033 = vpow2.f32 %v2724_v0  ;;  %v2386_v10 = vadd.f32 %v2372_v49, %v2354_v12 }
 0xd82   :  { %3035 = vpow2.f32 %v2725_v5  ;;  %v2387_v26 = vadd.f32 %v2372_v49, %v2355_v59  ;;  %v2341_v15 = vpop.f32.mrb[44].mxu0 }
 0xd83   :  { %v2726_v48 = vmul.f32 -1.442695, %v2386_v10  ;;  %v2356_v62 = vadd.f32 %v2341_v15, %v3562_v47  ;;  %v2343_v27 = vpop.f32.mrb[45].mxu0 }
 0xd84   :  { %v2727_v56 = vmul.f32 -1.442695, %v2387_v26  ;;  %v2357_v7 = vadd.f32 %v2343_v27, %v3566_v36  ;;  %v2736_v27 = vld [vmem:[%s3773_s3 + $0x38] sm:$0xff] }
 0xd85   :  { %3037 = vpow2.f32 %v2726_v48  ;;  %v2388_v17 = vadd.f32 %v2377_v51, %v2356_v62 }
 0xd86   :  { %3039 = vpow2.f32 %v2727_v56  ;;  %v2389_v29 = vadd.f32 %v2377_v51, %v2357_v7  ;;  %v2347_v41 = vpop.f32.mrb[46].mxu0  ;;  %v2521_v56 = vmul.f32 %v3719_v45, %v1294_v3 }
 0xd87   :  { %v2728_v46 = vmul.f32 -1.442695, %v2388_v17  ;;  %v2358_v21 = vadd.f32 %v2347_v41, %v3569_v42  ;;  %v2349_v61 = vpop.f32.mrb[47].mxu0 }
 0xd88   :  { %v2729_v34 = vmul.f32 -1.442695, %v2389_v29  ;;  %v2359_v16 = vadd.f32 %v2349_v61, %v3572_v63 }
 0xd89   :  { %3041 = vpow2.f32 %v2728_v46  ;;  %v2390_v47 = vadd.f32 %v2382_v58, %v2358_v21 }
 0xd8a   :  { %3043 = vpow2.f32 %v2729_v34  ;;  %v2391_v18 = vadd.f32 %v2382_v58, %v2359_v16 }
 0xd8b   :  { %v3034_v19 = vpop.eup %3033  ;;  %v2730_v20 = vmul.f32 -1.442695, %v2390_v47 }
 0xd8c   :  { %v3036_v36 = vpop.eup %3035  ;;  %v2416_v40 = vadd.f32 1.0, %v3034_v19  ;;  %v2731_v35 = vmul.f32 -1.442695, %v2391_v18 }
 0xd8d   :  { %v2417_v44 = vadd.f32 1.0, %v3036_v36  ;;  %3045 = vpow2.f32 %v2730_v20 }
 0xd8e   :  { %3047 = vrcp.f32 %v2416_v40 }
 0xd8f   :  { %v3038_v52 = vpop.eup %3037  ;;  %3049 = vpow2.f32 %v2731_v35 }
 0xd90   :  { %v3040_v38 = vpop.eup %3039  ;;  %v2418_v42 = vadd.f32 1.0, %v3038_v52  ;;  %3051 = vrcp.f32 %v2417_v44 }
 0xd91   :  { %v2419_v13 = vadd.f32 1.0, %v3040_v38 }
 0xd92   :  { %3053 = vrcp.f32 %v2418_v42 }
 0xd93   :  { %v3042_v63 = vpop.eup %3041  ;;  %3055 = vrcp.f32 %v2419_v13 }
 0xd94   :  { %v3044_v60 = vpop.eup %3043  ;;  %v2420_v57 = vadd.f32 1.0, %v3042_v63 }
 0xd95   :  { %v2421_v54 = vadd.f32 1.0, %v3044_v60 }
 0xd96   :  { %3057 = vrcp.f32 %v2420_v57 }
 0xd97   :  { %v3046_v50 = vpop.eup %3045 }
 0xd98   :  { %v2422_v9 = vadd.f32 1.0, %v3046_v50  ;;  %v3048_v22 = vpop.eup %3047 }
 0xd99   :  { %v3050_v11 = vpop.eup %3049  ;;  %v2440_v32 = vmul.f32 %v3048_v22, %v3739_v6 }
 0xd9a   :  { %3059 = vrcp.f32 %v2422_v9  ;;  %v3052_v53 = vpop.eup %3051  ;;  %v2423_v25 = vadd.f32 1.0, %v3050_v11 }
 0xd9b   :  { %3061 = vrcp.f32 %v2421_v54  ;;  %v2441_v23 = vmul.f32 %v3052_v53, %v3741_v55 }
 0xd9c   :  { %v3054_v30 = vpop.eup %3053  ;;  %3063 = vrcp.f32 %v2423_v25 }
 0xd9d   :  { %v3056_v31 = vpop.eup %3055  ;;  %v2442_v28 = vmul.f32 %v3054_v30, %v2386_v10 }
 0xd9e   :  { %v2443_v37 = vmul.f32 %v3056_v31, %v2387_v26 }
 0xd9f   :  { %v2796_v2 = vpack.c.bf16 %v2442_v28, %v2440_v32 }
 0xda0   :  { %v2794_v14 = vpack.c.bf16 %v2443_v37, %v2441_v23  ;;  %v3058_v39 = vpop.eup %3057 }
 0xda1   :  { %v2444_v12 = vmul.f32 %v3058_v39, %v2388_v17 }
 0xda2   :  { %2795 = vmatprep.subr.bf16.mxu1 %v2794_v14 }
 0xda3   :  { %2797 = vmatpush1.bf16.msra.mxu1 %v2796_v2 }
 0xda4   :  { %v3060_v1 = vpop.eup %3059 }
 0xda5   :  { %v3062_v0 = vpop.eup %3061  ;;  %v2446_v4 = vmul.f32 %v3060_v1, %v2390_v47 }
 0xda6   :  { %v3064_v49 = vpop.eup %3063  ;;  %v2445_v59 = vmul.f32 %v3062_v0, %v2389_v29 }
 0xda7   :  { %v2800_v5 = vpack.c.bf16 %v2446_v4, %v2444_v12  ;;  %v2447_v6 = vmul.f32 %v3064_v49, %v2391_v18 }
 0xda9   :  { %v2798_v10 = vpack.c.bf16 %v2447_v6, %v2445_v59 }
 0xdab   :  { %2799 = vmatprep.subr.bf16.mxu1 %v2798_v10 }
 0xdac   :  { %2801 = vmatpush1.bf16.msra.mxu1 %v2800_v5 }
 0xdaf   :  { %2732 = vmatmul.mubr.msk.f32.vlgmr.msra.gmra.mrb[46].mxu1 %vm376_vm2, %v3584_v24  ;;  %v2535_v24 = vmul.f32 %v2736_v27, %v1308_v8 }
 0xe82   :  { %v2514_v55 = vpop.f32.mrb[46].mxu1 }
 0xe83   :  { %v2515_v26 = vadd.f32 %v2514_v55, %v3306_v43  ;;  %v2516_v15 = vpop.f32.mrb[47].mxu1 }
 0xe84   :  { %v2517_v48 = vadd.f32 %v2516_v15, %v3306_v43 }
 0xe85   :  { %v2524_v62 = vmul.f32 %v2515_v26, %v3526_v33 }
 0xe86   :  { %v2525_v51 = vmul.f32 %v2517_v48, %v3526_v33 }
 0xe88   :  { %v2528_v7 = vcombine.low %v2524_v62, %v2525_v51 }
 0xe8a   :  { %v2530_v17 = vadd.f32 %v2528_v7, %v2521_v56 }
 0xe8c   :  { %v2536_v29 = vadd.f32 %v2535_v24, %v2530_v17 }
 0xe8e   :  { %v2537_v41 = vadd.f32 1.0, %v2536_v29 }
 0xe90   :  { %v2538_v46 = vmul.f32 0.5, %v2537_v41 }
 0xe92   :  { %v2539_v21 = vmax.f32 %v2538_v46, 0.0 }
 0xe94   :  { %v2540_v43 = vmin.f32 %v2539_v21, 1.0 }
 0xe96   :  { %2737 = vst [vmem:[%s3779_s9 + $0x8] sm:$0xff] %v2540_v43 }
 0xe97   :  { %2547 = vsyncpa [#allocation3], 1 }

</bundles_post_ra>
